<compile_context>
chip_gen: v6e
topology: v6e:2x2x1
jax: 0.10.0
libtpu: 0.0.40
codegen_flags: <defaults>
</compile_context>

<pallas_src>
import functools
import math

import jax
import jax.numpy as jnp
from jax.experimental import pallas as pl

# ----------------------------- config ---------------------------------------
VOCAB = 512
HIDDEN = 128
N_LAYERS = 2
N_HEADS = 4
HEAD_DIM = HIDDEN // N_HEADS
INTERMEDIATE = 512
MAX_POS = 32
TYPE_VOCAB = 2
LN_EPS = 1e-12


# ----------------------------- fused kernel ---------------------------------
def _bert_kernel(
    emb_ref, mask_ref,
    emb_ln_g_ref, emb_ln_b_ref,
    qkv_w_ref, qkv_b_ref, o_w_ref, o_b_ref, ln1_g_ref, ln1_b_ref,
    ff1_w_ref, ff1_b_ref, ff2_w_ref, ff2_b_ref, ln2_g_ref, ln2_b_ref,
    pool_w_ref, pool_b_ref, nsp_w_ref, nsp_b_ref,
    mlm_w_ref, mlm_b_ref, mlm_ln_g_ref, mlm_ln_b_ref,
    dec_wt_ref, dec_b_ref,
    pred_ref, nsp_out_ref,
    *, batch, seq,
):
    def ln(x, g, b):
        mu = jnp.mean(x, axis=-1, keepdims=True)
        d = x - mu
        var = jnp.mean(d * d, axis=-1, keepdims=True)
        return d * jax.lax.rsqrt(var + LN_EPS) * g + b

    def mm(x_f32, w_bf16):
        # bf16 MXU inputs, f32 accumulation.
        return jnp.dot(x_f32.astype(jnp.bfloat16), w_bf16,
                       preferred_element_type=jnp.float32)

    def gelu(y):
        # TODO(synk): original BERT uses erf-GELU; tanh approximation used for
        # Mosaic-safe elementwise lowering (EUP tanh).
        return 0.5 * y * (1.0 + jnp.tanh(
            0.7978845608028654 * (y + 0.044715 * y * y * y)))

    x = ln(emb_ref[...], emb_ln_g_ref[...], emb_ln_b_ref[...])   # (M, H) f32
    mask = mask_ref[...]                                          # (M, M) additive
    scale = 1.0 / math.sqrt(HEAD_DIM)

    for l in range(N_LAYERS):  # static unroll; weights stay VMEM-resident
        # ---- fused QKV projection: one (M,H) x (H,3H) matmul ----
        qkv = mm(x, qkv_w_ref[l]) + qkv_b_ref[l]                  # (M, 3H)

        # ---- attention (per head, full row block; cross-batch blocked by mask)
        ctx_heads = []
        for h in range(N_HEADS):
            lo = h * HEAD_DIM
            qh = qkv[:, lo:lo + HEAD_DIM].astype(jnp.bfloat16)
            kh = qkv[:, HIDDEN + lo:HIDDEN + lo + HEAD_DIM].astype(jnp.bfloat16)
            vh = qkv[:, 2 * HIDDEN + lo:2 * HIDDEN + lo + HEAD_DIM].astype(jnp.bfloat16)
            # q @ k^T via dot_general contracting last axes (no in-VMEM transpose)
            s = jax.lax.dot_general(qh, kh, (((1,), (1,)), ((), ())),
                                    preferred_element_type=jnp.float32)
            s = s * scale + mask
            s = s - jnp.max(s, axis=-1, keepdims=True)
            p = jnp.exp(s)
            p = p * pl.reciprocal(jnp.sum(p, axis=-1, keepdims=True), approx=True)
            ctx_heads.append(jnp.dot(p.astype(jnp.bfloat16), vh,
                                     preferred_element_type=jnp.float32))
        ctx = jnp.concatenate(ctx_heads, axis=-1)                 # (M, H)

        # ---- output projection + residual + LN (fused) ----
        attn_out = mm(ctx, o_w_ref[l]) + o_b_ref[l]
        x = ln(attn_out + x, ln1_g_ref[l], ln1_b_ref[l])

        # ---- FFN (dense -> gelu -> dense) + residual + LN (fused) ----
        hmid = gelu(mm(x, ff1_w_ref[l]) + ff1_b_ref[l])           # (M, I)
        ffn = mm(hmid, ff2_w_ref[l]) + ff2_b_ref[l]               # (M, H)
        x = ln(ffn + x, ln2_g_ref[l], ln2_b_ref[l])

    # ---- MLM head: dense -> gelu -> LN -> tied decoder ----
    t = gelu(mm(x, mlm_w_ref[...]) + mlm_b_ref[...])
    t = ln(t, mlm_ln_g_ref[...], mlm_ln_b_ref[...])
    pred_ref[...] = mm(t, dec_wt_ref[...]) + dec_b_ref[...]       # (M, V)

    # ---- Pooler (first token -> dense -> tanh) + NSP head ----
    cls_rows = jnp.concatenate(
        [x[b * seq:b * seq + 1, :] for b in range(batch)], axis=0)  # (B, H)
    pooled = jnp.tanh(mm(cls_rows, pool_w_ref[...]) + pool_b_ref[...])
    nsp_out_ref[...] = mm(pooled, nsp_w_ref[...]) + nsp_b_ref[...]  # (B, 2)


# --------------------------- parameters --------------------------------------
def init_params(key):
    def nrm(k, shape):
        return (jax.random.normal(k, shape, jnp.float32) * 0.02).astype(jnp.float32)

    keys = iter(jax.random.split(key, 256))
    p = {
        "word_emb": nrm(next(keys), (VOCAB, HIDDEN)),
        "pos_emb": nrm(next(keys), (MAX_POS, HIDDEN)),
        "tok_emb": nrm(next(keys), (TYPE_VOCAB, HIDDEN)),
        "emb_ln_g": jnp.ones((HIDDEN,), jnp.float32),
        "emb_ln_b": jnp.zeros((HIDDEN,), jnp.float32),
        "layers": [],
        "pool_w": nrm(next(keys), (HIDDEN, HIDDEN)),
        "pool_b": jnp.zeros((HIDDEN,), jnp.float32),
        "mlm_w": nrm(next(keys), (HIDDEN, HIDDEN)),
        "mlm_b": jnp.zeros((HIDDEN,), jnp.float32),
        "mlm_ln_g": jnp.ones((HIDDEN,), jnp.float32),
        "mlm_ln_b": jnp.zeros((HIDDEN,), jnp.float32),
        "decoder_b": jnp.zeros((VOCAB,), jnp.float32),
        "nsp_w": nrm(next(keys), (HIDDEN, 2)),
        "nsp_b": jnp.zeros((2,), jnp.float32),
    }
    for _ in range(N_LAYERS):
        layer = {
            "q_w": nrm(next(keys), (HIDDEN, HIDDEN)), "q_b": jnp.zeros((HIDDEN,), jnp.float32),
            "k_w": nrm(next(keys), (HIDDEN, HIDDEN)), "k_b": jnp.zeros((HIDDEN,), jnp.float32),
            "v_w": nrm(next(keys), (HIDDEN, HIDDEN)), "v_b": jnp.zeros((HIDDEN,), jnp.float32),
            "o_w": nrm(next(keys), (HIDDEN, HIDDEN)), "o_b": jnp.zeros((HIDDEN,), jnp.float32),
            "ln1_g": jnp.ones((HIDDEN,), jnp.float32), "ln1_b": jnp.zeros((HIDDEN,), jnp.float32),
            "ff1_w": nrm(next(keys), (HIDDEN, INTERMEDIATE)),
            "ff1_b": jnp.zeros((INTERMEDIATE,), jnp.float32),
            "ff2_w": nrm(next(keys), (INTERMEDIATE, HIDDEN)),
            "ff2_b": jnp.zeros((HIDDEN,), jnp.float32),
            "ln2_g": jnp.ones((HIDDEN,), jnp.float32), "ln2_b": jnp.zeros((HIDDEN,), jnp.float32),
        }
        p["layers"].append(layer)
    return p


def prepare_params(p):
    """One-time conversion to kernel-ready layout:
    stacked per-layer weights, fused QKV, bf16 matmul weights, f32 (1,N) biases,
    decoder weight transposed ONCE (tied to word_emb)."""
    layers = p["layers"]
    L = len(layers)

    def row(v):
        return v.reshape(1, -1).astype(jnp.float32)

    def bf(v):
        return v.astype(jnp.bfloat16)

    def stack_row(key, width):
        return jnp.stack([l[key] for l in layers]).reshape(L, 1, width).astype(jnp.float32)

    qkv_w = jnp.stack([jnp.concatenate([l["q_w"], l["k_w"], l["v_w"]], axis=1)
                       for l in layers])                                  # (L, H, 3H)
    qkv_b = jnp.stack([jnp.concatenate([l["q_b"], l["k_b"], l["v_b"]], axis=0)
                       for l in layers]).reshape(L, 1, 3 * HIDDEN)

    return {
        "word_emb": p["word_emb"], "pos_emb": p["pos_emb"], "tok_emb": p["tok_emb"],
        "emb_ln_g": row(p["emb_ln_g"]), "emb_ln_b": row(p["emb_ln_b"]),
        "qkv_w": bf(qkv_w), "qkv_b": qkv_b.astype(jnp.float32),
        "o_w": bf(jnp.stack([l["o_w"] for l in layers])),
        "o_b": stack_row("o_b", HIDDEN),
        "ln1_g": stack_row("ln1_g", HIDDEN), "ln1_b": stack_row("ln1_b", HIDDEN),
        "ff1_w": bf(jnp.stack([l["ff1_w"] for l in layers])),
        "ff1_b": stack_row("ff1_b", INTERMEDIATE),
        "ff2_w": bf(jnp.stack([l["ff2_w"] for l in layers])),
        "ff2_b": stack_row("ff2_b", HIDDEN),
        "ln2_g": stack_row("ln2_g", HIDDEN), "ln2_b": stack_row("ln2_b", HIDDEN),
        "pool_w": bf(p["pool_w"]), "pool_b": row(p["pool_b"]),
        "nsp_w": bf(p["nsp_w"]), "nsp_b": row(p["nsp_b"]),
        "mlm_w": bf(p["mlm_w"]), "mlm_b": row(p["mlm_b"]),
        "mlm_ln_g": row(p["mlm_ln_g"]), "mlm_ln_b": row(p["mlm_ln_b"]),
        "dec_wt": bf(p["word_emb"].T),        # tied decoder, transposed once
        "dec_b": row(p["decoder_b"]),
    }


# ----------------------------- forward ---------------------------------------
def bert_forward(pp, input_tokens, token_type_ids=None, attention_mask=None):
    """Returns (prediction_scores (B,S,V), seq_relationship_score (B,2))."""
    B, S = input_tokens.shape
    M = B * S
    if token_type_ids is None:
        token_type_ids = jnp.zeros_like(input_tokens)
    if attention_mask is None:
        attention_mask = jnp.ones_like(input_tokens)

    # --- embeddings (gather = plain-JAX glue; LN happens inside the kernel) ---
    we = jnp.take(pp["word_emb"], input_tokens, axis=0)            # (B,S,H)
    pe = pp["pos_emb"][:S]                                         # (S,H)
    te = jnp.take(pp["tok_emb"], token_type_ids, axis=0)           # (B,S,H)
    emb = (we + pe[None, :, :] + te).reshape(M, HIDDEN).astype(jnp.float32)

    # Combined additive mask (M, M): standard (1-m)*-10000 on the key axis
    # within a batch; a large negative block-diagonal penalty blocks
    # cross-batch attention so all (b, h) pairs can share one row block.
    key_bias = ((1.0 - attention_mask.astype(jnp.float32)) * -10000.0).reshape(M)
    bid = jnp.repeat(jnp.arange(B), S)
    same_batch = bid[:, None] == bid[None, :]
    mask = jnp.where(same_batch, key_bias[None, :], -1e9).astype(jnp.float32)

    kernel = functools.partial(_bert_kernel, batch=B, seq=S)
    pred, nsp = pl.pallas_call(
        kernel,
        out_shape=(jax.ShapeDtypeStruct((M, VOCAB), jnp.float32),
                   jax.ShapeDtypeStruct((B, 2), jnp.float32)),
    )(emb, mask,
      pp["emb_ln_g"], pp["emb_ln_b"],
      pp["qkv_w"], pp["qkv_b"], pp["o_w"], pp["o_b"], pp["ln1_g"], pp["ln1_b"],
      pp["ff1_w"], pp["ff1_b"], pp["ff2_w"], pp["ff2_b"], pp["ln2_g"], pp["ln2_b"],
      pp["pool_w"], pp["pool_b"], pp["nsp_w"], pp["nsp_b"],
      pp["mlm_w"], pp["mlm_b"], pp["mlm_ln_g"], pp["mlm_ln_b"],
      pp["dec_wt"], pp["dec_b"])

    return pred.reshape(B, S, VOCAB), nsp


# ------------------------------ main ------------------------------------------
if __name__ == "__main__":
    key = jax.random.PRNGKey(0)
    pkey, ikey, tkey = jax.random.split(key, 3)

    params = init_params(pkey)
    pp = prepare_params(params)        # one-time kernel-ready layout (incl. W^T)

    B, S = 2, 8
    input_tokens = jax.random.randint(ikey, (B, S), 0, VOCAB, dtype=jnp.int32)
    token_type_ids = jax.random.randint(tkey, (B, S), 0, TYPE_VOCAB, dtype=jnp.int32)
    attention_mask = jnp.ones((B, S), jnp.int32)

    fwd = jax.jit(bert_forward)
    pred_scores, seq_rel = fwd(pp, input_tokens, token_type_ids, attention_mask)
    jax.block_until_ready((pred_scores, seq_rel))

    assert pred_scores.shape == (B, S, VOCAB)
    assert seq_rel.shape == (B, 2)
    assert bool(jnp.all(jnp.isfinite(pred_scores))) and bool(jnp.all(jnp.isfinite(seq_rel)))
    print("KERNEL_OK")
</pallas_src>

<mosaic_0001>
module attributes {stable_mosaic.version = 11 : i64} {
  func.func @_bert_kernel(%arg0: memref<16x128xf32, #tpu.memory_space<vmem>>, %arg1: memref<16x16xf32, #tpu.memory_space<vmem>>, %arg2: memref<1x128xf32, #tpu.memory_space<vmem>>, %arg3: memref<1x128xf32, #tpu.memory_space<vmem>>, %arg4: memref<2x128x384xbf16, #tpu.memory_space<vmem>>, %arg5: memref<2x1x384xf32, #tpu.memory_space<vmem>>, %arg6: memref<2x128x128xbf16, #tpu.memory_space<vmem>>, %arg7: memref<2x1x128xf32, #tpu.memory_space<vmem>>, %arg8: memref<2x1x128xf32, #tpu.memory_space<vmem>>, %arg9: memref<2x1x128xf32, #tpu.memory_space<vmem>>, %arg10: memref<2x128x512xbf16, #tpu.memory_space<vmem>>, %arg11: memref<2x1x512xf32, #tpu.memory_space<vmem>>, %arg12: memref<2x512x128xbf16, #tpu.memory_space<vmem>>, %arg13: memref<2x1x128xf32, #tpu.memory_space<vmem>>, %arg14: memref<2x1x128xf32, #tpu.memory_space<vmem>>, %arg15: memref<2x1x128xf32, #tpu.memory_space<vmem>>, %arg16: memref<128x128xbf16, #tpu.memory_space<vmem>>, %arg17: memref<1x128xf32, #tpu.memory_space<vmem>>, %arg18: memref<128x2xbf16, #tpu.memory_space<vmem>>, %arg19: memref<1x2xf32, #tpu.memory_space<vmem>>, %arg20: memref<128x128xbf16, #tpu.memory_space<vmem>>, %arg21: memref<1x128xf32, #tpu.memory_space<vmem>>, %arg22: memref<1x128xf32, #tpu.memory_space<vmem>>, %arg23: memref<1x128xf32, #tpu.memory_space<vmem>>, %arg24: memref<128x512xbf16, #tpu.memory_space<vmem>>, %arg25: memref<1x512xf32, #tpu.memory_space<vmem>>, %arg26: memref<16x512xf32, #tpu.memory_space<vmem>>, %arg27: memref<2x2xf32, #tpu.memory_space<vmem>>) attributes {dimension_semantics = [], scalar_prefetch = 0 : i64, scratch_operands = 0 : i64, tpu.core_type = #tpu.core_type<tc>} {
    %c0 = arith.constant 0 : index
    %c0_0 = arith.constant 0 : index
    %0 = vector.load %arg0[%c0, %c0_0] : memref<16x128xf32, #tpu.memory_space<vmem>>, vector<16x128xf32>
    %c0_1 = arith.constant 0 : index
    %c0_2 = arith.constant 0 : index
    %1 = vector.load %arg2[%c0_1, %c0_2] : memref<1x128xf32, #tpu.memory_space<vmem>>, vector<1x128xf32>
    %c0_3 = arith.constant 0 : index
    %c0_4 = arith.constant 0 : index
    %2 = vector.load %arg3[%c0_3, %c0_4] : memref<1x128xf32, #tpu.memory_space<vmem>>, vector<1x128xf32>
    %cst = arith.constant dense<0.000000e+00> : vector<16xf32>
    %3 = vector.multi_reduction <add>, %0, %cst [1] : vector<16x128xf32> to vector<16xf32>
    %4 = vector.shape_cast %3 : vector<16xf32> to vector<16x1xf32>
    %cst_5 = arith.constant 1.280000e+02 : f32
    %5 = vector.broadcast %cst_5 : f32 to vector<16x1xf32>
    %6 = arith.divf %4, %5 : vector<16x1xf32>
    %7 = vector.broadcast %6 : vector<16x1xf32> to vector<16x128xf32>
    %8 = arith.subf %0, %7 : vector<16x128xf32>
    %9 = arith.mulf %8, %8 : vector<16x128xf32>
    %cst_6 = arith.constant dense<0.000000e+00> : vector<16xf32>
    %10 = vector.multi_reduction <add>, %9, %cst_6 [1] : vector<16x128xf32> to vector<16xf32>
    %11 = vector.shape_cast %10 : vector<16xf32> to vector<16x1xf32>
    %cst_7 = arith.constant 1.280000e+02 : f32
    %12 = vector.broadcast %cst_7 : f32 to vector<16x1xf32>
    %13 = arith.divf %11, %12 : vector<16x1xf32>
    %cst_8 = arith.constant 9.99999996E-13 : f32
    %14 = vector.broadcast %cst_8 : f32 to vector<16x1xf32>
    %15 = arith.addf %13, %14 : vector<16x1xf32>
    %16 = math.rsqrt %15 : vector<16x1xf32>
    %17 = vector.broadcast %16 : vector<16x1xf32> to vector<16x128xf32>
    %18 = arith.mulf %8, %17 : vector<16x128xf32>
    %19 = vector.broadcast %1 : vector<1x128xf32> to vector<16x128xf32>
    %20 = arith.mulf %18, %19 : vector<16x128xf32>
    %21 = vector.broadcast %2 : vector<1x128xf32> to vector<16x128xf32>
    %22 = arith.addf %20, %21 : vector<16x128xf32>
    %c0_9 = arith.constant 0 : index
    %c0_10 = arith.constant 0 : index
    %23 = vector.load %arg1[%c0_9, %c0_10] : memref<16x16xf32, #tpu.memory_space<vmem>>, vector<16x16xf32>
    %c0_11 = arith.constant 0 : index
    %c0_12 = arith.constant 0 : index
    %c0_13 = arith.constant 0 : index
    %24 = vector.load %arg4[%c0_11, %c0_12, %c0_13] : memref<2x128x384xbf16, #tpu.memory_space<vmem>>, vector<1x128x384xbf16>
    %25 = vector.shape_cast %24 : vector<1x128x384xbf16> to vector<128x384xbf16>
    %26 = arith.truncf %22 : vector<16x128xf32> to vector<16x128xbf16>
    %cst_14 = arith.constant dense<0.000000e+00> : vector<16x384xf32>
    %27 = tpu.matmul %26, %25, %cst_14 {dimension_numbers = #tpu.dot_dimension_numbers<[1], [0], [0], [1], [0, 0, 1, 1], [], []>} : vector<16x128xbf16>, vector<128x384xbf16>, vector<16x384xf32> -> vector<16x384xf32>
    %c0_15 = arith.constant 0 : index
    %c0_16 = arith.constant 0 : index
    %c0_17 = arith.constant 0 : index
    %28 = vector.load %arg5[%c0_15, %c0_16, %c0_17] : memref<2x1x384xf32, #tpu.memory_space<vmem>>, vector<1x1x384xf32>
    %29 = vector.shape_cast %28 : vector<1x1x384xf32> to vector<1x384xf32>
    %30 = vector.broadcast %29 : vector<1x384xf32> to vector<16x384xf32>
    %31 = arith.addf %27, %30 : vector<16x384xf32>
    %32 = vector.extract_strided_slice %31 {offsets = [0, 0], sizes = [16, 32], strides = [1, 1]} : vector<16x384xf32> to vector<16x32xf32>
    %33 = arith.truncf %32 : vector<16x32xf32> to vector<16x32xbf16>
    %34 = vector.extract_strided_slice %31 {offsets = [0, 128], sizes = [16, 32], strides = [1, 1]} : vector<16x384xf32> to vector<16x32xf32>
    %35 = arith.truncf %34 : vector<16x32xf32> to vector<16x32xbf16>
    %36 = vector.extract_strided_slice %31 {offsets = [0, 256], sizes = [16, 32], strides = [1, 1]} : vector<16x384xf32> to vector<16x32xf32>
    %37 = arith.truncf %36 : vector<16x32xf32> to vector<16x32xbf16>
    %cst_18 = arith.constant dense<0.000000e+00> : vector<16x16xf32>
    %38 = tpu.matmul %33, %35, %cst_18 {dimension_numbers = #tpu.dot_dimension_numbers<[1], [1], [0], [0], [0, 0, 1, 0], [], []>} : vector<16x32xbf16>, vector<16x32xbf16>, vector<16x16xf32> -> vector<16x16xf32>
    %cst_19 = arith.constant 0.176776692 : f32
    %39 = vector.broadcast %cst_19 : f32 to vector<16x16xf32>
    %40 = arith.mulf %38, %39 : vector<16x16xf32>
    %41 = arith.addf %40, %23 : vector<16x16xf32>
    %cst_20 = arith.constant dense<0xFF800000> : vector<16xf32>
    %42 = vector.multi_reduction <maximumf>, %41, %cst_20 [1] : vector<16x16xf32> to vector<16xf32>
    %43 = vector.shape_cast %42 : vector<16xf32> to vector<16x1xf32>
    %44 = vector.broadcast %43 : vector<16x1xf32> to vector<16x16xf32>
    %45 = arith.subf %41, %44 : vector<16x16xf32>
    %46 = math.exp %45 : vector<16x16xf32>
    %cst_21 = arith.constant dense<0.000000e+00> : vector<16xf32>
    %47 = vector.multi_reduction <add>, %46, %cst_21 [1] : vector<16x16xf32> to vector<16xf32>
    %48 = vector.shape_cast %47 : vector<16xf32> to vector<16x1xf32>
    %49 = tpu.reciprocal %48 {approx = true} : vector<16x1xf32> -> vector<16x1xf32>
    %50 = vector.broadcast %49 : vector<16x1xf32> to vector<16x16xf32>
    %51 = arith.mulf %46, %50 : vector<16x16xf32>
    %52 = arith.truncf %51 : vector<16x16xf32> to vector<16x16xbf16>
    %cst_22 = arith.constant dense<0.000000e+00> : vector<16x32xf32>
    %53 = tpu.matmul %52, %37, %cst_22 {dimension_numbers = #tpu.dot_dimension_numbers<[1], [0], [0], [1], [0, 0, 1, 1], [], []>} : vector<16x16xbf16>, vector<16x32xbf16>, vector<16x32xf32> -> vector<16x32xf32>
    %54 = vector.extract_strided_slice %31 {offsets = [0, 32], sizes = [16, 32], strides = [1, 1]} : vector<16x384xf32> to vector<16x32xf32>
    %55 = arith.truncf %54 : vector<16x32xf32> to vector<16x32xbf16>
    %56 = vector.extract_strided_slice %31 {offsets = [0, 160], sizes = [16, 32], strides = [1, 1]} : vector<16x384xf32> to vector<16x32xf32>
    %57 = arith.truncf %56 : vector<16x32xf32> to vector<16x32xbf16>
    %58 = vector.extract_strided_slice %31 {offsets = [0, 288], sizes = [16, 32], strides = [1, 1]} : vector<16x384xf32> to vector<16x32xf32>
    %59 = arith.truncf %58 : vector<16x32xf32> to vector<16x32xbf16>
    %cst_23 = arith.constant dense<0.000000e+00> : vector<16x16xf32>
    %60 = tpu.matmul %55, %57, %cst_23 {dimension_numbers = #tpu.dot_dimension_numbers<[1], [1], [0], [0], [0, 0, 1, 0], [], []>} : vector<16x32xbf16>, vector<16x32xbf16>, vector<16x16xf32> -> vector<16x16xf32>
    %cst_24 = arith.constant 0.176776692 : f32
    %61 = vector.broadcast %cst_24 : f32 to vector<16x16xf32>
    %62 = arith.mulf %60, %61 : vector<16x16xf32>
    %63 = arith.addf %62, %23 : vector<16x16xf32>
    %cst_25 = arith.constant dense<0xFF800000> : vector<16xf32>
    %64 = vector.multi_reduction <maximumf>, %63, %cst_25 [1] : vector<16x16xf32> to vector<16xf32>
    %65 = vector.shape_cast %64 : vector<16xf32> to vector<16x1xf32>
    %66 = vector.broadcast %65 : vector<16x1xf32> to vector<16x16xf32>
    %67 = arith.subf %63, %66 : vector<16x16xf32>
    %68 = math.exp %67 : vector<16x16xf32>
    %cst_26 = arith.constant dense<0.000000e+00> : vector<16xf32>
    %69 = vector.multi_reduction <add>, %68, %cst_26 [1] : vector<16x16xf32> to vector<16xf32>
    %70 = vector.shape_cast %69 : vector<16xf32> to vector<16x1xf32>
    %71 = tpu.reciprocal %70 {approx = true} : vector<16x1xf32> -> vector<16x1xf32>
    %72 = vector.broadcast %71 : vector<16x1xf32> to vector<16x16xf32>
    %73 = arith.mulf %68, %72 : vector<16x16xf32>
    %74 = arith.truncf %73 : vector<16x16xf32> to vector<16x16xbf16>
    %cst_27 = arith.constant dense<0.000000e+00> : vector<16x32xf32>
    %75 = tpu.matmul %74, %59, %cst_27 {dimension_numbers = #tpu.dot_dimension_numbers<[1], [0], [0], [1], [0, 0, 1, 1], [], []>} : vector<16x16xbf16>, vector<16x32xbf16>, vector<16x32xf32> -> vector<16x32xf32>
    %76 = vector.extract_strided_slice %31 {offsets = [0, 64], sizes = [16, 32], strides = [1, 1]} : vector<16x384xf32> to vector<16x32xf32>
    %77 = arith.truncf %76 : vector<16x32xf32> to vector<16x32xbf16>
    %78 = vector.extract_strided_slice %31 {offsets = [0, 192], sizes = [16, 32], strides = [1, 1]} : vector<16x384xf32> to vector<16x32xf32>
    %79 = arith.truncf %78 : vector<16x32xf32> to vector<16x32xbf16>
    %80 = vector.extract_strided_slice %31 {offsets = [0, 320], sizes = [16, 32], strides = [1, 1]} : vector<16x384xf32> to vector<16x32xf32>
    %81 = arith.truncf %80 : vector<16x32xf32> to vector<16x32xbf16>
    %cst_28 = arith.constant dense<0.000000e+00> : vector<16x16xf32>
    %82 = tpu.matmul %77, %79, %cst_28 {dimension_numbers = #tpu.dot_dimension_numbers<[1], [1], [0], [0], [0, 0, 1, 0], [], []>} : vector<16x32xbf16>, vector<16x32xbf16>, vector<16x16xf32> -> vector<16x16xf32>
    %cst_29 = arith.constant 0.176776692 : f32
    %83 = vector.broadcast %cst_29 : f32 to vector<16x16xf32>
    %84 = arith.mulf %82, %83 : vector<16x16xf32>
    %85 = arith.addf %84, %23 : vector<16x16xf32>
    %cst_30 = arith.constant dense<0xFF800000> : vector<16xf32>
    %86 = vector.multi_reduction <maximumf>, %85, %cst_30 [1] : vector<16x16xf32> to vector<16xf32>
    %87 = vector.shape_cast %86 : vector<16xf32> to vector<16x1xf32>
    %88 = vector.broadcast %87 : vector<16x1xf32> to vector<16x16xf32>
    %89 = arith.subf %85, %88 : vector<16x16xf32>
    %90 = math.exp %89 : vector<16x16xf32>
    %cst_31 = arith.constant dense<0.000000e+00> : vector<16xf32>
    %91 = vector.multi_reduction <add>, %90, %cst_31 [1] : vector<16x16xf32> to vector<16xf32>
    %92 = vector.shape_cast %91 : vector<16xf32> to vector<16x1xf32>
    %93 = tpu.reciprocal %92 {approx = true} : vector<16x1xf32> -> vector<16x1xf32>
    %94 = vector.broadcast %93 : vector<16x1xf32> to vector<16x16xf32>
    %95 = arith.mulf %90, %94 : vector<16x16xf32>
    %96 = arith.truncf %95 : vector<16x16xf32> to vector<16x16xbf16>
    %cst_32 = arith.constant dense<0.000000e+00> : vector<16x32xf32>
    %97 = tpu.matmul %96, %81, %cst_32 {dimension_numbers = #tpu.dot_dimension_numbers<[1], [0], [0], [1], [0, 0, 1, 1], [], []>} : vector<16x16xbf16>, vector<16x32xbf16>, vector<16x32xf32> -> vector<16x32xf32>
    %98 = vector.extract_strided_slice %31 {offsets = [0, 96], sizes = [16, 32], strides = [1, 1]} : vector<16x384xf32> to vector<16x32xf32>
    %99 = arith.truncf %98 : vector<16x32xf32> to vector<16x32xbf16>
    %100 = vector.extract_strided_slice %31 {offsets = [0, 224], sizes = [16, 32], strides = [1, 1]} : vector<16x384xf32> to vector<16x32xf32>
    %101 = arith.truncf %100 : vector<16x32xf32> to vector<16x32xbf16>
    %102 = vector.extract_strided_slice %31 {offsets = [0, 352], sizes = [16, 32], strides = [1, 1]} : vector<16x384xf32> to vector<16x32xf32>
    %103 = arith.truncf %102 : vector<16x32xf32> to vector<16x32xbf16>
    %cst_33 = arith.constant dense<0.000000e+00> : vector<16x16xf32>
    %104 = tpu.matmul %99, %101, %cst_33 {dimension_numbers = #tpu.dot_dimension_numbers<[1], [1], [0], [0], [0, 0, 1, 0], [], []>} : vector<16x32xbf16>, vector<16x32xbf16>, vector<16x16xf32> -> vector<16x16xf32>
    %cst_34 = arith.constant 0.176776692 : f32
    %105 = vector.broadcast %cst_34 : f32 to vector<16x16xf32>
    %106 = arith.mulf %104, %105 : vector<16x16xf32>
    %107 = arith.addf %106, %23 : vector<16x16xf32>
    %cst_35 = arith.constant dense<0xFF800000> : vector<16xf32>
    %108 = vector.multi_reduction <maximumf>, %107, %cst_35 [1] : vector<16x16xf32> to vector<16xf32>
    %109 = vector.shape_cast %108 : vector<16xf32> to vector<16x1xf32>
    %110 = vector.broadcast %109 : vector<16x1xf32> to vector<16x16xf32>
    %111 = arith.subf %107, %110 : vector<16x16xf32>
    %112 = math.exp %111 : vector<16x16xf32>
    %cst_36 = arith.constant dense<0.000000e+00> : vector<16xf32>
    %113 = vector.multi_reduction <add>, %112, %cst_36 [1] : vector<16x16xf32> to vector<16xf32>
    %114 = vector.shape_cast %113 : vector<16xf32> to vector<16x1xf32>
    %115 = tpu.reciprocal %114 {approx = true} : vector<16x1xf32> -> vector<16x1xf32>
    %116 = vector.broadcast %115 : vector<16x1xf32> to vector<16x16xf32>
    %117 = arith.mulf %112, %116 : vector<16x16xf32>
    %118 = arith.truncf %117 : vector<16x16xf32> to vector<16x16xbf16>
    %cst_37 = arith.constant dense<0.000000e+00> : vector<16x32xf32>
    %119 = tpu.matmul %118, %103, %cst_37 {dimension_numbers = #tpu.dot_dimension_numbers<[1], [0], [0], [1], [0, 0, 1, 1], [], []>} : vector<16x16xbf16>, vector<16x32xbf16>, vector<16x32xf32> -> vector<16x32xf32>
    %120 = tpu.concatenate %53, %75, %97, %119 in 1 : vector<16x32xf32>, vector<16x32xf32>, vector<16x32xf32>, vector<16x32xf32> -> vector<16x128xf32>
    %c0_38 = arith.constant 0 : index
    %c0_39 = arith.constant 0 : index
    %c0_40 = arith.constant 0 : index
    %121 = vector.load %arg6[%c0_38, %c0_39, %c0_40] : memref<2x128x128xbf16, #tpu.memory_space<vmem>>, vector<1x128x128xbf16>
    %122 = vector.shape_cast %121 : vector<1x128x128xbf16> to vector<128x128xbf16>
    %123 = arith.truncf %120 : vector<16x128xf32> to vector<16x128xbf16>
    %cst_41 = arith.constant dense<0.000000e+00> : vector<16x128xf32>
    %124 = tpu.matmul %123, %122, %cst_41 {dimension_numbers = #tpu.dot_dimension_numbers<[1], [0], [0], [1], [0, 0, 1, 1], [], []>} : vector<16x128xbf16>, vector<128x128xbf16>, vector<16x128xf32> -> vector<16x128xf32>
    %c0_42 = arith.constant 0 : index
    %c0_43 = arith.constant 0 : index
    %c0_44 = arith.constant 0 : index
    %125 = vector.load %arg7[%c0_42, %c0_43, %c0_44] : memref<2x1x128xf32, #tpu.memory_space<vmem>>, vector<1x1x128xf32>
    %126 = vector.shape_cast %125 : vector<1x1x128xf32> to vector<1x128xf32>
    %127 = vector.broadcast %126 : vector<1x128xf32> to vector<16x128xf32>
    %128 = arith.addf %124, %127 : vector<16x128xf32>
    %129 = arith.addf %128, %22 : vector<16x128xf32>
    %c0_45 = arith.constant 0 : index
    %c0_46 = arith.constant 0 : index
    %c0_47 = arith.constant 0 : index
    %130 = vector.load %arg8[%c0_45, %c0_46, %c0_47] : memref<2x1x128xf32, #tpu.memory_space<vmem>>, vector<1x1x128xf32>
    %131 = vector.shape_cast %130 : vector<1x1x128xf32> to vector<1x128xf32>
    %c0_48 = arith.constant 0 : index
    %c0_49 = arith.constant 0 : index
    %c0_50 = arith.constant 0 : index
    %132 = vector.load %arg9[%c0_48, %c0_49, %c0_50] : memref<2x1x128xf32, #tpu.memory_space<vmem>>, vector<1x1x128xf32>
    %133 = vector.shape_cast %132 : vector<1x1x128xf32> to vector<1x128xf32>
    %cst_51 = arith.constant dense<0.000000e+00> : vector<16xf32>
    %134 = vector.multi_reduction <add>, %129, %cst_51 [1] : vector<16x128xf32> to vector<16xf32>
    %135 = vector.shape_cast %134 : vector<16xf32> to vector<16x1xf32>
    %cst_52 = arith.constant 1.280000e+02 : f32
    %136 = vector.broadcast %cst_52 : f32 to vector<16x1xf32>
    %137 = arith.divf %135, %136 : vector<16x1xf32>
    %138 = vector.broadcast %137 : vector<16x1xf32> to vector<16x128xf32>
    %139 = arith.subf %129, %138 : vector<16x128xf32>
    %140 = arith.mulf %139, %139 : vector<16x128xf32>
    %cst_53 = arith.constant dense<0.000000e+00> : vector<16xf32>
    %141 = vector.multi_reduction <add>, %140, %cst_53 [1] : vector<16x128xf32> to vector<16xf32>
    %142 = vector.shape_cast %141 : vector<16xf32> to vector<16x1xf32>
    %cst_54 = arith.constant 1.280000e+02 : f32
    %143 = vector.broadcast %cst_54 : f32 to vector<16x1xf32>
    %144 = arith.divf %142, %143 : vector<16x1xf32>
    %cst_55 = arith.constant 9.99999996E-13 : f32
    %145 = vector.broadcast %cst_55 : f32 to vector<16x1xf32>
    %146 = arith.addf %144, %145 : vector<16x1xf32>
    %147 = math.rsqrt %146 : vector<16x1xf32>
    %148 = vector.broadcast %147 : vector<16x1xf32> to vector<16x128xf32>
    %149 = arith.mulf %139, %148 : vector<16x128xf32>
    %150 = vector.broadcast %131 : vector<1x128xf32> to vector<16x128xf32>
    %151 = arith.mulf %149, %150 : vector<16x128xf32>
    %152 = vector.broadcast %133 : vector<1x128xf32> to vector<16x128xf32>
    %153 = arith.addf %151, %152 : vector<16x128xf32>
    %c0_56 = arith.constant 0 : index
    %c0_57 = arith.constant 0 : index
    %c0_58 = arith.constant 0 : index
    %154 = vector.load %arg10[%c0_56, %c0_57, %c0_58] : memref<2x128x512xbf16, #tpu.memory_space<vmem>>, vector<1x128x512xbf16>
    %155 = vector.shape_cast %154 : vector<1x128x512xbf16> to vector<128x512xbf16>
    %156 = arith.truncf %153 : vector<16x128xf32> to vector<16x128xbf16>
    %cst_59 = arith.constant dense<0.000000e+00> : vector<16x512xf32>
    %157 = tpu.matmul %156, %155, %cst_59 {dimension_numbers = #tpu.dot_dimension_numbers<[1], [0], [0], [1], [0, 0, 1, 1], [], []>} : vector<16x128xbf16>, vector<128x512xbf16>, vector<16x512xf32> -> vector<16x512xf32>
    %c0_60 = arith.constant 0 : index
    %c0_61 = arith.constant 0 : index
    %c0_62 = arith.constant 0 : index
    %158 = vector.load %arg11[%c0_60, %c0_61, %c0_62] : memref<2x1x512xf32, #tpu.memory_space<vmem>>, vector<1x1x512xf32>
    %159 = vector.shape_cast %158 : vector<1x1x512xf32> to vector<1x512xf32>
    %160 = vector.broadcast %159 : vector<1x512xf32> to vector<16x512xf32>
    %161 = arith.addf %157, %160 : vector<16x512xf32>
    %cst_63 = arith.constant 5.000000e-01 : f32
    %162 = vector.broadcast %cst_63 : f32 to vector<16x512xf32>
    %163 = arith.mulf %162, %161 : vector<16x512xf32>
    %cst_64 = arith.constant 4.471500e-02 : f32
    %164 = vector.broadcast %cst_64 : f32 to vector<16x512xf32>
    %165 = arith.mulf %164, %161 : vector<16x512xf32>
    %166 = arith.mulf %165, %161 : vector<16x512xf32>
    %167 = arith.mulf %166, %161 : vector<16x512xf32>
    %168 = arith.addf %161, %167 : vector<16x512xf32>
    %cst_65 = arith.constant 0.797884583 : f32
    %169 = vector.broadcast %cst_65 : f32 to vector<16x512xf32>
    %170 = arith.mulf %169, %168 : vector<16x512xf32>
    %171 = math.tanh %170 : vector<16x512xf32>
    %cst_66 = arith.constant 1.000000e+00 : f32
    %172 = vector.broadcast %cst_66 : f32 to vector<16x512xf32>
    %173 = arith.addf %172, %171 : vector<16x512xf32>
    %174 = arith.mulf %163, %173 : vector<16x512xf32>
    %c0_67 = arith.constant 0 : index
    %c0_68 = arith.constant 0 : index
    %c0_69 = arith.constant 0 : index
    %175 = vector.load %arg12[%c0_67, %c0_68, %c0_69] : memref<2x512x128xbf16, #tpu.memory_space<vmem>>, vector<1x512x128xbf16>
    %176 = vector.shape_cast %175 : vector<1x512x128xbf16> to vector<512x128xbf16>
    %177 = arith.truncf %174 : vector<16x512xf32> to vector<16x512xbf16>
    %cst_70 = arith.constant dense<0.000000e+00> : vector<16x128xf32>
    %178 = tpu.matmul %177, %176, %cst_70 {dimension_numbers = #tpu.dot_dimension_numbers<[1], [0], [0], [1], [0, 0, 1, 1], [], []>} : vector<16x512xbf16>, vector<512x128xbf16>, vector<16x128xf32> -> vector<16x128xf32>
    %c0_71 = arith.constant 0 : index
    %c0_72 = arith.constant 0 : index
    %c0_73 = arith.constant 0 : index
    %179 = vector.load %arg13[%c0_71, %c0_72, %c0_73] : memref<2x1x128xf32, #tpu.memory_space<vmem>>, vector<1x1x128xf32>
    %180 = vector.shape_cast %179 : vector<1x1x128xf32> to vector<1x128xf32>
    %181 = vector.broadcast %180 : vector<1x128xf32> to vector<16x128xf32>
    %182 = arith.addf %178, %181 : vector<16x128xf32>
    %183 = arith.addf %182, %153 : vector<16x128xf32>
    %c0_74 = arith.constant 0 : index
    %c0_75 = arith.constant 0 : index
    %c0_76 = arith.constant 0 : index
    %184 = vector.load %arg14[%c0_74, %c0_75, %c0_76] : memref<2x1x128xf32, #tpu.memory_space<vmem>>, vector<1x1x128xf32>
    %185 = vector.shape_cast %184 : vector<1x1x128xf32> to vector<1x128xf32>
    %c0_77 = arith.constant 0 : index
    %c0_78 = arith.constant 0 : index
    %c0_79 = arith.constant 0 : index
    %186 = vector.load %arg15[%c0_77, %c0_78, %c0_79] : memref<2x1x128xf32, #tpu.memory_space<vmem>>, vector<1x1x128xf32>
    %187 = vector.shape_cast %186 : vector<1x1x128xf32> to vector<1x128xf32>
    %cst_80 = arith.constant dense<0.000000e+00> : vector<16xf32>
    %188 = vector.multi_reduction <add>, %183, %cst_80 [1] : vector<16x128xf32> to vector<16xf32>
    %189 = vector.shape_cast %188 : vector<16xf32> to vector<16x1xf32>
    %cst_81 = arith.constant 1.280000e+02 : f32
    %190 = vector.broadcast %cst_81 : f32 to vector<16x1xf32>
    %191 = arith.divf %189, %190 : vector<16x1xf32>
    %192 = vector.broadcast %191 : vector<16x1xf32> to vector<16x128xf32>
    %193 = arith.subf %183, %192 : vector<16x128xf32>
    %194 = arith.mulf %193, %193 : vector<16x128xf32>
    %cst_82 = arith.constant dense<0.000000e+00> : vector<16xf32>
    %195 = vector.multi_reduction <add>, %194, %cst_82 [1] : vector<16x128xf32> to vector<16xf32>
    %196 = vector.shape_cast %195 : vector<16xf32> to vector<16x1xf32>
    %cst_83 = arith.constant 1.280000e+02 : f32
    %197 = vector.broadcast %cst_83 : f32 to vector<16x1xf32>
    %198 = arith.divf %196, %197 : vector<16x1xf32>
    %cst_84 = arith.constant 9.99999996E-13 : f32
    %199 = vector.broadcast %cst_84 : f32 to vector<16x1xf32>
    %200 = arith.addf %198, %199 : vector<16x1xf32>
    %201 = math.rsqrt %200 : vector<16x1xf32>
    %202 = vector.broadcast %201 : vector<16x1xf32> to vector<16x128xf32>
    %203 = arith.mulf %193, %202 : vector<16x128xf32>
    %204 = vector.broadcast %185 : vector<1x128xf32> to vector<16x128xf32>
    %205 = arith.mulf %203, %204 : vector<16x128xf32>
    %206 = vector.broadcast %187 : vector<1x128xf32> to vector<16x128xf32>
    %207 = arith.addf %205, %206 : vector<16x128xf32>
    %c1 = arith.constant 1 : index
    %c0_85 = arith.constant 0 : index
    %c0_86 = arith.constant 0 : index
    %208 = vector.load %arg4[%c1, %c0_85, %c0_86] : memref<2x128x384xbf16, #tpu.memory_space<vmem>>, vector<1x128x384xbf16>
    %209 = vector.shape_cast %208 : vector<1x128x384xbf16> to vector<128x384xbf16>
    %210 = arith.truncf %207 : vector<16x128xf32> to vector<16x128xbf16>
    %cst_87 = arith.constant dense<0.000000e+00> : vector<16x384xf32>
    %211 = tpu.matmul %210, %209, %cst_87 {dimension_numbers = #tpu.dot_dimension_numbers<[1], [0], [0], [1], [0, 0, 1, 1], [], []>} : vector<16x128xbf16>, vector<128x384xbf16>, vector<16x384xf32> -> vector<16x384xf32>
    %c1_88 = arith.constant 1 : index
    %c0_89 = arith.constant 0 : index
    %c0_90 = arith.constant 0 : index
    %212 = vector.load %arg5[%c1_88, %c0_89, %c0_90] : memref<2x1x384xf32, #tpu.memory_space<vmem>>, vector<1x1x384xf32>
    %213 = vector.shape_cast %212 : vector<1x1x384xf32> to vector<1x384xf32>
    %214 = vector.broadcast %213 : vector<1x384xf32> to vector<16x384xf32>
    %215 = arith.addf %211, %214 : vector<16x384xf32>
    %216 = vector.extract_strided_slice %215 {offsets = [0, 0], sizes = [16, 32], strides = [1, 1]} : vector<16x384xf32> to vector<16x32xf32>
    %217 = arith.truncf %216 : vector<16x32xf32> to vector<16x32xbf16>
    %218 = vector.extract_strided_slice %215 {offsets = [0, 128], sizes = [16, 32], strides = [1, 1]} : vector<16x384xf32> to vector<16x32xf32>
    %219 = arith.truncf %218 : vector<16x32xf32> to vector<16x32xbf16>
    %220 = vector.extract_strided_slice %215 {offsets = [0, 256], sizes = [16, 32], strides = [1, 1]} : vector<16x384xf32> to vector<16x32xf32>
    %221 = arith.truncf %220 : vector<16x32xf32> to vector<16x32xbf16>
    %cst_91 = arith.constant dense<0.000000e+00> : vector<16x16xf32>
    %222 = tpu.matmul %217, %219, %cst_91 {dimension_numbers = #tpu.dot_dimension_numbers<[1], [1], [0], [0], [0, 0, 1, 0], [], []>} : vector<16x32xbf16>, vector<16x32xbf16>, vector<16x16xf32> -> vector<16x16xf32>
    %cst_92 = arith.constant 0.176776692 : f32
    %223 = vector.broadcast %cst_92 : f32 to vector<16x16xf32>
    %224 = arith.mulf %222, %223 : vector<16x16xf32>
    %225 = arith.addf %224, %23 : vector<16x16xf32>
    %cst_93 = arith.constant dense<0xFF800000> : vector<16xf32>
    %226 = vector.multi_reduction <maximumf>, %225, %cst_93 [1] : vector<16x16xf32> to vector<16xf32>
    %227 = vector.shape_cast %226 : vector<16xf32> to vector<16x1xf32>
    %228 = vector.broadcast %227 : vector<16x1xf32> to vector<16x16xf32>
    %229 = arith.subf %225, %228 : vector<16x16xf32>
    %230 = math.exp %229 : vector<16x16xf32>
    %cst_94 = arith.constant dense<0.000000e+00> : vector<16xf32>
    %231 = vector.multi_reduction <add>, %230, %cst_94 [1] : vector<16x16xf32> to vector<16xf32>
    %232 = vector.shape_cast %231 : vector<16xf32> to vector<16x1xf32>
    %233 = tpu.reciprocal %232 {approx = true} : vector<16x1xf32> -> vector<16x1xf32>
    %234 = vector.broadcast %233 : vector<16x1xf32> to vector<16x16xf32>
    %235 = arith.mulf %230, %234 : vector<16x16xf32>
    %236 = arith.truncf %235 : vector<16x16xf32> to vector<16x16xbf16>
    %cst_95 = arith.constant dense<0.000000e+00> : vector<16x32xf32>
    %237 = tpu.matmul %236, %221, %cst_95 {dimension_numbers = #tpu.dot_dimension_numbers<[1], [0], [0], [1], [0, 0, 1, 1], [], []>} : vector<16x16xbf16>, vector<16x32xbf16>, vector<16x32xf32> -> vector<16x32xf32>
    %238 = vector.extract_strided_slice %215 {offsets = [0, 32], sizes = [16, 32], strides = [1, 1]} : vector<16x384xf32> to vector<16x32xf32>
    %239 = arith.truncf %238 : vector<16x32xf32> to vector<16x32xbf16>
    %240 = vector.extract_strided_slice %215 {offsets = [0, 160], sizes = [16, 32], strides = [1, 1]} : vector<16x384xf32> to vector<16x32xf32>
    %241 = arith.truncf %240 : vector<16x32xf32> to vector<16x32xbf16>
    %242 = vector.extract_strided_slice %215 {offsets = [0, 288], sizes = [16, 32], strides = [1, 1]} : vector<16x384xf32> to vector<16x32xf32>
    %243 = arith.truncf %242 : vector<16x32xf32> to vector<16x32xbf16>
    %cst_96 = arith.constant dense<0.000000e+00> : vector<16x16xf32>
    %244 = tpu.matmul %239, %241, %cst_96 {dimension_numbers = #tpu.dot_dimension_numbers<[1], [1], [0], [0], [0, 0, 1, 0], [], []>} : vector<16x32xbf16>, vector<16x32xbf16>, vector<16x16xf32> -> vector<16x16xf32>
    %cst_97 = arith.constant 0.176776692 : f32
    %245 = vector.broadcast %cst_97 : f32 to vector<16x16xf32>
    %246 = arith.mulf %244, %245 : vector<16x16xf32>
    %247 = arith.addf %246, %23 : vector<16x16xf32>
    %cst_98 = arith.constant dense<0xFF800000> : vector<16xf32>
    %248 = vector.multi_reduction <maximumf>, %247, %cst_98 [1] : vector<16x16xf32> to vector<16xf32>
    %249 = vector.shape_cast %248 : vector<16xf32> to vector<16x1xf32>
    %250 = vector.broadcast %249 : vector<16x1xf32> to vector<16x16xf32>
    %251 = arith.subf %247, %250 : vector<16x16xf32>
    %252 = math.exp %251 : vector<16x16xf32>
    %cst_99 = arith.constant dense<0.000000e+00> : vector<16xf32>
    %253 = vector.multi_reduction <add>, %252, %cst_99 [1] : vector<16x16xf32> to vector<16xf32>
    %254 = vector.shape_cast %253 : vector<16xf32> to vector<16x1xf32>
    %255 = tpu.reciprocal %254 {approx = true} : vector<16x1xf32> -> vector<16x1xf32>
    %256 = vector.broadcast %255 : vector<16x1xf32> to vector<16x16xf32>
    %257 = arith.mulf %252, %256 : vector<16x16xf32>
    %258 = arith.truncf %257 : vector<16x16xf32> to vector<16x16xbf16>
    %cst_100 = arith.constant dense<0.000000e+00> : vector<16x32xf32>
    %259 = tpu.matmul %258, %243, %cst_100 {dimension_numbers = #tpu.dot_dimension_numbers<[1], [0], [0], [1], [0, 0, 1, 1], [], []>} : vector<16x16xbf16>, vector<16x32xbf16>, vector<16x32xf32> -> vector<16x32xf32>
    %260 = vector.extract_strided_slice %215 {offsets = [0, 64], sizes = [16, 32], strides = [1, 1]} : vector<16x384xf32> to vector<16x32xf32>
    %261 = arith.truncf %260 : vector<16x32xf32> to vector<16x32xbf16>
    %262 = vector.extract_strided_slice %215 {offsets = [0, 192], sizes = [16, 32], strides = [1, 1]} : vector<16x384xf32> to vector<16x32xf32>
    %263 = arith.truncf %262 : vector<16x32xf32> to vector<16x32xbf16>
    %264 = vector.extract_strided_slice %215 {offsets = [0, 320], sizes = [16, 32], strides = [1, 1]} : vector<16x384xf32> to vector<16x32xf32>
    %265 = arith.truncf %264 : vector<16x32xf32> to vector<16x32xbf16>
    %cst_101 = arith.constant dense<0.000000e+00> : vector<16x16xf32>
    %266 = tpu.matmul %261, %263, %cst_101 {dimension_numbers = #tpu.dot_dimension_numbers<[1], [1], [0], [0], [0, 0, 1, 0], [], []>} : vector<16x32xbf16>, vector<16x32xbf16>, vector<16x16xf32> -> vector<16x16xf32>
    %cst_102 = arith.constant 0.176776692 : f32
    %267 = vector.broadcast %cst_102 : f32 to vector<16x16xf32>
    %268 = arith.mulf %266, %267 : vector<16x16xf32>
    %269 = arith.addf %268, %23 : vector<16x16xf32>
    %cst_103 = arith.constant dense<0xFF800000> : vector<16xf32>
    %270 = vector.multi_reduction <maximumf>, %269, %cst_103 [1] : vector<16x16xf32> to vector<16xf32>
    %271 = vector.shape_cast %270 : vector<16xf32> to vector<16x1xf32>
    %272 = vector.broadcast %271 : vector<16x1xf32> to vector<16x16xf32>
    %273 = arith.subf %269, %272 : vector<16x16xf32>
    %274 = math.exp %273 : vector<16x16xf32>
    %cst_104 = arith.constant dense<0.000000e+00> : vector<16xf32>
    %275 = vector.multi_reduction <add>, %274, %cst_104 [1] : vector<16x16xf32> to vector<16xf32>
    %276 = vector.shape_cast %275 : vector<16xf32> to vector<16x1xf32>
    %277 = tpu.reciprocal %276 {approx = true} : vector<16x1xf32> -> vector<16x1xf32>
    %278 = vector.broadcast %277 : vector<16x1xf32> to vector<16x16xf32>
    %279 = arith.mulf %274, %278 : vector<16x16xf32>
    %280 = arith.truncf %279 : vector<16x16xf32> to vector<16x16xbf16>
    %cst_105 = arith.constant dense<0.000000e+00> : vector<16x32xf32>
    %281 = tpu.matmul %280, %265, %cst_105 {dimension_numbers = #tpu.dot_dimension_numbers<[1], [0], [0], [1], [0, 0, 1, 1], [], []>} : vector<16x16xbf16>, vector<16x32xbf16>, vector<16x32xf32> -> vector<16x32xf32>
    %282 = vector.extract_strided_slice %215 {offsets = [0, 96], sizes = [16, 32], strides = [1, 1]} : vector<16x384xf32> to vector<16x32xf32>
    %283 = arith.truncf %282 : vector<16x32xf32> to vector<16x32xbf16>
    %284 = vector.extract_strided_slice %215 {offsets = [0, 224], sizes = [16, 32], strides = [1, 1]} : vector<16x384xf32> to vector<16x32xf32>
    %285 = arith.truncf %284 : vector<16x32xf32> to vector<16x32xbf16>
    %286 = vector.extract_strided_slice %215 {offsets = [0, 352], sizes = [16, 32], strides = [1, 1]} : vector<16x384xf32> to vector<16x32xf32>
    %287 = arith.truncf %286 : vector<16x32xf32> to vector<16x32xbf16>
    %cst_106 = arith.constant dense<0.000000e+00> : vector<16x16xf32>
    %288 = tpu.matmul %283, %285, %cst_106 {dimension_numbers = #tpu.dot_dimension_numbers<[1], [1], [0], [0], [0, 0, 1, 0], [], []>} : vector<16x32xbf16>, vector<16x32xbf16>, vector<16x16xf32> -> vector<16x16xf32>
    %cst_107 = arith.constant 0.176776692 : f32
    %289 = vector.broadcast %cst_107 : f32 to vector<16x16xf32>
    %290 = arith.mulf %288, %289 : vector<16x16xf32>
    %291 = arith.addf %290, %23 : vector<16x16xf32>
    %cst_108 = arith.constant dense<0xFF800000> : vector<16xf32>
    %292 = vector.multi_reduction <maximumf>, %291, %cst_108 [1] : vector<16x16xf32> to vector<16xf32>
    %293 = vector.shape_cast %292 : vector<16xf32> to vector<16x1xf32>
    %294 = vector.broadcast %293 : vector<16x1xf32> to vector<16x16xf32>
    %295 = arith.subf %291, %294 : vector<16x16xf32>
    %296 = math.exp %295 : vector<16x16xf32>
    %cst_109 = arith.constant dense<0.000000e+00> : vector<16xf32>
    %297 = vector.multi_reduction <add>, %296, %cst_109 [1] : vector<16x16xf32> to vector<16xf32>
    %298 = vector.shape_cast %297 : vector<16xf32> to vector<16x1xf32>
    %299 = tpu.reciprocal %298 {approx = true} : vector<16x1xf32> -> vector<16x1xf32>
    %300 = vector.broadcast %299 : vector<16x1xf32> to vector<16x16xf32>
    %301 = arith.mulf %296, %300 : vector<16x16xf32>
    %302 = arith.truncf %301 : vector<16x16xf32> to vector<16x16xbf16>
    %cst_110 = arith.constant dense<0.000000e+00> : vector<16x32xf32>
    %303 = tpu.matmul %302, %287, %cst_110 {dimension_numbers = #tpu.dot_dimension_numbers<[1], [0], [0], [1], [0, 0, 1, 1], [], []>} : vector<16x16xbf16>, vector<16x32xbf16>, vector<16x32xf32> -> vector<16x32xf32>
    %304 = tpu.concatenate %237, %259, %281, %303 in 1 : vector<16x32xf32>, vector<16x32xf32>, vector<16x32xf32>, vector<16x32xf32> -> vector<16x128xf32>
    %c1_111 = arith.constant 1 : index
    %c0_112 = arith.constant 0 : index
    %c0_113 = arith.constant 0 : index
    %305 = vector.load %arg6[%c1_111, %c0_112, %c0_113] : memref<2x128x128xbf16, #tpu.memory_space<vmem>>, vector<1x128x128xbf16>
    %306 = vector.shape_cast %305 : vector<1x128x128xbf16> to vector<128x128xbf16>
    %307 = arith.truncf %304 : vector<16x128xf32> to vector<16x128xbf16>
    %cst_114 = arith.constant dense<0.000000e+00> : vector<16x128xf32>
    %308 = tpu.matmul %307, %306, %cst_114 {dimension_numbers = #tpu.dot_dimension_numbers<[1], [0], [0], [1], [0, 0, 1, 1], [], []>} : vector<16x128xbf16>, vector<128x128xbf16>, vector<16x128xf32> -> vector<16x128xf32>
    %c1_115 = arith.constant 1 : index
    %c0_116 = arith.constant 0 : index
    %c0_117 = arith.constant 0 : index
    %309 = vector.load %arg7[%c1_115, %c0_116, %c0_117] : memref<2x1x128xf32, #tpu.memory_space<vmem>>, vector<1x1x128xf32>
    %310 = vector.shape_cast %309 : vector<1x1x128xf32> to vector<1x128xf32>
    %311 = vector.broadcast %310 : vector<1x128xf32> to vector<16x128xf32>
    %312 = arith.addf %308, %311 : vector<16x128xf32>
    %313 = arith.addf %312, %207 : vector<16x128xf32>
    %c1_118 = arith.constant 1 : index
    %c0_119 = arith.constant 0 : index
    %c0_120 = arith.constant 0 : index
    %314 = vector.load %arg8[%c1_118, %c0_119, %c0_120] : memref<2x1x128xf32, #tpu.memory_space<vmem>>, vector<1x1x128xf32>
    %315 = vector.shape_cast %314 : vector<1x1x128xf32> to vector<1x128xf32>
    %c1_121 = arith.constant 1 : index
    %c0_122 = arith.constant 0 : index
    %c0_123 = arith.constant 0 : index
    %316 = vector.load %arg9[%c1_121, %c0_122, %c0_123] : memref<2x1x128xf32, #tpu.memory_space<vmem>>, vector<1x1x128xf32>
    %317 = vector.shape_cast %316 : vector<1x1x128xf32> to vector<1x128xf32>
    %cst_124 = arith.constant dense<0.000000e+00> : vector<16xf32>
    %318 = vector.multi_reduction <add>, %313, %cst_124 [1] : vector<16x128xf32> to vector<16xf32>
    %319 = vector.shape_cast %318 : vector<16xf32> to vector<16x1xf32>
    %cst_125 = arith.constant 1.280000e+02 : f32
    %320 = vector.broadcast %cst_125 : f32 to vector<16x1xf32>
    %321 = arith.divf %319, %320 : vector<16x1xf32>
    %322 = vector.broadcast %321 : vector<16x1xf32> to vector<16x128xf32>
    %323 = arith.subf %313, %322 : vector<16x128xf32>
    %324 = arith.mulf %323, %323 : vector<16x128xf32>
    %cst_126 = arith.constant dense<0.000000e+00> : vector<16xf32>
    %325 = vector.multi_reduction <add>, %324, %cst_126 [1] : vector<16x128xf32> to vector<16xf32>
    %326 = vector.shape_cast %325 : vector<16xf32> to vector<16x1xf32>
    %cst_127 = arith.constant 1.280000e+02 : f32
    %327 = vector.broadcast %cst_127 : f32 to vector<16x1xf32>
    %328 = arith.divf %326, %327 : vector<16x1xf32>
    %cst_128 = arith.constant 9.99999996E-13 : f32
    %329 = vector.broadcast %cst_128 : f32 to vector<16x1xf32>
    %330 = arith.addf %328, %329 : vector<16x1xf32>
    %331 = math.rsqrt %330 : vector<16x1xf32>
    %332 = vector.broadcast %331 : vector<16x1xf32> to vector<16x128xf32>
    %333 = arith.mulf %323, %332 : vector<16x128xf32>
    %334 = vector.broadcast %315 : vector<1x128xf32> to vector<16x128xf32>
    %335 = arith.mulf %333, %334 : vector<16x128xf32>
    %336 = vector.broadcast %317 : vector<1x128xf32> to vector<16x128xf32>
    %337 = arith.addf %335, %336 : vector<16x128xf32>
    %c1_129 = arith.constant 1 : index
    %c0_130 = arith.constant 0 : index
    %c0_131 = arith.constant 0 : index
    %338 = vector.load %arg10[%c1_129, %c0_130, %c0_131] : memref<2x128x512xbf16, #tpu.memory_space<vmem>>, vector<1x128x512xbf16>
    %339 = vector.shape_cast %338 : vector<1x128x512xbf16> to vector<128x512xbf16>
    %340 = arith.truncf %337 : vector<16x128xf32> to vector<16x128xbf16>
    %cst_132 = arith.constant dense<0.000000e+00> : vector<16x512xf32>
    %341 = tpu.matmul %340, %339, %cst_132 {dimension_numbers = #tpu.dot_dimension_numbers<[1], [0], [0], [1], [0, 0, 1, 1], [], []>} : vector<16x128xbf16>, vector<128x512xbf16>, vector<16x512xf32> -> vector<16x512xf32>
    %c1_133 = arith.constant 1 : index
    %c0_134 = arith.constant 0 : index
    %c0_135 = arith.constant 0 : index
    %342 = vector.load %arg11[%c1_133, %c0_134, %c0_135] : memref<2x1x512xf32, #tpu.memory_space<vmem>>, vector<1x1x512xf32>
    %343 = vector.shape_cast %342 : vector<1x1x512xf32> to vector<1x512xf32>
    %344 = vector.broadcast %343 : vector<1x512xf32> to vector<16x512xf32>
    %345 = arith.addf %341, %344 : vector<16x512xf32>
    %cst_136 = arith.constant 5.000000e-01 : f32
    %346 = vector.broadcast %cst_136 : f32 to vector<16x512xf32>
    %347 = arith.mulf %346, %345 : vector<16x512xf32>
    %cst_137 = arith.constant 4.471500e-02 : f32
    %348 = vector.broadcast %cst_137 : f32 to vector<16x512xf32>
    %349 = arith.mulf %348, %345 : vector<16x512xf32>
    %350 = arith.mulf %349, %345 : vector<16x512xf32>
    %351 = arith.mulf %350, %345 : vector<16x512xf32>
    %352 = arith.addf %345, %351 : vector<16x512xf32>
    %cst_138 = arith.constant 0.797884583 : f32
    %353 = vector.broadcast %cst_138 : f32 to vector<16x512xf32>
    %354 = arith.mulf %353, %352 : vector<16x512xf32>
    %355 = math.tanh %354 : vector<16x512xf32>
    %cst_139 = arith.constant 1.000000e+00 : f32
    %356 = vector.broadcast %cst_139 : f32 to vector<16x512xf32>
    %357 = arith.addf %356, %355 : vector<16x512xf32>
    %358 = arith.mulf %347, %357 : vector<16x512xf32>
    %c1_140 = arith.constant 1 : index
    %c0_141 = arith.constant 0 : index
    %c0_142 = arith.constant 0 : index
    %359 = vector.load %arg12[%c1_140, %c0_141, %c0_142] : memref<2x512x128xbf16, #tpu.memory_space<vmem>>, vector<1x512x128xbf16>
    %360 = vector.shape_cast %359 : vector<1x512x128xbf16> to vector<512x128xbf16>
    %361 = arith.truncf %358 : vector<16x512xf32> to vector<16x512xbf16>
    %cst_143 = arith.constant dense<0.000000e+00> : vector<16x128xf32>
    %362 = tpu.matmul %361, %360, %cst_143 {dimension_numbers = #tpu.dot_dimension_numbers<[1], [0], [0], [1], [0, 0, 1, 1], [], []>} : vector<16x512xbf16>, vector<512x128xbf16>, vector<16x128xf32> -> vector<16x128xf32>
    %c1_144 = arith.constant 1 : index
    %c0_145 = arith.constant 0 : index
    %c0_146 = arith.constant 0 : index
    %363 = vector.load %arg13[%c1_144, %c0_145, %c0_146] : memref<2x1x128xf32, #tpu.memory_space<vmem>>, vector<1x1x128xf32>
    %364 = vector.shape_cast %363 : vector<1x1x128xf32> to vector<1x128xf32>
    %365 = vector.broadcast %364 : vector<1x128xf32> to vector<16x128xf32>
    %366 = arith.addf %362, %365 : vector<16x128xf32>
    %367 = arith.addf %366, %337 : vector<16x128xf32>
    %c1_147 = arith.constant 1 : index
    %c0_148 = arith.constant 0 : index
    %c0_149 = arith.constant 0 : index
    %368 = vector.load %arg14[%c1_147, %c0_148, %c0_149] : memref<2x1x128xf32, #tpu.memory_space<vmem>>, vector<1x1x128xf32>
    %369 = vector.shape_cast %368 : vector<1x1x128xf32> to vector<1x128xf32>
    %c1_150 = arith.constant 1 : index
    %c0_151 = arith.constant 0 : index
    %c0_152 = arith.constant 0 : index
    %370 = vector.load %arg15[%c1_150, %c0_151, %c0_152] : memref<2x1x128xf32, #tpu.memory_space<vmem>>, vector<1x1x128xf32>
    %371 = vector.shape_cast %370 : vector<1x1x128xf32> to vector<1x128xf32>
    %cst_153 = arith.constant dense<0.000000e+00> : vector<16xf32>
    %372 = vector.multi_reduction <add>, %367, %cst_153 [1] : vector<16x128xf32> to vector<16xf32>
    %373 = vector.shape_cast %372 : vector<16xf32> to vector<16x1xf32>
    %cst_154 = arith.constant 1.280000e+02 : f32
    %374 = vector.broadcast %cst_154 : f32 to vector<16x1xf32>
    %375 = arith.divf %373, %374 : vector<16x1xf32>
    %376 = vector.broadcast %375 : vector<16x1xf32> to vector<16x128xf32>
    %377 = arith.subf %367, %376 : vector<16x128xf32>
    %378 = arith.mulf %377, %377 : vector<16x128xf32>
    %cst_155 = arith.constant dense<0.000000e+00> : vector<16xf32>
    %379 = vector.multi_reduction <add>, %378, %cst_155 [1] : vector<16x128xf32> to vector<16xf32>
    %380 = vector.shape_cast %379 : vector<16xf32> to vector<16x1xf32>
    %cst_156 = arith.constant 1.280000e+02 : f32
    %381 = vector.broadcast %cst_156 : f32 to vector<16x1xf32>
    %382 = arith.divf %380, %381 : vector<16x1xf32>
    %cst_157 = arith.constant 9.99999996E-13 : f32
    %383 = vector.broadcast %cst_157 : f32 to vector<16x1xf32>
    %384 = arith.addf %382, %383 : vector<16x1xf32>
    %385 = math.rsqrt %384 : vector<16x1xf32>
    %386 = vector.broadcast %385 : vector<16x1xf32> to vector<16x128xf32>
    %387 = arith.mulf %377, %386 : vector<16x128xf32>
    %388 = vector.broadcast %369 : vector<1x128xf32> to vector<16x128xf32>
    %389 = arith.mulf %387, %388 : vector<16x128xf32>
    %390 = vector.broadcast %371 : vector<1x128xf32> to vector<16x128xf32>
    %391 = arith.addf %389, %390 : vector<16x128xf32>
    %c0_158 = arith.constant 0 : index
    %c0_159 = arith.constant 0 : index
    %392 = vector.load %arg20[%c0_158, %c0_159] : memref<128x128xbf16, #tpu.memory_space<vmem>>, vector<128x128xbf16>
    %393 = arith.truncf %391 : vector<16x128xf32> to vector<16x128xbf16>
    %cst_160 = arith.constant dense<0.000000e+00> : vector<16x128xf32>
    %394 = tpu.matmul %393, %392, %cst_160 {dimension_numbers = #tpu.dot_dimension_numbers<[1], [0], [0], [1], [0, 0, 1, 1], [], []>} : vector<16x128xbf16>, vector<128x128xbf16>, vector<16x128xf32> -> vector<16x128xf32>
    %c0_161 = arith.constant 0 : index
    %c0_162 = arith.constant 0 : index
    %395 = vector.load %arg21[%c0_161, %c0_162] : memref<1x128xf32, #tpu.memory_space<vmem>>, vector<1x128xf32>
    %396 = vector.broadcast %395 : vector<1x128xf32> to vector<16x128xf32>
    %397 = arith.addf %394, %396 : vector<16x128xf32>
    %cst_163 = arith.constant 5.000000e-01 : f32
    %398 = vector.broadcast %cst_163 : f32 to vector<16x128xf32>
    %399 = arith.mulf %398, %397 : vector<16x128xf32>
    %cst_164 = arith.constant 4.471500e-02 : f32
    %400 = vector.broadcast %cst_164 : f32 to vector<16x128xf32>
    %401 = arith.mulf %400, %397 : vector<16x128xf32>
    %402 = arith.mulf %401, %397 : vector<16x128xf32>
    %403 = arith.mulf %402, %397 : vector<16x128xf32>
    %404 = arith.addf %397, %403 : vector<16x128xf32>
    %cst_165 = arith.constant 0.797884583 : f32
    %405 = vector.broadcast %cst_165 : f32 to vector<16x128xf32>
    %406 = arith.mulf %405, %404 : vector<16x128xf32>
    %407 = math.tanh %406 : vector<16x128xf32>
    %cst_166 = arith.constant 1.000000e+00 : f32
    %408 = vector.broadcast %cst_166 : f32 to vector<16x128xf32>
    %409 = arith.addf %408, %407 : vector<16x128xf32>
    %410 = arith.mulf %399, %409 : vector<16x128xf32>
    %c0_167 = arith.constant 0 : index
    %c0_168 = arith.constant 0 : index
    %411 = vector.load %arg22[%c0_167, %c0_168] : memref<1x128xf32, #tpu.memory_space<vmem>>, vector<1x128xf32>
    %c0_169 = arith.constant 0 : index
    %c0_170 = arith.constant 0 : index
    %412 = vector.load %arg23[%c0_169, %c0_170] : memref<1x128xf32, #tpu.memory_space<vmem>>, vector<1x128xf32>
    %cst_171 = arith.constant dense<0.000000e+00> : vector<16xf32>
    %413 = vector.multi_reduction <add>, %410, %cst_171 [1] : vector<16x128xf32> to vector<16xf32>
    %414 = vector.shape_cast %413 : vector<16xf32> to vector<16x1xf32>
    %cst_172 = arith.constant 1.280000e+02 : f32
    %415 = vector.broadcast %cst_172 : f32 to vector<16x1xf32>
    %416 = arith.divf %414, %415 : vector<16x1xf32>
    %417 = vector.broadcast %416 : vector<16x1xf32> to vector<16x128xf32>
    %418 = arith.subf %410, %417 : vector<16x128xf32>
    %419 = arith.mulf %418, %418 : vector<16x128xf32>
    %cst_173 = arith.constant dense<0.000000e+00> : vector<16xf32>
    %420 = vector.multi_reduction <add>, %419, %cst_173 [1] : vector<16x128xf32> to vector<16xf32>
    %421 = vector.shape_cast %420 : vector<16xf32> to vector<16x1xf32>
    %cst_174 = arith.constant 1.280000e+02 : f32
    %422 = vector.broadcast %cst_174 : f32 to vector<16x1xf32>
    %423 = arith.divf %421, %422 : vector<16x1xf32>
    %cst_175 = arith.constant 9.99999996E-13 : f32
    %424 = vector.broadcast %cst_175 : f32 to vector<16x1xf32>
    %425 = arith.addf %423, %424 : vector<16x1xf32>
    %426 = math.rsqrt %425 : vector<16x1xf32>
    %427 = vector.broadcast %426 : vector<16x1xf32> to vector<16x128xf32>
    %428 = arith.mulf %418, %427 : vector<16x128xf32>
    %429 = vector.broadcast %411 : vector<1x128xf32> to vector<16x128xf32>
    %430 = arith.mulf %428, %429 : vector<16x128xf32>
    %431 = vector.broadcast %412 : vector<1x128xf32> to vector<16x128xf32>
    %432 = arith.addf %430, %431 : vector<16x128xf32>
    %c0_176 = arith.constant 0 : index
    %c0_177 = arith.constant 0 : index
    %433 = vector.load %arg24[%c0_176, %c0_177] : memref<128x512xbf16, #tpu.memory_space<vmem>>, vector<128x512xbf16>
    %434 = arith.truncf %432 : vector<16x128xf32> to vector<16x128xbf16>
    %cst_178 = arith.constant dense<0.000000e+00> : vector<16x512xf32>
    %435 = tpu.matmul %434, %433, %cst_178 {dimension_numbers = #tpu.dot_dimension_numbers<[1], [0], [0], [1], [0, 0, 1, 1], [], []>} : vector<16x128xbf16>, vector<128x512xbf16>, vector<16x512xf32> -> vector<16x512xf32>
    %c0_179 = arith.constant 0 : index
    %c0_180 = arith.constant 0 : index
    %436 = vector.load %arg25[%c0_179, %c0_180] : memref<1x512xf32, #tpu.memory_space<vmem>>, vector<1x512xf32>
    %437 = vector.broadcast %436 : vector<1x512xf32> to vector<16x512xf32>
    %438 = arith.addf %435, %437 : vector<16x512xf32>
    %c0_181 = arith.constant 0 : index
    %c0_182 = arith.constant 0 : index
    %439 = vector.load %arg26[%c0_181, %c0_182] : memref<16x512xf32, #tpu.memory_space<vmem>>, vector<16x512xf32>
    tpu.vector_store %arg26[%c0_181, %c0_182], %438 {strides = array<i32>} : memref<16x512xf32, #tpu.memory_space<vmem>>, vector<16x512xf32>,
    %440 = vector.extract_strided_slice %391 {offsets = [0, 0], sizes = [1, 128], strides = [1, 1]} : vector<16x128xf32> to vector<1x128xf32>
    %441 = vector.extract_strided_slice %391 {offsets = [8, 0], sizes = [1, 128], strides = [1, 1]} : vector<16x128xf32> to vector<1x128xf32>
    %442 = tpu.concatenate %440, %441 in 0 : vector<1x128xf32>, vector<1x128xf32> -> vector<2x128xf32>
    %c0_183 = arith.constant 0 : index
    %c0_184 = arith.constant 0 : index
    %443 = vector.load %arg16[%c0_183, %c0_184] : memref<128x128xbf16, #tpu.memory_space<vmem>>, vector<128x128xbf16>
    %444 = arith.truncf %442 : vector<2x128xf32> to vector<2x128xbf16>
    %cst_185 = arith.constant dense<0.000000e+00> : vector<2x128xf32>
    %445 = tpu.matmul %444, %443, %cst_185 {dimension_numbers = #tpu.dot_dimension_numbers<[1], [0], [0], [1], [0, 0, 1, 1], [], []>} : vector<2x128xbf16>, vector<128x128xbf16>, vector<2x128xf32> -> vector<2x128xf32>
    %c0_186 = arith.constant 0 : index
    %c0_187 = arith.constant 0 : index
    %446 = vector.load %arg17[%c0_186, %c0_187] : memref<1x128xf32, #tpu.memory_space<vmem>>, vector<1x128xf32>
    %447 = vector.broadcast %446 : vector<1x128xf32> to vector<2x128xf32>
    %448 = arith.addf %445, %447 : vector<2x128xf32>
    %449 = math.tanh %448 : vector<2x128xf32>
    %c0_188 = arith.constant 0 : index
    %c0_189 = arith.constant 0 : index
    %450 = vector.load %arg18[%c0_188, %c0_189] : memref<128x2xbf16, #tpu.memory_space<vmem>>, vector<128x2xbf16>
    %451 = arith.truncf %449 : vector<2x128xf32> to vector<2x128xbf16>
    %cst_190 = arith.constant dense<0.000000e+00> : vector<2x2xf32>
    %452 = tpu.matmul %451, %450, %cst_190 {dimension_numbers = #tpu.dot_dimension_numbers<[1], [0], [0], [1], [0, 0, 1, 1], [], []>} : vector<2x128xbf16>, vector<128x2xbf16>, vector<2x2xf32> -> vector<2x2xf32>
    %c0_191 = arith.constant 0 : index
    %c0_192 = arith.constant 0 : index
    %453 = vector.load %arg19[%c0_191, %c0_192] : memref<1x2xf32, #tpu.memory_space<vmem>>, vector<1x2xf32>
    %454 = vector.broadcast %453 : vector<1x2xf32> to vector<2x2xf32>
    %455 = arith.addf %452, %454 : vector<2x2xf32>
    %c0_193 = arith.constant 0 : index
    %c0_194 = arith.constant 0 : index
    %456 = vector.load %arg27[%c0_193, %c0_194] : memref<2x2xf32, #tpu.memory_space<vmem>>, vector<2x2xf32>
    tpu.vector_store %arg27[%c0_193, %c0_194], %455 {strides = array<i32>} : memref<2x2xf32, #tpu.memory_space<vmem>>, vector<2x2xf32>,
    return
  }
}

</mosaic_0001>

<bundles_post_ra>
// kernel: bert_forward.1
= control target key start
LH: loop header
LB: loop body
LE: loop exit
PB: predicated region body
PF: predicated region fallthrough
CT: control target
= control target key end

     0   :  { %s7201_s0 = inlined_call_operand.vmem [shape: f32[16,128], index: 0, kind: input, shape index: {}]   ;;  %s7202_s1 = inlined_call_operand.vmem [shape: f32[16,16], index: 1, kind: input, shape index: {}]   ;;  %s7203_s2 = inlined_call_operand.hbm [shape: f32[1,128], index: 2, kind: input, shape index: {}]   ;;  %s7204_s3 = inlined_call_operand.hbm [shape: f32[1,128], index: 3, kind: input, shape index: {}]   ;;  %s7205_s4 = inlined_call_operand.vmem [shape: bf16[2,128,384], index: 4, kind: input, shape index: {}]   ;;  %s7206_s5 = inlined_call_operand.vmem [shape: f32[2,1,384], index: 5, kind: input, shape index: {}]   ;;  %s7207_s6 = inlined_call_operand.vmem [shape: bf16[2,128,128], index: 6, kind: input, shape index: {}]   ;;  %s7208_s7 = inlined_call_operand.vmem [shape: f32[2,1,128], index: 7, kind: input, shape index: {}]   ;;  %s7209_s8 = inlined_call_operand.hbm [shape: f32[2,1,128], index: 8, kind: input, shape index: {}]   ;;  %s7210_s9 = inlined_call_operand.hbm [shape: f32[2,1,128], index: 9, kind: input, shape index: {}]   ;;  %s7211_s10 = inlined_call_operand.hbm [shape: bf16[2,128,512], index: 10, kind: input, shape index: {}]   ;;  %s7212_s11 = inlined_call_operand.hbm [shape: f32[2,1,512], index: 11, kind: input, shape index: {}]   ;;  %s7213_s12 = inlined_call_operand.hbm [shape: bf16[2,512,128], index: 12, kind: input, shape index: {}]   ;;  %s7214_s13 = inlined_call_operand.hbm [shape: f32[2,1,128], index: 13, kind: input, shape index: {}]   ;;  %s7215_s14 = inlined_call_operand.hbm [shape: f32[2,1,128], index: 14, kind: input, shape index: {}]   ;;  %s7216_s15 = inlined_call_operand.hbm [shape: f32[2,1,128], index: 15, kind: input, shape index: {}]   ;;  %s7217_s16 = inlined_call_operand.hbm [shape: bf16[128,128], index: 16, kind: input, shape index: {}]   ;;  %s7218_s17 = inlined_call_operand.hbm [shape: f32[1,128], index: 17, kind: input, shape index: {}]   ;;  %s7219_s18 = inlined_call_operand.vmem [shape: bf16[128,2], index: 18, kind: input, shape index: {}]   ;;  %s7220_s19 = inlined_call_operand.hbm [shape: f32[1,2], index: 19, kind: input, shape index: {}]   ;;  %s7221_s20 = inlined_call_operand.hbm [shape: bf16[128,128], index: 20, kind: input, shape index: {}]   ;;  %s7222_s21 = inlined_call_operand.hbm [shape: f32[1,128], index: 21, kind: input, shape index: {}]   ;;  %s7223_s22 = inlined_call_operand.hbm [shape: f32[1,128], index: 22, kind: input, shape index: {}]   ;;  %s7224_s23 = inlined_call_operand.hbm [shape: f32[1,128], index: 23, kind: input, shape index: {}]   ;;  %s7225_s24 = inlined_call_operand.hbm [shape: bf16[128,512], index: 24, kind: input, shape index: {}]   ;;  %s7226_s25 = inlined_call_operand.hbm [shape: f32[1,512], index: 25, kind: input, shape index: {}]   ;;  %s7227_s26 = inlined_call_operand.hbm [shape: f32[16,512], index: 26, kind: output, shape index: {0}]   ;;  %s7228_s27 = inlined_call_operand.hbm [shape: f32[2,2], index: 27, kind: output, shape index: {1}]  }
   0x1   :  { %7235 = sst [smem:[#allocation47_spill]] %s7201_s0 }
   0x2   :  { %7236 = sst [smem:[#allocation48_spill]] %s7202_s1 }
   0x3   :  { %7237 = sst [smem:[#allocation49_spill]] %s7203_s2 }
   0x4   :  { %7238 = sst [smem:[#allocation50_spill]] %s7204_s3 }
   0x5   :  { %7239 = sst [smem:[#allocation51_spill]] %s7205_s4 }
   0x6   :  { %7240 = sst [smem:[#allocation52_spill]] %s7206_s5 }
   0x7   :  { %7241 = sst [smem:[#allocation53_spill]] %s7207_s6 }
   0x8   :  { %7242 = sst [smem:[#allocation54_spill]] %s7208_s7 }
   0x9   :  { %7243 = sst [smem:[#allocation55_spill]] %s7209_s8 }
   0xa   :  { %7244 = sst [smem:[#allocation56_spill]] %s7210_s9 }
   0xb   :  { %7245 = sst [smem:[#allocation57_spill]] %s7211_s10 }
   0xc   :  { %7246 = sst [smem:[#allocation58_spill]] %s7212_s11 }
   0xd   :  { %33 = vsyncpa [#allocation3], 0 }
   0xe   :  { %34 = vsyncpa [#allocation6], 0 }
   0xf   :  { %35 = vsyncpa [#allocation9], 0 }
  0x10   :  { %36 = vsyncpa [#allocation12], 0 }
  0x11   :  { %37 = vsyncpa [#allocation15], 0 }
  0x12   :  { %38 = vsyncpa [#allocation18], 0 }
  0x13   :  { %39 = vsyncpa [#allocation21], 0 }
  0x14   :  { %40 = vsyncpa [#allocation24], 0 }
  0x15   :  { %41 = vsyncpa [#allocation27], 0 }
  0x16   :  { %42 = vsyncpa [#allocation30], 0 }
  0x17   :  { %43 = vsyncpa [#allocation4], 0 }
  0x18   :  { %44 = vsyncpa [#allocation34], 0  ;;  %s6260_s7 = smov [#allocation5]  }
  0x19   :  { %s65_s4 = sshll.u32 %s6260_s7, 4  ;;  %s66_s4 = int_to_ptr.vmem [resolvable:$true] %s65_s4 }
  0x1a   :  { %s5824_s8 = scalar_lea.vmem %s66_s4, 16  ;;  %s5828_s30 = scalar_lea.vmem %s66_s4, 32 }
  0x1b   :  { %p5825_p0 = scmp.ne.s32.totalorder %s66_s4, %s5824_s8  ;;  %p5829_p1 = scmp.lt.s32.totalorder %s66_s4, %s66_s4 }
  0x1c   :  { %p5830_p2 = scmp.lt.s32.totalorder %s5828_s30, %s5824_s8 }
  0x1e   :  { %p5831_p3 = por %p5830_p2, %p5829_p1 }
  0x20   :  { %p5832_p4 = pnand %p5831_p3, %p5825_p0 }
  0x22   :  { %5835 = shalt.err (!%p5832_p4)
}
  0x23   :  { %s7247_s28 = sld [smem:[#allocation50_spill]]  ;;  %s6261_s0 = smov [#allocation8]  }
  0x24   :  { %s94_s10 = sshll.u32 %s6261_s0, 4  ;;  %s6262_s29 = smov [#allocation11]   ;;  %s95_s10 = int_to_ptr.vmem [resolvable:$true] %s94_s10 }
  0x25   :  { %s118_s1 = sshll.u32 %s6262_s29, 4  ;;  %s5844_s6 = scalar_lea.vmem %s95_s10, 32  ;;  %s119_s1 = int_to_ptr.vmem [resolvable:$true] %s118_s1 }
  0x26   :  { %p5845_p5 = scmp.ne.s32.totalorder %s95_s10, %s5844_s6  ;;  %p5849_p6 = scmp.lt.s32.totalorder %s95_s10, %s95_s10 }
  0x27   :  { %p5850_p7 = scmp.lt.s32.totalorder %s5844_s6, %s5844_s6 }
  0x29   :  { %68 = dma.hbm_to_vmem [thread:$0]  %s7247_s28, 16, %s66_s4, [#allocation6]  }
  0x2a   :  { %p5851_p8 = por %p5850_p7, %p5849_p6 }
  0x2c   :  { %p5852_p9 = pnand %p5851_p8, %p5845_p5 }
  0x2e   :  { %5855 = shalt.err (!%p5852_p9)
}
  0x2f   :  { %s6263_s11 = smov 16   ;;  %s6264_s2 = smov 1  }
  0x30   :  { %s7248_s4 = sld [smem:[#allocation56_spill]]  ;;  %s5864_s8 = scalar_lea.vmem %s119_s1, 128 }
  0x31   :  { %p5865_p10 = scmp.ne.s32.totalorder %s119_s1, %s5864_s8  ;;  %p5869_p11 = scmp.lt.s32.totalorder %s119_s1, %s119_s1 }
  0x32   :  { %p5870_p12 = scmp.lt.s32.totalorder %s5864_s8, %s5864_s8 }
  0x34   :  { %p5871_p13 = por %p5870_p12, %p5869_p11 }
  0x36   :  { %100 = dma.hbm_to_vmem [thread:$0]  %s7248_s4, 32, %s95_s10, [#allocation9], %s6263_s11, %s6263_s11, %s6264_s2  }
  0x37   :  { %p5872_p0 = pnand %p5871_p13, %p5865_p10 }
  0x39   :  { %5875 = shalt.err (!%p5872_p0)
}
  0x3a   :  { %s6265_s30 = smov 64   ;;  %s6266_s9 = smov 4  }
  0x3b   :  { %s7249_s0 = sld [smem:[#allocation58_spill]]  ;;  %s6267_s29 = smov [#allocation14]  }
  0x3c   :  { %s142_s6 = sshll.u32 %s6267_s29, 4  ;;  %s6268_s10 = smov [#allocation17]   ;;  %s143_s6 = int_to_ptr.vmem [resolvable:$true] %s142_s6 }
  0x3d   :  { %s166_s3 = sshll.u32 %s6268_s10, 4  ;;  %s5884_s7 = scalar_lea.vmem %s143_s6, 32  ;;  %s167_s3 = int_to_ptr.vmem [resolvable:$true] %s166_s3 }
  0x3e   :  { %p5885_p1 = scmp.ne.s32.totalorder %s143_s6, %s5884_s7  ;;  %p5889_p2 = scmp.lt.s32.totalorder %s143_s6, %s143_s6 }
  0x3f   :  { %p5890_p3 = scmp.lt.s32.totalorder %s5884_s7, %s5884_s7 }
  0x41   :  { %124 = dma.hbm_to_vmem [thread:$0]  %s7249_s0, 128, %s119_s1, [#allocation12], %s6265_s30, %s6265_s30, %s6266_s9  }
  0x42   :  { %p5891_p4 = por %p5890_p3, %p5889_p2 }
  0x44   :  { %p5892_p5 = pnand %p5891_p4, %p5885_p1 }
  0x46   :  { %5895 = shalt.err (!%p5892_p5)
}
  0x47   :  { %148 = dma.hbm_to_vmem [thread:$0]  %s7214_s13, 32, %s143_s6, [#allocation15], %s6263_s11, %s6263_s11, %s6264_s2  }
  0x48   :  { %s5904_s1 = scalar_lea.vmem %s167_s3, 32  ;;  %p5909_p7 = scmp.lt.s32.totalorder %s167_s3, %s167_s3 }
  0x49   :  { %p5905_p6 = scmp.ne.s32.totalorder %s167_s3, %s5904_s1  ;;  %p5910_p8 = scmp.lt.s32.totalorder %s5904_s1, %s5904_s1 }
  0x4b   :  { %p5911_p9 = por %p5910_p8, %p5909_p7 }
  0x4d   :  { %p5912_p10 = pnand %p5911_p9, %p5905_p6 }
  0x4f   :  { %5915 = shalt.err (!%p5912_p10)
}
  0x50   :  { %172 = dma.hbm_to_vmem [thread:$0]  %s7216_s15, 32, %s167_s3, [#allocation18], %s6263_s11, %s6263_s11, %s6264_s2  }
  0x51   :  { %s6269_s0 = smov [#allocation20]   ;;  %s6270_s10 = smov [#allocation23]  }
  0x52   :  { %s191_s29 = sshll.u32 %s6269_s0, 4  ;;  %s212_s13 = sshll.u32 %s6270_s10, 4  ;;  %s192_s29 = int_to_ptr.vmem [resolvable:$true] %s191_s29  ;;  %s213_s13 = int_to_ptr.vmem [resolvable:$true] %s212_s13 }
  0x53   :  { %s5924_s6 = scalar_lea.vmem %s192_s29, 16  ;;  %s5928_s7 = scalar_lea.vmem %s192_s29, 32 }
  0x54   :  { %p5925_p11 = scmp.ne.s32.totalorder %s192_s29, %s5924_s6  ;;  %p5929_p12 = scmp.lt.s32.totalorder %s192_s29, %s192_s29 }
  0x55   :  { %p5930_p13 = scmp.lt.s32.totalorder %s5928_s7, %s5924_s6 }
  0x57   :  { %p5931_p0 = por %p5930_p13, %p5929_p12 }
  0x59   :  { %p5932_p1 = pnand %p5931_p0, %p5925_p11 }
  0x5b   :  { %5935 = shalt.err (!%p5932_p1)
}
  0x5c   :  { %194 = dma.hbm_to_vmem [thread:$0]  %s7218_s17, 16, %s192_s29, [#allocation21]  }
  0x5d   :  { %s5944_s1 = scalar_lea.vmem %s213_s13, 1024  ;;  %p5949_p3 = scmp.lt.s32.totalorder %s213_s13, %s213_s13 }
  0x5e   :  { %p5945_p2 = scmp.ne.s32.totalorder %s213_s13, %s5944_s1  ;;  %p5950_p4 = scmp.lt.s32.totalorder %s5944_s1, %s5944_s1 }
  0x60   :  { %p5951_p5 = por %p5950_p4, %p5949_p3 }
  0x62   :  { %p5952_p6 = pnand %p5951_p5, %p5945_p2 }
  0x64   :  { %5955 = shalt.err (!%p5952_p6)
}
  0x65   :  { %218 = dma.hbm_to_vmem [thread:$0]  %s7221_s20, 1024, %s213_s13, [#allocation24], %s6265_s30, %s6265_s30, %s6266_s9  }
  0x66   :  { %s6271_s5 = smov [#allocation26]  }
  0x67   :  { %s235_s28 = sshll.u32 %s6271_s5, 4  ;;  %s236_s28 = int_to_ptr.vmem [resolvable:$true] %s235_s28 }
  0x68   :  { %s5964_s0 = scalar_lea.vmem %s236_s28, 16  ;;  %s5968_s17 = scalar_lea.vmem %s236_s28, 32 }
  0x69   :  { %p5965_p7 = scmp.ne.s32.totalorder %s236_s28, %s5964_s0  ;;  %p5969_p8 = scmp.lt.s32.totalorder %s236_s28, %s236_s28 }
  0x6a   :  { %p5970_p9 = scmp.lt.s32.totalorder %s5968_s17, %s5964_s0 }
  0x6c   :  { %p5971_p10 = por %p5970_p9, %p5969_p8 }
  0x6e   :  { %p5972_p11 = pnand %p5971_p10, %p5965_p7 }
  0x70   :  { %5975 = shalt.err (!%p5972_p11)
}
  0x71   :  { %238 = dma.hbm_to_vmem [thread:$0]  %s7223_s22, 16, %s236_s28, [#allocation27]  }
  0x72   :  { %s6272_s6 = smov [#allocation29]   ;;  %s6273_s4 = smov [#allocation2]  }
  0x73   :  { %s254_s7 = sshll.u32 %s6272_s6, 4  ;;  %s55_s20 = sshll.u32 %s6273_s4, 4  ;;  %s255_s7 = int_to_ptr.vmem [resolvable:$true] %s254_s7  ;;  %s56_s20 = int_to_ptr.vmem [resolvable:$true] %s55_s20 }
  0x74   :  { %s5984_s13 = scalar_lea.vmem %s255_s7, 4096  ;;  %p5989_p13 = scmp.lt.s32.totalorder %s255_s7, %s255_s7 }
  0x75   :  { %p5985_p12 = scmp.ne.s32.totalorder %s255_s7, %s5984_s13  ;;  %p5990_p0 = scmp.lt.s32.totalorder %s5984_s13, %s5984_s13 }
  0x77   :  { %p5991_p1 = por %p5990_p0, %p5989_p13 }
  0x79   :  { %p5992_p2 = pnand %p5991_p1, %p5985_p12 }
  0x7b   :  { %5995 = shalt.err (!%p5992_p2)
}
  0x7c   :  { %s6274_s8 = smov 256   ;;  %s6004_s22 = scalar_lea.vmem %s56_s20, 16 }
  0x7d   :  { %260 = dma.hbm_to_vmem [thread:$0]  %s7225_s24, 4096, %s255_s7, [#allocation30], %s6274_s8, %s6274_s8, %s6263_s11  }
  0x7e   :  { %p6005_p3 = scmp.ne.s32.totalorder %s56_s20, %s6004_s22  ;;  %s6008_s3 = scalar_lea.vmem %s56_s20, 32 }
  0x7f   :  { %p6009_p4 = scmp.lt.s32.totalorder %s56_s20, %s56_s20  ;;  %p6010_p5 = scmp.lt.s32.totalorder %s6008_s3, %s6004_s22 }
  0x81   :  { %p6011_p6 = por %p6010_p5, %p6009_p4 }
  0x83   :  { %p6012_p7 = pnand %p6011_p6, %p6005_p3 }
  0x85   :  { %6015 = shalt.err (!%p6012_p7)
}
  0x86   :  { %s7250_s0 = sld [smem:[#allocation49_spill]]  ;;  %s6275_s17 = smov [#allocation7]  }
  0x87   :  { %s82_s29 = sshll.u32 %s6275_s17, 4  ;;  %s6276_s10 = smov [#allocation10]   ;;  %s83_s29 = int_to_ptr.vmem [resolvable:$true] %s82_s29 }
  0x88   :  { %s106_s6 = sshll.u32 %s6276_s10, 4  ;;  %s6024_s4 = scalar_lea.vmem %s83_s29, 32  ;;  %s107_s6 = int_to_ptr.vmem [resolvable:$true] %s106_s6 }
  0x89   :  { %p6025_p8 = scmp.ne.s32.totalorder %s83_s29, %s6024_s4  ;;  %p6029_p9 = scmp.lt.s32.totalorder %s83_s29, %s83_s29 }
  0x8a   :  { %p6030_p10 = scmp.lt.s32.totalorder %s6024_s4, %s6024_s4 }
  0x8c   :  { %58 = dma.hbm_to_vmem [thread:$0]  %s7250_s0, 16, %s56_s20, [#allocation3]  }
  0x8d   :  { %p6031_p11 = por %p6030_p10, %p6029_p9 }
  0x8f   :  { %p6032_p12 = pnand %p6031_p11, %p6025_p8 }
  0x91   :  { %6035 = shalt.err (!%p6032_p12)
}
  0x92   :  { %s7251_s13 = sld [smem:[#allocation55_spill]]  ;;  %s6044_s20 = scalar_lea.vmem %s107_s6, 8192 }
  0x93   :  { %p6045_p13 = scmp.ne.s32.totalorder %s107_s6, %s6044_s20  ;;  %p6049_p0 = scmp.lt.s32.totalorder %s107_s6, %s107_s6 }
  0x94   :  { %p6050_p1 = scmp.lt.s32.totalorder %s6044_s20, %s6044_s20 }
  0x96   :  { %p6051_p2 = por %p6050_p1, %p6049_p0 }
  0x98   :  { %88 = dma.hbm_to_vmem [thread:$0]  %s7251_s13, 32, %s83_s29, [#allocation6], %s6263_s11, %s6263_s11, %s6264_s2  }
  0x99   :  { %p6052_p3 = pnand %p6051_p2, %p6045_p13 }
  0x9b   :  { %6055 = shalt.err (!%p6052_p3)
}
  0x9c   :  { %s7252_s22 = sld [smem:[#allocation57_spill]]  ;;  %s6277_s3 = smov [#allocation13]  }
  0x9d   :  { %s130_s5 = sshll.u32 %s6277_s3, 4  ;;  %s6278_s28 = smov [#allocation16]   ;;  %s131_s5 = int_to_ptr.vmem [resolvable:$true] %s130_s5 }
  0x9e   :  { %s154_s0 = sshll.u32 %s6278_s28, 4  ;;  %s6064_s17 = scalar_lea.vmem %s131_s5, 8192  ;;  %s155_s0 = int_to_ptr.vmem [resolvable:$true] %s154_s0 }
  0x9f   :  { %p6065_p4 = scmp.ne.s32.totalorder %s131_s5, %s6064_s17  ;;  %p6069_p5 = scmp.lt.s32.totalorder %s131_s5, %s131_s5 }
  0xa0   :  { %p6070_p6 = scmp.lt.s32.totalorder %s6064_s17, %s6064_s17 }
  0xa2   :  { %112 = dma.hbm_to_vmem [thread:$0]  %s7252_s22, 8192, %s107_s6, [#allocation9], %s6274_s8, %s6274_s8, %s6263_s11  }
  0xa3   :  { %p6071_p7 = por %p6070_p6, %p6069_p5 }
  0xa5   :  { %p6072_p8 = pnand %p6071_p7, %p6065_p4 }
  0xa7   :  { %6075 = shalt.err (!%p6072_p8)
}
  0xa8   :  { %136 = dma.hbm_to_vmem [thread:$0]  %s7213_s12, 8192, %s131_s5, [#allocation12], %s6265_s30, %s6265_s30, %s6266_s9  }
  0xa9   :  { %s6084_s8 = scalar_lea.vmem %s155_s0, 32  ;;  %p6089_p10 = scmp.lt.s32.totalorder %s155_s0, %s155_s0 }
  0xaa   :  { %p6085_p9 = scmp.ne.s32.totalorder %s155_s0, %s6084_s8  ;;  %p6090_p11 = scmp.lt.s32.totalorder %s6084_s8, %s6084_s8 }
  0xac   :  { %p6091_p12 = por %p6090_p11, %p6089_p10 }
  0xae   :  { %p6092_p13 = pnand %p6091_p12, %p6085_p9 }
  0xb0   :  { %6095 = shalt.err (!%p6092_p13)
}
  0xb1   :  { %160 = dma.hbm_to_vmem [thread:$0]  %s7215_s14, 32, %s155_s0, [#allocation15], %s6263_s11, %s6263_s11, %s6264_s2  }
  0xb2   :  { %s6279_s24 = smov [#allocation19]   ;;  %s6280_s13 = smov [#allocation22]  }
  0xb3   :  { %s178_s7 = sshll.u32 %s6279_s24, 4  ;;  %s203_s12 = sshll.u32 %s6280_s13, 4  ;;  %s179_s7 = int_to_ptr.vmem [resolvable:$true] %s178_s7  ;;  %s204_s12 = int_to_ptr.vmem [resolvable:$true] %s203_s12 }
  0xb4   :  { %s6104_s20 = scalar_lea.vmem %s179_s7, 1024  ;;  %p6109_p1 = scmp.lt.s32.totalorder %s179_s7, %s179_s7 }
  0xb5   :  { %p6105_p0 = scmp.ne.s32.totalorder %s179_s7, %s6104_s20  ;;  %p6110_p2 = scmp.lt.s32.totalorder %s6104_s20, %s6104_s20 }
  0xb7   :  { %p6111_p3 = por %p6110_p2, %p6109_p1 }
  0xb9   :  { %p6112_p4 = pnand %p6111_p3, %p6105_p0 }
  0xbb   :  { %6115 = shalt.err (!%p6112_p4)
}
  0xbc   :  { %184 = dma.hbm_to_vmem [thread:$0]  %s7217_s16, 1024, %s179_s7, [#allocation18], %s6265_s30, %s6265_s30, %s6266_s9  }
  0xbd   :  { %s6124_s14 = scalar_lea.vmem %s204_s12, 16  ;;  %s6128_s11 = scalar_lea.vmem %s204_s12, 32 }
  0xbe   :  { %p6125_p5 = scmp.ne.s32.totalorder %s204_s12, %s6124_s14  ;;  %p6129_p6 = scmp.lt.s32.totalorder %s204_s12, %s204_s12 }
  0xbf   :  { %p6130_p7 = scmp.lt.s32.totalorder %s6128_s11, %s6124_s14 }
  0xc1   :  { %p6131_p8 = por %p6130_p7, %p6129_p6 }
  0xc3   :  { %p6132_p9 = pnand %p6131_p8, %p6125_p5 }
  0xc5   :  { %6135 = shalt.err (!%p6132_p9)
}
  0xc6   :  { %206 = dma.hbm_to_vmem [thread:$0]  %s7220_s19, 16, %s204_s12, [#allocation21]  }
  0xc7   :  { %s6281_s3 = smov [#allocation25]   ;;  %s6282_s28 = smov [#allocation28]  }
  0xc8   :  { %s225_s5 = sshll.u32 %s6281_s3, 4  ;;  %s245_s0 = sshll.u32 %s6282_s28, 4  ;;  %s226_s5 = int_to_ptr.vmem [resolvable:$true] %s225_s5  ;;  %s246_s0 = int_to_ptr.vmem [resolvable:$true] %s245_s0 }
  0xc9   :  { %s6144_s17 = scalar_lea.vmem %s226_s5, 16  ;;  %s6148_s16 = scalar_lea.vmem %s226_s5, 32 }
  0xca   :  { %p6145_p10 = scmp.ne.s32.totalorder %s226_s5, %s6144_s17  ;;  %p6149_p11 = scmp.lt.s32.totalorder %s226_s5, %s226_s5 }
  0xcb   :  { %p6150_p12 = scmp.lt.s32.totalorder %s6148_s16, %s6144_s17 }
  0xcd   :  { %p6151_p13 = por %p6150_p12, %p6149_p11 }
  0xcf   :  { %p6152_p0 = pnand %p6151_p13, %p6145_p10 }
  0xd1   :  { %6155 = shalt.err (!%p6152_p0)
}
  0xd2   :  { %228 = dma.hbm_to_vmem [thread:$0]  %s7222_s21, 16, %s226_s5, [#allocation24]  }
  0xd3   :  { %s6164_s10 = scalar_lea.vmem %s246_s0, 16  ;;  %s6168_s19 = scalar_lea.vmem %s246_s0, 32 }
  0xd4   :  { %p6165_p1 = scmp.ne.s32.totalorder %s246_s0, %s6164_s10  ;;  %p6169_p2 = scmp.lt.s32.totalorder %s246_s0, %s246_s0 }
  0xd5   :  { %p6170_p3 = scmp.lt.s32.totalorder %s6168_s19, %s6164_s10 }
  0xd7   :  { %p6171_p4 = por %p6170_p3, %p6169_p2 }
  0xd9   :  { %p6172_p5 = pnand %p6171_p4, %p6165_p1 }
  0xdb   :  { %6175 = shalt.err (!%p6172_p5)
}
  0xdc   :  { %248 = dma.hbm_to_vmem [thread:$0]  %s7224_s23, 16, %s246_s0, [#allocation27]  }
  0xdd   :  { %s6283_s4 = smov [#allocation31]  }
  0xde   :  { %s267_s24 = sshll.u32 %s6283_s4, 4  ;;  %s268_s24 = int_to_ptr.vmem [resolvable:$true] %s267_s24 }
  0xdf   :  { %s6184_s7 = scalar_lea.vmem %s268_s24, 64  ;;  %p6189_p7 = scmp.lt.s32.totalorder %s268_s24, %s268_s24 }
  0xe0   :  { %p6185_p6 = scmp.ne.s32.totalorder %s268_s24, %s6184_s7  ;;  %p6190_p8 = scmp.lt.s32.totalorder %s6184_s7, %s6184_s7 }
  0xe2   :  { %p6191_p9 = por %p6190_p8, %p6189_p7 }
  0xe4   :  { %p6192_p10 = pnand %p6191_p9, %p6185_p6 }
  0xe6   :  { %6195 = shalt.err (!%p6192_p10)
}
  0xe7   :  { %270 = dma.hbm_to_vmem [thread:$0]  %s7226_s25, 64, %s268_s24, [#allocation30]  }
  0xe8   :  { %6236 = dma.done.wait [#allocation3], 16  }
  0xe9   :  { %6237 = vsyncadd [#allocation3], 4294967280 }
  0xea   :  { %6238 = dma.done.wait [#allocation6], 48  }
  0xeb   :  { %6239 = vsyncadd [#allocation6], 4294967248 }
  0xec   :  { %6240 = dma.done.wait [#allocation9], 8224  }
  0xed   :  { %6241 = vsyncadd [#allocation9], 4294959072 }
  0xee   :  { %6242 = dma.done.wait [#allocation12], 8320  }
  0xef   :  { %6243 = vsyncadd [#allocation12], 4294958976 }
  0xf0   :  { %6244 = dma.done.wait [#allocation15], 64  }
  0xf1   :  { %6245 = vsyncadd [#allocation15], 4294967232 }
  0xf2   :  { %6246 = dma.done.wait [#allocation18], 1056  }
  0xf3   :  { %6247 = vsyncadd [#allocation18], 4294966240 }
  0xf4   :  { %6248 = dma.done.wait [#allocation21], 32  }
  0xf5   :  { %6249 = vsyncadd [#allocation21], 4294967264 }
  0xf6   :  { %6250 = dma.done.wait [#allocation24], 1040  }
  0xf7   :  { %6251 = vsyncadd [#allocation24], 4294966256 }
  0xf8   :  { %6252 = dma.done.wait [#allocation27], 32  }
  0xf9   :  { %6253 = vsyncadd [#allocation27], 4294967264 }
  0xfa   :  { %6254 = dma.done.wait [#allocation30], 4160  }
  0xfb   :  { %6255 = vsyncadd [#allocation30], 4294963136  ;;  %s7253_s12 = sld [smem:[#allocation47_spill]]  ;;  %v6284_v4 = vmov 0.0   ;;  %v6285_v27 = vmov 0   ;;  %vm6286_vm0 = vmmov 0   ;;  %v409_v53 = vlaneseq }
  0xfc   :  { %s7254_s11 = sld [smem:[#allocation51_spill]]  ;;  %5078 = vmatprep.subr.bf16.mxu1 %v6284_v4  ;;  %584 = vmatprep.mubr.bf16.mxu0 %v6285_v27  ;;  %v4562_v44 = vld [vmem:[#allocation2] ss:$0 sm:$0xff]  ;;  %v4563_v48 = vld [vmem:[#allocation5] ss:$0 sm:$0xff]  ;;  %vm639_vm1 = vcmask 261120  }
  0xfd   :  { %5094 = vmatprep.mubr.msk.bf16.mxu1 %vm6286_vm0, %v6284_v4  ;;  %v6633_v54 = vshrl.u32 %v409_v53, 7  ;;  %s7255_s20 = sld [smem:[#allocation52_spill]]  ;;  %s6287_s1 = smov 96   ;;  %vm691_vm2 = vcmask 130048   ;;  %vm1163_vm3 = vcmask 523264   ;;  %vm1166_vm4 = vcmask 785408  }
  0xfe   :  { %s6288_s15 = smov 32   ;;  %s7256_s22 = sld [smem:[#allocation48_spill]]  ;;  %vm4293_vm5 = vcmask 1040384  }
  0xff   :  { %v6636_v55 = vsub.s32 0, %v6633_v54  ;;  %v6639_v56 = vsub.s32 2, %v6633_v54  ;;  %v6645_v58 = vsub.s32 1, %v6633_v54  ;;  %s7257_s17 = sld [smem:[#allocation53_spill]] }
 0x100   :  { %s7258_s2 = sld [smem:[#allocation54_spill]] }
 0x101   :  { %v329_v0 = vld [vmem:[%s7253_s12] sm:$0xff]  ;;  %v330_v1 = vld [vmem:[%s7253_s12 + $0x8] sm:$0xff] }
 0x102   :  { %333 = vadd.xlane.f32.xlu0 %v329_v0  ;;  %v5376_v2 = vld [vmem:[%s7254_s11 + $0xac] ss:$12 sps:$4 sm:$0xff]   ;;  %v5378_v3 = vld [vmem:[%s7254_s11 + $0xa8] ss:$12 sps:$4 sm:$0xff]   ;;  %v5379_v5 = vld [vmem:[%s7254_s11 + $0xb0] ss:$12 sps:$4 sm:$0xff]  }
 0x103   :  { %552 = vmatprep.subr.bf16.mxu0 %v5376_v2  ;;  %5079 = vmatpush3.bf16.msra.mxu1 %v5379_v5  ;;  %v5380_v14 = vld [vmem:[%s7254_s11 + $0x94] ss:$12 sps:$4 sm:$0xff]   ;;  %v5382_v15 = vld [vmem:[%s7254_s11 + $0x90] ss:$12 sps:$4 sm:$0xff]   ;;  %v5383_v16 = vld [vmem:[%s7254_s11 + $0x98] ss:$12 sps:$4 sm:$0xff]  }
 0x104   :  { %553 = vmatpush1.bf16.msra.mxu0 %v5378_v3  ;;  %5080 = vmatprep.subr.bf16.mxu1 %v6284_v4  ;;  %v5384_v17 = vld [vmem:[%s7254_s11 + $0x7c] ss:$12 sps:$4 sm:$0xff]   ;;  %v5386_v18 = vld [vmem:[%s7254_s11 + $0x78] ss:$12 sps:$4 sm:$0xff]   ;;  %v5387_v19 = vld [vmem:[%s7254_s11 + $0x80] ss:$12 sps:$4 sm:$0xff]  }
 0x105   :  { %554 = vmatprep.subr.bf16.mxu0 %v5380_v14  ;;  %v5388_v20 = vld [vmem:[%s7254_s11 + $0x64] ss:$12 sps:$4 sm:$0xff]   ;;  %v5390_v21 = vld [vmem:[%s7254_s11 + $0x60] ss:$12 sps:$4 sm:$0xff]   ;;  %v5391_v22 = vld [vmem:[%s7254_s11 + $0x68] ss:$12 sps:$4 sm:$0xff]  }
 0x106   :  { %335 = vadd.xlane.f32.xlu0 %v330_v1  ;;  %v5392_v23 = vld [vmem:[%s7254_s11 + $0x4c] ss:$12 sps:$4 sm:$0xff]   ;;  %v5394_v24 = vld [vmem:[%s7254_s11 + $0x48] ss:$12 sps:$4 sm:$0xff]   ;;  %v5395_v25 = vld [vmem:[%s7254_s11 + $0x50] ss:$12 sps:$4 sm:$0xff]  }
 0x107   :  { %5081 = vmatpush3.bf16.msra.mxu1 %v5383_v16  ;;  %v5396_v26 = vld [vmem:[%s7254_s11 + $0x34] ss:$12 sps:$4 sm:$0xff]   ;;  %v5398_v28 = vld [vmem:[%s7254_s11 + $0x30] ss:$12 sps:$4 sm:$0xff]   ;;  %v5399_v29 = vld [vmem:[%s7254_s11 + $0x38] ss:$12 sps:$4 sm:$0xff]  }
 0x108   :  { %555 = vmatpush1.bf16.msra.mxu0 %v5382_v15  ;;  %5082 = vmatprep.subr.bf16.mxu1 %v6284_v4  ;;  %v5400_v30 = vld [vmem:[%s7254_s11 + $0x1c] ss:$12 sps:$4 sm:$0xff]   ;;  %v5402_v31 = vld [vmem:[%s7254_s11 + $0x18] ss:$12 sps:$4 sm:$0xff]   ;;  %v5403_v32 = vld [vmem:[%s7254_s11 + $0x20] ss:$12 sps:$4 sm:$0xff]  }
 0x109   :  { %556 = vmatprep.subr.bf16.mxu0 %v5384_v17  ;;  %v5404_v33 = vld [vmem:[%s7254_s11 + $0x4] ss:$12 sps:$4 sm:$0xff]   ;;  %v5406_v34 = vld [vmem:[%s7254_s11] ss:$12 sps:$4 sm:$0xff]   ;;  %v5407_v35 = vld [vmem:[%s7254_s11 + $0x8] ss:$12 sps:$4 sm:$0xff]  }
 0x10a   :  { %v407_v57 = vld [vmem:[%s7255_s20] sm:$0x7] }
 0x10b   :  { %5083 = vmatpush3.bf16.msra.mxu1 %v5387_v19  ;;  %v412_v61 = vrot.slane %v407_v57, %v6636_v55  ;;  %v420_v62 = vrot.slane %v407_v57, %v6639_v56 }
 0x10c   :  { %557 = vmatpush1.bf16.msra.mxu0 %v5386_v18  ;;  %5084 = vmatprep.subr.bf16.mxu1 %v6284_v4 }
 0x10d   :  { %558 = vmatprep.subr.bf16.mxu0 %v5388_v20 }
 0x10f   :  { %5085 = vmatpush3.bf16.msra.mxu1 %v5391_v22 }
 0x110   :  { %559 = vmatpush1.bf16.msra.mxu0 %v5390_v21  ;;  %5086 = vmatprep.subr.bf16.mxu1 %v6284_v4 }
 0x111   :  { %560 = vmatprep.subr.bf16.mxu0 %v5392_v23 }
 0x113   :  { %5087 = vmatpush3.bf16.msra.mxu1 %v5395_v25 }
 0x114   :  { %561 = vmatpush1.bf16.msra.mxu0 %v5394_v24  ;;  %5088 = vmatprep.subr.bf16.mxu1 %v6284_v4 }
 0x115   :  { %562 = vmatprep.subr.bf16.mxu0 %v5396_v26 }
 0x117   :  { %5089 = vmatpush3.bf16.msra.mxu1 %v5399_v29 }
 0x118   :  { %563 = vmatpush1.bf16.msra.mxu0 %v5398_v28  ;;  %5090 = vmatprep.subr.bf16.mxu1 %v6284_v4  ;;  %v372_v28 = vld [vmem:[%s7256_s22] sm:$0xff] }
 0x119   :  { %564 = vmatprep.subr.bf16.mxu0 %v5400_v30 }
 0x11b   :  { %5091 = vmatpush3.bf16.msra.mxu1 %v5403_v32 }
 0x11c   :  { %565 = vmatpush1.bf16.msra.mxu0 %v5402_v31  ;;  %5092 = vmatprep.subr.bf16.mxu1 %v6284_v4 }
 0x11d   :  { %566 = vmatprep.subr.bf16.mxu0 %v5404_v33  ;;  %v373_v33 = vld [vmem:[%s7256_s22 + $0x8] sm:$0xff] }
 0x11f   :  { %5093 = vmatpush3.bf16.msra.mxu1 %v5407_v35 }
 0x120   :  { %567 = vmatpush1.bf16.msra.mxu0 %v5406_v34  ;;  %5104 = vmatprep.subr.bf16.mxu1 %v6284_v4 }
 0x121   :  { %5098 = vmatprep.subr.bf16.mxu0 %v6284_v4 }
 0x18b   :  { %v334_v6 = vpop.xlane.xlu0 %333 }
 0x18c   :  { %v338_v7 = vmul.f32 0.0078125, %v334_v6 }
 0x18e   :  { %v6539_v8 = vsub.f32 %v329_v0, %v338_v7 }
 0x18f   :  { %v336_v9 = vpop.xlane.xlu0 %335 }
 0x190   :  { %v339_v10 = vmul.f32 0.0078125, %v336_v9  ;;  %v342_v11 = vmul.f32 %v6539_v8, %v6539_v8 }
 0x192   :  { %v6543_v12 = vsub.f32 %v330_v1, %v339_v10  ;;  %344 = vadd.xlane.f32.xlu1 %v342_v11  ;;  %v416_v1 = vrot.slane %v407_v57, %v6645_v58 }
 0x194   :  { %v343_v13 = vmul.f32 %v6543_v12, %v6543_v12 }
 0x196   :  { %346 = vadd.xlane.f32.xlu1 %v343_v13 }
 0x21b   :  { %v345_v36 = vpop.xlane.xlu1 %344 }
 0x21c   :  { %v348_v37 = vmul.f32 0.0078125, %v345_v36 }
 0x21e   :  { %v350_v38 = vadd.f32 1e-12, %v348_v37 }
 0x21f   :  { %v347_v39 = vpop.xlane.xlu1 %346 }
 0x220   :  { %5688 = vrsqrt.f32 %v350_v38  ;;  %v349_v40 = vmul.f32 0.0078125, %v347_v39 }
 0x222   :  { %v351_v41 = vadd.f32 1e-12, %v349_v40 }
 0x224   :  { %5690 = vrsqrt.f32 %v351_v41 }
 0x22d   :  { %v5689_v42 = vpop.eup %5688 }
 0x22e   :  { %v354_v43 = vmul.f32 %v5689_v42, %v6539_v8 }
 0x230   :  { %v362_v47 = vmul.f32 %v4562_v44, %v354_v43 }
 0x231   :  { %v5691_v45 = vpop.eup %5690 }
 0x232   :  { %v355_v46 = vmul.f32 %v5691_v45, %v6543_v12  ;;  %v6623_v50 = vadd.f32 %v4563_v48, %v362_v47 }
 0x234   :  { %v363_v49 = vmul.f32 %v4562_v44, %v355_v46 }
 0x236   :  { %v6625_v51 = vadd.f32 %v4563_v48, %v363_v49 }
 0x238   :  { %v406_v52 = vpack.c.bf16 %v6625_v51, %v6623_v50 }
 0x23a   :  { %585 = vmatmul.mubr.bf16.vlgmr.msra.gmra.mxu0 %v406_v52  ;;  %5095 = vmatmul.mubr.bf16.vlgmr.msra.gmra.mxu1 %v406_v52 }
 0x23b   :  { %5100 = vmatprep.mubr.msk.bf16.mxu0 %vm6286_vm0, %v6284_v4  ;;  %5106 = vmatprep.mubr.msk.bf16.mxu1 %vm6286_vm0, %v6284_v4 }
 0x2fa   :  { %v586_v59 = vpop.f32.mrf.mxu0  ;;  %v629_v60 = vpop.f32.mrf.mxu1 }
 0x2fb   :  { %v587_v5 = vadd.f32 %v586_v59, %v412_v61  ;;  %v630_v6 = vadd.f32 %v629_v60, %v420_v62 }
 0x2fc   :  { %v588_v63 = vpop.f32.mrf.mxu0  ;;  %v5096_v0 = vpop.f32.mrf.mxu1 }
 0x2fd   :  { %v589_v11 = vadd.f32 %v588_v63, %v416_v1 }
 0x2fe   :  { %v590_v2 = vpop.f32.mrf.mxu0  ;;  %v632_v3 = vpop.f32.mrf.mxu1 }
 0x2ff   :  { %v591_v7 = vadd.f32 %v590_v2, %v412_v61  ;;  %v633_v8 = vadd.f32 %v632_v3, %v420_v62 }
 0x300   :  { %v592_v9 = vpop.f32.mrf.mxu0  ;;  %v5097_v10 = vpop.f32.mrf.mxu1 }
 0x301   :  { %v636_v12 = vpack.c.bf16 %v591_v7, %v587_v5  ;;  %v6650_v13 = vpack.c.bf16 %v633_v8, %v630_v6  ;;  %v593_v14 = vadd.f32 %v592_v9, %v416_v1 }
 0x303   :  { %v637_v15 = vpack.c.bf16 %v593_v14, %v589_v11  ;;  %5105 = vmatpush3.bf16.msra.mxu1 %v6650_v13  ;;  %760 = vrot.lane.b32.xlu1 %v636_v12, %s6287_s1 }
 0x304   :  { %5116 = vmatprep.subr.bf16.mxu1 %v6284_v4 }
 0x305   :  { %763 = vrot.lane.b32.xlu0 %v637_v15, %s6287_s1  ;;  %v644_v16 = vsel %vm639_vm1, %v637_v15, 0 }
 0x306   :  { %5099 = vmatpush3.bf16.xpose.msra.mxu0 %v644_v16 }
 0x307   :  { %889 = vrot.lane.b32.xlu1 %v637_v15, %s6265_s30  ;;  %5110 = vmatprep.subr.bf16.mxu0 %v6284_v4 }
 0x309   :  { %1014 = vrot.lane.b32.xlu0 %v637_v15, %s6288_s15 }
 0x30b   :  { %887 = vrot.lane.b32.xlu1 %v636_v12, %s6265_s30 }
 0x30d   :  { %5101 = vmatmul.mubr.msk.bf16.vlgmr.msra.gmra.mxu0 %vm639_vm1, %v636_v12 }
 0x30e   :  { %5112 = vmatprep.mubr.msk.bf16.mxu0 %vm6286_vm0, %v6284_v4 }
 0x30f   :  { %1012 = vrot.lane.b32.xlu1 %v636_v12, %s6288_s15 }
 0x375   :  { %v761_v17 = vpop.permute.xlu1 %760 }
 0x377   :  { %v764_v18 = vpop.permute.xlu0 %763 }
 0x378   :  { %v769_v19 = vsel %vm639_vm1, %v764_v18, 0 }
 0x379   :  { %5111 = vmatpush3.bf16.xpose.msra.mxu0 %v769_v19  ;;  %v890_v20 = vpop.permute.xlu1 %889 }
 0x37a   :  { %5122 = vmatprep.subr.bf16.mxu0 %v6284_v4  ;;  %v895_v21 = vsel %vm639_vm1, %v890_v20, 0 }
 0x37b   :  { %v1015_v22 = vpop.permute.xlu0 %1014 }
 0x37c   :  { %v1020_v24 = vsel %vm639_vm1, %v1015_v22, 0 }
 0x37d   :  { %v888_v23 = vpop.permute.xlu1 %887 }
 0x380   :  { %5113 = vmatmul.mubr.msk.bf16.vlgmr.msra.gmra.mxu0 %vm639_vm1, %v761_v17 }
 0x381   :  { %5123 = vmatpush3.bf16.xpose.msra.mxu0 %v895_v21  ;;  %5124 = vmatprep.mubr.msk.bf16.mxu0 %vm6286_vm0, %v6284_v4  ;;  %v1013_v25 = vpop.permute.xlu1 %1012 }
 0x382   :  { %5134 = vmatprep.subr.bf16.mxu0 %v6284_v4 }
 0x388   :  { %5125 = vmatmul.mubr.msk.bf16.vlgmr.msra.gmra.mxu0 %vm639_vm1, %v888_v23 }
 0x389   :  { %5135 = vmatpush3.bf16.xpose.msra.mxu0 %v1020_v24  ;;  %5136 = vmatprep.mubr.msk.bf16.mxu0 %vm6286_vm0, %v6284_v4 }
 0x38a   :  { %5146 = vmatprep.subr.bf16.mxu0 %v6284_v4 }
 0x390   :  { %5137 = vmatmul.mubr.msk.bf16.vlgmr.msra.gmra.mxu0 %vm639_vm1, %v1013_v25 }
 0x391   :  { %5162 = vmatprep.mubr.msk.bf16.mxu0 %vm6286_vm0, %v6284_v4 }
 0x3cd   :  { %v680_v26 = vpop.f32.mrf.mxu0 }
 0x3ce   :  { %v687_v29 = vmul.f32 0.17677669, %v680_v26 }
 0x3cf   :  { %v5102_v30 = vpop.f32.mrf.mxu0 }
 0x3d0   :  { %v689_v31 = vadd.f32 %v687_v29, %v372_v28 }
 0x3d1   :  { %v683_v32 = vpop.f32.mrf.mxu0 }
 0x3d2   :  { %v688_v34 = vmul.f32 0.17677669, %v683_v32  ;;  %v692_v35 = vsel %vm691_vm2, %v689_v31, -inf }
 0x3d3   :  { %693 = vmax.xlane.f32.xlu0 %v692_v35  ;;  %v5103_v36 = vpop.f32.mrf.mxu0 }
 0x3d4   :  { %v690_v37 = vadd.f32 %v688_v34, %v373_v33 }
 0x3d6   :  { %v695_v38 = vsel %vm691_vm2, %v690_v37, -inf }
 0x3d7   :  { %696 = vmax.xlane.f32.xlu1 %v695_v38 }
 0x440   :  { %v805_v39 = vpop.f32.mrf.mxu0 }
 0x441   :  { %v812_v40 = vmul.f32 0.17677669, %v805_v39 }
 0x442   :  { %v5114_v41 = vpop.f32.mrf.mxu0 }
 0x443   :  { %v814_v42 = vadd.f32 %v812_v40, %v372_v28 }
 0x444   :  { %v808_v43 = vpop.f32.mrf.mxu0 }
 0x445   :  { %v813_v44 = vmul.f32 0.17677669, %v808_v43  ;;  %v816_v45 = vsel %vm691_vm2, %v814_v42, -inf }
 0x446   :  { %817 = vmax.xlane.f32.xlu0 %v816_v45  ;;  %v5115_v46 = vpop.f32.mrf.mxu0 }
 0x447   :  { %v815_v47 = vadd.f32 %v813_v44, %v373_v33 }
 0x448   :  { %v931_v48 = vpop.f32.mrf.mxu0 }
 0x449   :  { %v938_v49 = vmul.f32 0.17677669, %v931_v48  ;;  %v819_v52 = vsel %vm691_vm2, %v815_v47, -inf }
 0x44a   :  { %820 = vmax.xlane.f32.xlu0 %v819_v52  ;;  %v5126_v53 = vpop.f32.mrf.mxu0 }
 0x44b   :  { %v940_v57 = vadd.f32 %v938_v49, %v372_v28 }
 0x44c   :  { %v934_v59 = vpop.f32.mrf.mxu0 }
 0x44d   :  { %v939_v60 = vmul.f32 0.17677669, %v934_v59  ;;  %v942_v61 = vsel %vm691_vm2, %v940_v57, -inf }
 0x44e   :  { %943 = vmax.xlane.f32.xlu0 %v942_v61  ;;  %v5127_v62 = vpop.f32.mrf.mxu0 }
 0x44f   :  { %v941_v63 = vadd.f32 %v939_v60, %v373_v33 }
 0x450   :  { %v1056_v0 = vpop.f32.mrf.mxu0 }
 0x451   :  { %v1063_v1 = vmul.f32 0.17677669, %v1056_v0  ;;  %v945_v2 = vsel %vm691_vm2, %v941_v63, -inf }
 0x452   :  { %946 = vmax.xlane.f32.xlu1 %v945_v2  ;;  %v5138_v3 = vpop.f32.mrf.mxu0 }
 0x453   :  { %v1065_v5 = vadd.f32 %v1063_v1, %v372_v28 }
 0x454   :  { %v1059_v6 = vpop.f32.mrf.mxu0 }
 0x455   :  { %v1064_v7 = vmul.f32 0.17677669, %v1059_v6  ;;  %v1067_v8 = vsel %vm691_vm2, %v1065_v5, -inf }
 0x456   :  { %1068 = vmax.xlane.f32.xlu0 %v1067_v8  ;;  %v5139_v9 = vpop.f32.mrf.mxu0 }
 0x457   :  { %v6693_v10 = vadd.f32 %v1064_v7, %v373_v33 }
 0x459   :  { %v1070_v11 = vsel %vm691_vm2, %v6693_v10, -inf }
 0x45a   :  { %1071 = vmax.xlane.f32.xlu1 %v1070_v11 }
 0x45c   :  { %v694_v12 = vpop.xlane.xlu0 %693 }
 0x45d   :  { %v698_v14 = vsub.f32 %v689_v31, %v694_v12 }
 0x45f   :  { %v700_v15 = vmul.f32 1.442695, %v698_v14 }
 0x460   :  { %v697_v16 = vpop.xlane.xlu1 %696 }
 0x461   :  { %5692 = vpow2.f32 %v700_v15  ;;  %v699_v17 = vsub.f32 %v690_v37, %v697_v16 }
 0x463   :  { %v702_v18 = vmul.f32 1.442695, %v699_v17 }
 0x465   :  { %5694 = vpow2.f32 %v702_v18 }
 0x46e   :  { %v5693_v19 = vpop.eup %5692 }
 0x46f   :  { %v704_v20 = vsel %vm691_vm2, %v5693_v19, 0.0 }
 0x470   :  { %705 = vadd.xlane.f32.xlu0 %v704_v20 }
 0x472   :  { %v5695_v21 = vpop.eup %5694 }
 0x473   :  { %v707_v22 = vsel %vm691_vm2, %v5695_v21, 0.0 }
 0x474   :  { %708 = vadd.xlane.f32.xlu1 %v707_v22 }
 0x4cf   :  { %v818_v23 = vpop.xlane.xlu0 %817 }
 0x4d0   :  { %v822_v24 = vsub.f32 %v814_v42, %v818_v23 }
 0x4d2   :  { %v824_v25 = vmul.f32 1.442695, %v822_v24 }
 0x4d3   :  { %v821_v26 = vpop.xlane.xlu0 %820 }
 0x4d4   :  { %5696 = vpow2.f32 %v824_v25  ;;  %v823_v28 = vsub.f32 %v815_v47, %v821_v26 }
 0x4d6   :  { %v826_v29 = vmul.f32 1.442695, %v823_v28 }
 0x4d7   :  { %v944_v30 = vpop.xlane.xlu0 %943 }
 0x4d8   :  { %5698 = vpow2.f32 %v826_v29  ;;  %v948_v31 = vsub.f32 %v940_v57, %v944_v30 }
 0x4da   :  { %v950_v32 = vmul.f32 1.442695, %v948_v31 }
 0x4db   :  { %v947_v33 = vpop.xlane.xlu1 %946 }
 0x4dc   :  { %5700 = vpow2.f32 %v950_v32  ;;  %v949_v34 = vsub.f32 %v941_v63, %v947_v33 }
 0x4de   :  { %v952_v35 = vmul.f32 1.442695, %v949_v34 }
 0x4df   :  { %v1069_v36 = vpop.xlane.xlu0 %1068 }
 0x4e0   :  { %5702 = vpow2.f32 %v952_v35  ;;  %v1073_v37 = vsub.f32 %v1065_v5, %v1069_v36  ;;  %v5408_v36 = vld [vmem:[%s7257_s17 + $0x38] sm:$0xff]  }
 0x4e1   :  { %v5697_v38 = vpop.eup %5696  ;;  %5147 = vmatpush3.bf16.msra.mxu0 %v5408_v36  ;;  %v5427_v36 = vld [vmem:[#allocation10 + $0xcc] ss:$16 sps:$4 sm:$0xff]  }
 0x4e2   :  { %v1075_v39 = vmul.f32 1.442695, %v1073_v37  ;;  %v828_v40 = vsel %vm691_vm2, %v5697_v38, 0.0  ;;  %5148 = vmatprep.subr.bf16.mxu0 %v6284_v4 }
 0x4e3   :  { %829 = vadd.xlane.f32.xlu0 %v828_v40  ;;  %v1072_v49 = vpop.xlane.xlu1 %1071 }
 0x4e4   :  { %5704 = vpow2.f32 %v1075_v39  ;;  %v1074_v60 = vsub.f32 %v6693_v10, %v1072_v49  ;;  %v5409_v39 = vld [vmem:[%s7257_s17 + $0x30] sm:$0xff]   ;;  %v5414_v49 = vld [vmem:[%s7257_s17 + $0x8] sm:$0xff]  }
 0x4e5   :  { %v5699_v41 = vpop.eup %5698  ;;  %5149 = vmatpush3.bf16.msra.mxu0 %v5409_v39  ;;  %v5430_v39 = vld [vmem:[#allocation10 + $0xa4] ss:$16 sps:$4 sm:$0xff]  }
 0x4e6   :  { %v831_v42 = vsel %vm691_vm2, %v5699_v41, 0.0  ;;  %v1077_v0 = vmul.f32 1.442695, %v1074_v60  ;;  %5150 = vmatprep.subr.bf16.mxu0 %v6284_v4 }
 0x4e7   :  { %832 = vadd.xlane.f32.xlu1 %v831_v42  ;;  %v5410_v42 = vld [vmem:[%s7257_s17 + $0x28] sm:$0xff]  }
 0x4e9   :  { %v5701_v43 = vpop.eup %5700  ;;  %5151 = vmatpush3.bf16.msra.mxu0 %v5410_v42  ;;  %v5431_v42 = vld [vmem:[#allocation10 + $0xa8] ss:$16 sps:$4 sm:$0xff]  }
 0x4ea   :  { %v954_v44 = vsel %vm691_vm2, %v5701_v43, 0.0  ;;  %5152 = vmatprep.subr.bf16.mxu0 %v6284_v4 }
 0x4eb   :  { %955 = vadd.xlane.f32.xlu0 %v954_v44 }
 0x4ed   :  { %v5703_v45 = vpop.eup %5702 }
 0x4ee   :  { %v957_v46 = vsel %vm691_vm2, %v5703_v45, 0.0 }
 0x4ef   :  { %958 = vadd.xlane.f32.xlu1 %v957_v46  ;;  %v5411_v46 = vld [vmem:[%s7257_s17 + $0x20] sm:$0xff]  }
 0x4f0   :  { %5153 = vmatpush3.bf16.msra.mxu0 %v5411_v46  ;;  %v5439_v46 = vld [vmem:[#allocation10 + $0x8c] ss:$16 sps:$4 sm:$0xff]  }
 0x4f1   :  { %v5705_v47 = vpop.eup %5704  ;;  %5154 = vmatprep.subr.bf16.mxu0 %v6284_v4 }
 0x4f2   :  { %v1079_v48 = vsel %vm691_vm2, %v5705_v47, 0.0 }
 0x4f3   :  { %1080 = vadd.xlane.f32.xlu0 %v1079_v48  ;;  %v5413_v48 = vld [vmem:[%s7257_s17 + $0x10] sm:$0xff]  }
 0x4f9   :  { %v706_v52 = vpop.xlane.xlu0 %705 }
 0x4fa   :  { %5706 = vrcp.f32 %v706_v52  ;;  %v5415_v52 = vld [vmem:[%s7257_s17] sm:$0xff]  }
 0x4fd   :  { %v709_v53 = vpop.xlane.xlu1 %708 }
 0x4fe   :  { %5708 = vrcp.f32 %v709_v53 }
 0x4ff   :  { %5710 = vpow2.f32 %v1077_v0 }
 0x500   :  { %965 = vrot.lane.b32.xlu1 %v6650_v13, %s6265_s30 }
 0x507   :  { %v5707_v57 = vpop.eup %5706 }
 0x508   :  { %v712_v61 = vmul.f32 %v5707_v57, %v5693_v19 }
 0x509   :  { %840 = vrot.lane.b32.xlu0 %v6650_v13, %s6287_s1 }
 0x50b   :  { %v5709_v59 = vpop.eup %5708 }
 0x50c   :  { %v713_v62 = vmul.f32 %v5709_v59, %v5695_v21  ;;  %v5711_v1 = vpop.eup %5710 }
 0x50d   :  { %v1082_v2 = vsel %vm691_vm2, %v5711_v1, 0.0 }
 0x50e   :  { %v714_v63 = vpack.c.bf16 %v713_v62, %v712_v61 }
 0x510   :  { %5107 = vmatmul.mubr.msk.bf16.vlgmr.msra.gmra.mxu1 %vm691_vm2, %v714_v63 }
 0x511   :  { %5118 = vmatprep.mubr.msk.bf16.mxu1 %vm6286_vm0, %v6284_v4 }
 0x524   :  { %1083 = vadd.xlane.f32.xlu1 %v1082_v2 }
 0x535   :  { %1090 = vrot.lane.b32.xlu1 %v6650_v13, %s6288_s15 }
 0x56c   :  { %v830_v3 = vpop.xlane.xlu0 %829 }
 0x56d   :  { %5712 = vrcp.f32 %v830_v3 }
 0x570   :  { %v833_v5 = vpop.xlane.xlu1 %832 }
 0x571   :  { %5714 = vrcp.f32 %v833_v5 }
 0x574   :  { %v956_v6 = vpop.xlane.xlu0 %955 }
 0x575   :  { %5716 = vrcp.f32 %v956_v6 }
 0x578   :  { %v959_v7 = vpop.xlane.xlu1 %958 }
 0x579   :  { %5718 = vrcp.f32 %v959_v7 }
 0x57a   :  { %v5713_v8 = vpop.eup %5712 }
 0x57b   :  { %v836_v11 = vmul.f32 %v5713_v8, %v5697_v38 }
 0x57c   :  { %v1081_v9 = vpop.xlane.xlu0 %1080  ;;  %v966_v13 = vpop.permute.xlu1 %965 }
 0x57d   :  { %5720 = vrcp.f32 %v1081_v9 }
 0x57e   :  { %v5715_v10 = vpop.eup %5714 }
 0x57f   :  { %v837_v12 = vmul.f32 %v5715_v10, %v5699_v41 }
 0x580   :  { %v841_v14 = vpop.permute.xlu0 %840 }
 0x581   :  { %5117 = vmatpush3.bf16.msra.mxu1 %v841_v14  ;;  %v838_v15 = vpack.c.bf16 %v837_v12, %v836_v11 }
 0x582   :  { %5128 = vmatprep.subr.bf16.mxu1 %v6284_v4  ;;  %v5717_v16 = vpop.eup %5716 }
 0x583   :  { %v962_v18 = vmul.f32 %v5717_v16, %v5701_v43  ;;  %v4596_v16 = vld [vmem:[%s7258_s2] ss:$0 sm:$0xff] }
 0x584   :  { %5119 = vmatmul.mubr.msk.bf16.vlgmr.msra.gmra.mxu1 %vm691_vm2, %v838_v15 }
 0x585   :  { %5129 = vmatpush3.bf16.msra.mxu1 %v966_v13  ;;  %5130 = vmatprep.mubr.msk.bf16.mxu1 %vm6286_vm0, %v6284_v4 }
 0x586   :  { %v5719_v17 = vpop.eup %5718  ;;  %5140 = vmatprep.subr.bf16.mxu1 %v6284_v4 }
 0x587   :  { %v963_v19 = vmul.f32 %v5719_v17, %v5703_v45 }
 0x589   :  { %v964_v20 = vpack.c.bf16 %v963_v19, %v962_v18 }
 0x58a   :  { %v5721_v23 = vpop.eup %5720 }
 0x58b   :  { %v1087_v25 = vmul.f32 %v5721_v23, %v5705_v47  ;;  %v5412_v47 = vld [vmem:[%s7257_s17 + $0x18] sm:$0xff]  }
 0x58c   :  { %5131 = vmatmul.mubr.msk.bf16.vlgmr.msra.gmra.mxu1 %vm691_vm2, %v964_v20  ;;  %5155 = vmatpush3.bf16.msra.mxu0 %v5412_v47  ;;  %v5442_v47 = vld [vmem:[#allocation10 + $0x64] ss:$16 sps:$4 sm:$0xff]  }
 0x58d   :  { %5142 = vmatprep.mubr.msk.bf16.mxu1 %vm6286_vm0, %v6284_v4  ;;  %5156 = vmatprep.subr.bf16.mxu0 %v6284_v4 }
 0x590   :  { %5157 = vmatpush3.bf16.msra.mxu0 %v5413_v48  ;;  %v5445_v48 = vld [vmem:[#allocation10 + $0x6c] ss:$16 sps:$4 sm:$0xff]  }
 0x591   :  { %5158 = vmatprep.subr.bf16.mxu0 %v6284_v4 }
 0x594   :  { %5159 = vmatpush3.bf16.msra.mxu0 %v5414_v49  ;;  %v5440_v49 = vld [vmem:[#allocation10 + $0x60] ss:$16 sps:$4 sm:$0xff]  }
 0x595   :  { %5160 = vmatprep.subr.bf16.mxu0 %v6284_v4 }
 0x598   :  { %5161 = vmatpush3.bf16.msra.mxu0 %v5415_v52  ;;  %v5443_v52 = vld [vmem:[#allocation10 + $0x68] ss:$16 sps:$4 sm:$0xff]  }
 0x5ad   :  { %v1084_v21 = vpop.xlane.xlu1 %1083 }
 0x5ae   :  { %5722 = vrcp.f32 %v1084_v21 }
 0x5b1   :  { %v1091_v22 = vpop.permute.xlu1 %1090 }
 0x5b2   :  { %5141 = vmatpush3.bf16.msra.mxu1 %v1091_v22 }
 0x5bb   :  { %v5723_v24 = vpop.eup %5722 }
 0x5bc   :  { %v1088_v26 = vmul.f32 %v5723_v24, %v5711_v1  ;;  %v5416_v24 = vld [vmem:[#allocation10 + $0xe0] ss:$16 sps:$4 sm:$0xff]  }
 0x5be   :  { %v1089_v28 = vpack.c.bf16 %v1088_v26, %v1087_v25  ;;  %v5418_v25 = vld [vmem:[#allocation10 + $0xe4] ss:$16 sps:$4 sm:$0xff]   ;;  %v5419_v26 = vld [vmem:[#allocation10 + $0xe8] ss:$16 sps:$4 sm:$0xff]  }
 0x5bf   :  { %1539 = vmatprep.subr.bf16.mxu1 %v5418_v25  ;;  %v5466_v25 = vld [vmem:[#allocation13 + $0x38] sm:$0xff]  }
 0x5c0   :  { %5143 = vmatmul.mubr.msk.bf16.vlgmr.msra.gmra.mxu1 %vm691_vm2, %v1089_v28  ;;  %v5421_v28 = vld [vmem:[#allocation10 + $0xec] ss:$16 sps:$4 sm:$0xff]  }
 0x5c1   :  { %1571 = vmatprep.mubr.bf16.mxu1 %v6285_v27  ;;  %1582 = vmatprep.subr.bf16.mxu0 %v5421_v28  ;;  %v5468_v28 = vld [vmem:[#allocation13 + $0x70] sm:$0xff]  }
 0x5c2   :  { %1540 = vmatpush1.bf16.msra.mxu1 %v5416_v24  ;;  %v5465_v24 = vld [vmem:[#allocation13 + $0xf8] sm:$0xff]  }
 0x5d0   :  { %v752_v29 = vpop.f32.mrf.mxu1 }
 0x5d2   :  { %v5108_v30 = vpop.f32.mrf.mxu1 }
 0x5d4   :  { %v755_v31 = vpop.f32.mrf.mxu1 }
 0x5d6   :  { %v5109_v32 = vpop.f32.mrf.mxu1 }
 0x644   :  { %v880_v33 = vpop.f32.mrf.mxu1 }
 0x646   :  { %v5120_v34 = vpop.f32.mrf.mxu1 }
 0x648   :  { %v883_v35 = vpop.f32.mrf.mxu1 }
 0x649   :  { %v5346_v37 = vpack.i.bf16 %v883_v35, %v880_v33  ;;  %v5424_v35 = vld [vmem:[#allocation10 + $0xc4] ss:$16 sps:$4 sm:$0xff]  }
 0x64a   :  { %v5121_v38 = vpop.f32.mrf.mxu1  ;;  %1541 = vmatprep.subr.bf16.mxu1 %v5424_v35  ;;  %v5477_v35 = vld [vmem:[#allocation13 + $0xe0] sm:$0xff]  }
 0x64b   :  { %5347 = vrot.lane.b32.xlu1 %v5346_v37, %s6288_s15  ;;  %v5422_v37 = vld [vmem:[#allocation10 + $0xc0] ss:$16 sps:$4 sm:$0xff]   ;;  %v5425_v38 = vld [vmem:[#allocation10 + $0xc8] ss:$16 sps:$4 sm:$0xff]  }
 0x64c   :  { %v1005_v40 = vpop.f32.mrf.mxu1  ;;  %1542 = vmatpush1.bf16.msra.mxu1 %v5422_v37  ;;  %v5479_v37 = vld [vmem:[#allocation13 + $0xa0] sm:$0xff]  }
 0x64d   :  { %1543 = vmatprep.subr.bf16.mxu1 %v5430_v39  ;;  %v5481_v39 = vld [vmem:[#allocation13 + $0xd8] sm:$0xff]  }
 0x64e   :  { %v5132_v41 = vpop.f32.mrf.mxu1 }
 0x64f   :  { %v5428_v41 = vld [vmem:[#allocation10 + $0xa0] ss:$16 sps:$4 sm:$0xff]  }
 0x650   :  { %v1008_v43 = vpop.f32.mrf.mxu1  ;;  %1544 = vmatpush1.bf16.msra.mxu1 %v5428_v41  ;;  %v5483_v41 = vld [vmem:[#allocation13 + $0x98] sm:$0xff]  }
 0x651   :  { %v5351_v44 = vpack.i.bf16 %v1008_v43, %v1005_v40  ;;  %v5433_v40 = vld [vmem:[#allocation10 + $0xac] ss:$16 sps:$4 sm:$0xff]   ;;  %v5434_v43 = vld [vmem:[#allocation10 + $0x80] ss:$16 sps:$4 sm:$0xff]  }
 0x652   :  { %v5133_v45 = vpop.f32.mrf.mxu1 }
 0x653   :  { %5352 = vrot.lane.b32.xlu0 %v5351_v44, %s6265_s30  ;;  %v5436_v44 = vld [vmem:[#allocation10 + $0x84] ss:$16 sps:$4 sm:$0xff]   ;;  %v5437_v45 = vld [vmem:[#allocation10 + $0x88] ss:$16 sps:$4 sm:$0xff]  }
 0x654   :  { %1545 = vmatprep.subr.bf16.mxu1 %v5436_v44  ;;  %v5486_v44 = vld [vmem:[#allocation13 + $0x10] sm:$0xff]  }
 0x655   :  { %1546 = vmatpush1.bf16.msra.mxu1 %v5434_v43  ;;  %v5485_v43 = vld [vmem:[#allocation13 + $0xd0] sm:$0xff]  }
 0x656   :  { %1547 = vmatprep.subr.bf16.mxu1 %v5442_v47  ;;  %v5489_v47 = vld [vmem:[#allocation13 + $0xc8] sm:$0xff]  }
 0x659   :  { %1548 = vmatpush1.bf16.msra.mxu1 %v5440_v49  ;;  %v5491_v49 = vld [vmem:[#allocation13 + $0x88] sm:$0xff]  }
 0x680   :  { %v1130_v53 = vpop.f32.mrf.mxu1 }
 0x682   :  { %v5144_v57 = vpop.f32.mrf.mxu1 }
 0x683   :  { %v5451_v57 = vld [vmem:[#allocation10 + $0x4c] ss:$16 sps:$4 sm:$0xff]  }
 0x684   :  { %v1133_v59 = vpop.f32.mrf.mxu1 }
 0x685   :  { %v5356_v60 = vpack.i.bf16 %v1133_v59, %v1130_v53  ;;  %v5448_v53 = vld [vmem:[#allocation10 + $0x44] ss:$16 sps:$4 sm:$0xff]   ;;  %v5446_v59 = vld [vmem:[#allocation10 + $0x40] ss:$16 sps:$4 sm:$0xff]  }
 0x686   :  { %v5145_v61 = vpop.f32.mrf.mxu1  ;;  %1549 = vmatprep.subr.bf16.mxu1 %v5448_v53  ;;  %v5493_v53 = vld [vmem:[#allocation13 + $0xc0] sm:$0xff]  }
 0x687   :  { %5357 = vrot.lane.b32.xlu1 %v5356_v60, %s6287_s1  ;;  %v5449_v60 = vld [vmem:[#allocation10 + $0x48] ss:$16 sps:$4 sm:$0xff]   ;;  %v5454_v61 = vld [vmem:[#allocation10 + $0x24] ss:$16 sps:$4 sm:$0xff]   ;;  %1550 = vmatpush1.bf16.msra.mxu1 %v5446_v59 }
 0x688   :  { %1551 = vmatprep.subr.bf16.mxu1 %v5454_v61  ;;  %v5495_v59 = vld [vmem:[#allocation13 + $0x80] sm:$0xff]   ;;  %v6789_v61 = vsub.s32 3, %v6633_v54 }
 0x6bd   :  { %v5348_v62 = vpop.permute.xlu1 %5347 }
 0x6be   :  { %v5350_v0 = vunpack.i.h.bf16 %v5348_v62  ;;  %v5349_v1 = vunpack.i.l.bf16 %v5348_v62  ;;  %v5457_v62 = vld [vmem:[#allocation10 + $0x2c] ss:$16 sps:$4 sm:$0xff]  }
 0x6c0   :  { %v1162_v6 = vsel %vm639_vm1, %v755_v31, %v5350_v0  ;;  %v1161_v7 = vsel %vm639_vm1, %v752_v29, %v5349_v1  ;;  %v5455_v0 = vld [vmem:[#allocation10 + $0x28] ss:$16 sps:$4 sm:$0xff]   ;;  %v5460_v1 = vld [vmem:[#allocation10 + $0x4] ss:$16 sps:$4 sm:$0xff]  }
 0x6c5   :  { %v5353_v63 = vpop.permute.xlu0 %5352 }
 0x6c6   :  { %v5355_v2 = vunpack.i.h.bf16 %v5353_v63  ;;  %v5354_v3 = vunpack.i.l.bf16 %v5353_v63  ;;  %v5452_v63 = vld [vmem:[#allocation10 + $0x20] ss:$16 sps:$4 sm:$0xff]  }
 0x6c7   :  { %1552 = vmatpush1.bf16.msra.mxu1 %v5452_v63 }
 0x6c8   :  { %v1164_v10 = vsel %vm1163_vm3, %v1161_v7, %v5354_v3  ;;  %v1165_v11 = vsel %vm1163_vm3, %v1162_v6, %v5355_v2  ;;  %v5463_v2 = vld [vmem:[#allocation10 + $0xc] ss:$16 sps:$4 sm:$0xff]   ;;  %v5458_v3 = vld [vmem:[#allocation10] ss:$16 sps:$4 sm:$0xff]   ;;  %1553 = vmatprep.subr.bf16.mxu1 %v5460_v1 }
 0x6cb   :  { %1554 = vmatpush1.bf16.msra.mxu1 %v5458_v3 }
 0x6f9   :  { %v5358_v5 = vpop.permute.xlu1 %5357 }
 0x6fa   :  { %v5360_v8 = vunpack.i.h.bf16 %v5358_v5  ;;  %v5359_v9 = vunpack.i.l.bf16 %v5358_v5  ;;  %v5461_v5 = vld [vmem:[#allocation10 + $0x8] ss:$16 sps:$4 sm:$0xff]  }
 0x6fc   :  { %v1167_v12 = vsel %vm1166_vm4, %v1164_v10, %v5359_v9  ;;  %v1168_v14 = vsel %vm1166_vm4, %v1165_v11, %v5360_v8 }
 0x6fd   :  { %v1185_v15 = vpack.c.bf16 %v1168_v14, %v1167_v12 }
 0x6ff   :  { %5163 = vmatmul.mubr.bf16.vlgmr.msra.gmra.mxu0 %v1185_v15  ;;  %v4605_v15 = vld [vmem:[#allocation7] ss:$0 sm:$0xff] }
 0x700   :  { %1614 = vmatprep.mubr.bf16.mxu0 %v6285_v27  ;;  %1583 = vmatpush1.bf16.msra.mxu0 %v5419_v26  ;;  %v5467_v26 = vld [vmem:[#allocation13 + $0xb8] sm:$0xff]  }
 0x701   :  { %1584 = vmatprep.subr.bf16.mxu0 %v5427_v36  ;;  %v5478_v36 = vld [vmem:[#allocation13 + $0x20] sm:$0xff]  }
 0x704   :  { %1585 = vmatpush1.bf16.msra.mxu0 %v5425_v38  ;;  %v5480_v38 = vld [vmem:[#allocation13 + $0x58] sm:$0xff]  }
 0x705   :  { %1586 = vmatprep.subr.bf16.mxu0 %v5433_v40  ;;  %v5482_v40 = vld [vmem:[#allocation13 + $0x18] sm:$0xff]  }
 0x708   :  { %1587 = vmatpush1.bf16.msra.mxu0 %v5431_v42  ;;  %v5484_v42 = vld [vmem:[#allocation13 + $0x50] sm:$0xff]  }
 0x709   :  { %1588 = vmatprep.subr.bf16.mxu0 %v5439_v46  ;;  %v5488_v46 = vld [vmem:[#allocation13 + $0x48] sm:$0xff]  }
 0x70c   :  { %1589 = vmatpush1.bf16.msra.mxu0 %v5437_v45  ;;  %v5487_v45 = vld [vmem:[#allocation13 + $0x90] sm:$0xff]  }
 0x70d   :  { %1590 = vmatprep.subr.bf16.mxu0 %v5445_v48  ;;  %v5490_v48 = vld [vmem:[#allocation13 + $0x8] sm:$0xff]  }
 0x710   :  { %1591 = vmatpush1.bf16.msra.mxu0 %v5443_v52  ;;  %v5492_v52 = vld [vmem:[#allocation13 + $0x40] sm:$0xff]  }
 0x711   :  { %1592 = vmatprep.subr.bf16.mxu0 %v5451_v57  ;;  %v5494_v57 = vld [vmem:[#allocation13] sm:$0xff]  }
 0x714   :  { %1593 = vmatpush1.bf16.msra.mxu0 %v5449_v60  ;;  %v1357_v60 = vld [vmem:[#allocation11] sm:$0xf] }
 0x715   :  { %1594 = vmatprep.subr.bf16.mxu0 %v5457_v62  ;;  %v1362_v62 = vrot.slane %v1357_v60, %v6636_v55  ;;  %v1370_v63 = vrot.slane %v1357_v60, %v6639_v56  ;;  %v1374_v1 = vrot.slane %v1357_v60, %v6789_v61 }
 0x718   :  { %1595 = vmatpush1.bf16.msra.mxu0 %v5455_v0  ;;  %v1366_v0 = vrot.slane %v1357_v60, %v6645_v58 }
 0x719   :  { %1596 = vmatprep.subr.bf16.mxu0 %v5463_v2 }
 0x71c   :  { %1597 = vmatpush1.bf16.msra.mxu0 %v5461_v5 }
 0x71d   :  { %4951 = vmatprep.subr.bf16.mxu0 %v5465_v24 }
 0x7bf   :  { %v1275_v13 = vpop.f32.mrf.mxu0 }
 0x7c0   :  { %v1276_v17 = vadd.f32 %v4596_v16, %v1275_v13 }
 0x7c1   :  { %v5164_v18 = vpop.f32.mrf.mxu0 }
 0x7c2   :  { %v1282_v19 = vadd.f32 %v1276_v17, %v6623_v50  ;;  %v4606_v18 = vld [vmem:[#allocation8] ss:$0 sm:$0xff] }
 0x7c3   :  { %v1278_v20 = vpop.f32.mrf.mxu0 }
 0x7c4   :  { %v1279_v21 = vadd.f32 %v4596_v16, %v1278_v20  ;;  %1286 = vadd.xlane.f32.xlu0 %v1282_v19 }
 0x7c5   :  { %v5165_v22 = vpop.f32.mrf.mxu0 }
 0x7c6   :  { %v1283_v23 = vadd.f32 %v1279_v21, %v6625_v51 }
 0x7c8   :  { %1288 = vadd.xlane.f32.xlu1 %v1283_v23 }
 0x84d   :  { %v1287_v29 = vpop.xlane.xlu0 %1286 }
 0x84e   :  { %v1290_v30 = vmul.f32 0.0078125, %v1287_v29  ;;  %v5469_v29 = vld [vmem:[#allocation13 + $0xf0] sm:$0xff]  }
 0x850   :  { %v6771_v31 = vsub.f32 %v1282_v19, %v1290_v30  ;;  %v5470_v30 = vld [vmem:[#allocation13 + $0x30] sm:$0xff]  }
 0x851   :  { %v1289_v50 = vpop.xlane.xlu1 %1288 }
 0x852   :  { %v1291_v32 = vmul.f32 0.0078125, %v1289_v50  ;;  %v1294_v33 = vmul.f32 %v6771_v31, %v6771_v31  ;;  %v5472_v50 = vld [vmem:[#allocation13 + $0x68] sm:$0xff]  }
 0x854   :  { %v6775_v34 = vsub.f32 %v1283_v23, %v1291_v32  ;;  %1296 = vadd.xlane.f32.xlu0 %v1294_v33  ;;  %v5464_v23 = vld [vmem:[#allocation13 + $0x78] sm:$0xff]   ;;  %v5473_v32 = vld [vmem:[#allocation13 + $0xe8] sm:$0xff]  }
 0x855   :  { %4929 = vmatprep.subr.bf16.mxu1 %v5464_v23  ;;  %v5474_v33 = vld [vmem:[#allocation13 + $0x28] sm:$0xff]  }
 0x856   :  { %v1295_v51 = vmul.f32 %v6775_v34, %v6775_v34 }
 0x858   :  { %1298 = vadd.xlane.f32.xlu0 %v1295_v51  ;;  %v5476_v51 = vld [vmem:[#allocation13 + $0x60] sm:$0xff]  }
 0x8dd   :  { %v1297_v6 = vpop.xlane.xlu0 %1296 }
 0x8de   :  { %v1300_v7 = vmul.f32 0.0078125, %v1297_v6 }
 0x8e0   :  { %v1302_v8 = vadd.f32 1e-12, %v1300_v7 }
 0x8e1   :  { %v1299_v9 = vpop.xlane.xlu0 %1298 }
 0x8e2   :  { %5724 = vrsqrt.f32 %v1302_v8  ;;  %v1301_v10 = vmul.f32 0.0078125, %v1299_v9 }
 0x8e4   :  { %v1303_v11 = vadd.f32 1e-12, %v1301_v10 }
 0x8e6   :  { %5726 = vrsqrt.f32 %v1303_v11 }
 0x8ef   :  { %v5725_v12 = vpop.eup %5724 }
 0x8f0   :  { %v1306_v14 = vmul.f32 %v5725_v12, %v6771_v31  ;;  %v5471_v31 = vld [vmem:[#allocation13 + $0xb0] sm:$0xff]  }
 0x8f2   :  { %v1314_v17 = vmul.f32 %v4605_v15, %v1306_v14 }
 0x8f3   :  { %v5727_v16 = vpop.eup %5726 }
 0x8f4   :  { %v1307_v13 = vmul.f32 %v5727_v16, %v6775_v34  ;;  %v6781_v20 = vadd.f32 %v4606_v18, %v1314_v17  ;;  %v5475_v34 = vld [vmem:[#allocation13 + $0xa8] sm:$0xff]  }
 0x8f6   :  { %v1315_v19 = vmul.f32 %v4605_v15, %v1307_v13 }
 0x8f8   :  { %v6783_v21 = vadd.f32 %v4606_v18, %v1315_v19 }
 0x8fa   :  { %v1356_v22 = vpack.c.bf16 %v6783_v21, %v6781_v20 }
 0x8fc   :  { %1572 = vmatmul.mubr.bf16.vlgmr.msra.gmra.mxu1 %v1356_v22  ;;  %1615 = vmatmul.mubr.bf16.vlgmr.msra.gmra.mxu0 %v1356_v22 }
 0x8fd   :  { %4930 = vmatpush3.bf16.msra.mxu1 %v5466_v25  ;;  %4952 = vmatpush3.bf16.msra.mxu0 %v5467_v26 }
 0x8fe   :  { %4931 = vmatprep.subr.bf16.mxu1 %v5468_v28  ;;  %4953 = vmatprep.subr.bf16.mxu0 %v5469_v29 }
 0x901   :  { %4932 = vmatpush3.bf16.msra.mxu1 %v5470_v30  ;;  %4954 = vmatpush3.bf16.msra.mxu0 %v5471_v31 }
 0x902   :  { %4933 = vmatprep.subr.bf16.mxu1 %v5472_v50  ;;  %4955 = vmatprep.subr.bf16.mxu0 %v5473_v32 }
 0x905   :  { %4934 = vmatpush3.bf16.msra.mxu1 %v5474_v33  ;;  %4956 = vmatpush3.bf16.msra.mxu0 %v5475_v34 }
 0x906   :  { %4935 = vmatprep.subr.bf16.mxu1 %v5476_v51  ;;  %4957 = vmatprep.subr.bf16.mxu0 %v5477_v35 }
 0x909   :  { %4936 = vmatpush3.bf16.msra.mxu1 %v5478_v36  ;;  %4958 = vmatpush3.bf16.msra.mxu0 %v5479_v37 }
 0x90a   :  { %4937 = vmatprep.subr.bf16.mxu1 %v5480_v38  ;;  %4959 = vmatprep.subr.bf16.mxu0 %v5481_v39 }
 0x90d   :  { %4938 = vmatpush3.bf16.msra.mxu1 %v5482_v40  ;;  %4960 = vmatpush3.bf16.msra.mxu0 %v5483_v41 }
 0x90e   :  { %4939 = vmatprep.subr.bf16.mxu1 %v5484_v42  ;;  %4961 = vmatprep.subr.bf16.mxu0 %v5485_v43 }
 0x911   :  { %4940 = vmatpush3.bf16.msra.mxu1 %v5486_v44  ;;  %4962 = vmatpush3.bf16.msra.mxu0 %v5487_v45 }
 0x912   :  { %4941 = vmatprep.subr.bf16.mxu1 %v5488_v46  ;;  %4963 = vmatprep.subr.bf16.mxu0 %v5489_v47 }
 0x915   :  { %4942 = vmatpush3.bf16.msra.mxu1 %v5490_v48  ;;  %4964 = vmatpush3.bf16.msra.mxu0 %v5491_v49 }
 0x916   :  { %4943 = vmatprep.subr.bf16.mxu1 %v5492_v52  ;;  %4965 = vmatprep.subr.bf16.mxu0 %v5493_v53 }
 0x919   :  { %4944 = vmatpush3.bf16.msra.mxu1 %v5494_v57  ;;  %4966 = vmatpush3.bf16.msra.mxu0 %v5495_v59 }
 0x91a   :  { %5166 = vmatprep.subr.bf16.mxu0 %v6284_v4 }
 0x9bc   :  { %v1573_v2 = vpop.f32.mrf.mxu1  ;;  %v1616_v3 = vpop.f32.mrf.mxu0 }
 0x9bd   :  { %v6795_v5 = vadd.f32 %v1573_v2, %v1362_v62  ;;  %v6797_v6 = vadd.f32 %v1616_v3, %v1370_v63 }
 0x9be   :  { %v1575_v7 = vpop.f32.mrf.mxu1  ;;  %v1618_v8 = vpop.f32.mrf.mxu0 }
 0x9bf   :  { %v1633_v9 = vmul.f32 0.044715, %v6795_v5  ;;  %v1635_v54 = vmul.f32 0.044715, %v6797_v6  ;;  %v1576_v10 = vadd.f32 %v1575_v7, %v1366_v0  ;;  %v6801_v11 = vadd.f32 %v1618_v8, %v1374_v1 }
 0x9c0   :  { %v1577_v12 = vpop.f32.mrf.mxu1  ;;  %v1620_v14 = vpop.f32.mrf.mxu0 }
 0x9c1   :  { %v1641_v15 = vmul.f32 %v1633_v9, %v6795_v5  ;;  %v1643_v16 = vmul.f32 %v1635_v54, %v6797_v6  ;;  %v1634_v13 = vmul.f32 0.044715, %v1576_v10  ;;  %v1636_v17 = vmul.f32 0.044715, %v6801_v11 }
 0x9c2   :  { %v1578_v18 = vadd.f32 %v1577_v12, %v1362_v62  ;;  %v6806_v19 = vadd.f32 %v1620_v14, %v1370_v63  ;;  %v1579_v22 = vpop.f32.mrf.mxu1  ;;  %v1622_v23 = vpop.f32.mrf.mxu0  ;;  %v1626_v12 = vmul.f32 0.5, %v1576_v10 }
 0x9c3   :  { %v1649_v24 = vmul.f32 %v1641_v15, %v6795_v5  ;;  %v1651_v25 = vmul.f32 %v1643_v16, %v6797_v6  ;;  %v1642_v26 = vmul.f32 %v1634_v13, %v1576_v10  ;;  %v1644_v28 = vmul.f32 %v1636_v17, %v6801_v11 }
 0x9c4   :  { %v1637_v29 = vmul.f32 0.044715, %v1578_v18  ;;  %v1639_v30 = vmul.f32 0.044715, %v6806_v19  ;;  %v1580_v31 = vadd.f32 %v1579_v22, %v1366_v0  ;;  %v1623_v50 = vadd.f32 %v1622_v23, %v1374_v1 }
 0x9c5   :  { %v1657_v32 = vadd.f32 %v1649_v24, %v6795_v5  ;;  %v1659_v33 = vadd.f32 %v1651_v25, %v6797_v6  ;;  %v1650_v34 = vmul.f32 %v1642_v26, %v1576_v10  ;;  %v1652_v51 = vmul.f32 %v1644_v28, %v6801_v11 }
 0x9c6   :  { %v1645_v35 = vmul.f32 %v1637_v29, %v1578_v18  ;;  %v1647_v36 = vmul.f32 %v1639_v30, %v6806_v19  ;;  %v1638_v37 = vmul.f32 0.044715, %v1580_v31  ;;  %v1640_v38 = vmul.f32 0.044715, %v1623_v50 }
 0x9c7   :  { %v1665_v39 = vmul.f32 0.7978846, %v1657_v32  ;;  %v1667_v40 = vmul.f32 0.7978846, %v1659_v33  ;;  %v1658_v41 = vadd.f32 %v1650_v34, %v1576_v10  ;;  %v1660_v47 = vadd.f32 %v1652_v51, %v6801_v11 }
 0x9c8   :  { %v1653_v42 = vmul.f32 %v1645_v35, %v1578_v18  ;;  %v1655_v43 = vmul.f32 %v1647_v36, %v6806_v19  ;;  %v1646_v44 = vmul.f32 %v1638_v37, %v1580_v31  ;;  %v1648_v45 = vmul.f32 %v1640_v38, %v1623_v50 }
 0x9c9   :  { %v1666_v46 = vmul.f32 0.7978846, %v1658_v41  ;;  %5728 = vtanh.f32 %v1665_v39  ;;  %v1668_v57 = vmul.f32 0.7978846, %v1660_v47  ;;  %v1625_v15 = vmul.f32 0.5, %v6795_v5 }
 0x9ca   :  { %v1661_v48 = vadd.f32 %v1653_v42, %v1578_v18  ;;  %v1663_v49 = vadd.f32 %v1655_v43, %v6806_v19  ;;  %v1654_v52 = vmul.f32 %v1646_v44, %v1580_v31  ;;  %5730 = vtanh.f32 %v1667_v40 }
 0x9cb   :  { %v1656_v53 = vmul.f32 %v1648_v45, %v1623_v50  ;;  %5732 = vtanh.f32 %v1666_v46  ;;  %v1629_v22 = vmul.f32 0.5, %v1578_v18  ;;  %v1630_v26 = vmul.f32 0.5, %v1580_v31 }
 0x9cc   :  { %v1669_v59 = vmul.f32 0.7978846, %v1661_v48  ;;  %v1671_v60 = vmul.f32 0.7978846, %v1663_v49  ;;  %v1662_v62 = vadd.f32 %v1654_v52, %v1580_v31  ;;  %5734 = vtanh.f32 %v1668_v57 }
 0x9cd   :  { %v1664_v63 = vadd.f32 %v1656_v53, %v1623_v50  ;;  %v1631_v29 = vmul.f32 0.5, %v6806_v19  ;;  %v1628_v32 = vmul.f32 0.5, %v6801_v11  ;;  %v1632_v33 = vmul.f32 0.5, %v1623_v50  ;;  %v4639_v50 = vld [vmem:[#allocation14] ss:$0 sm:$0xff] }
 0x9ce   :  { %5736 = vtanh.f32 %v1669_v59  ;;  %v1670_v0 = vmul.f32 0.7978846, %v1662_v62  ;;  %v1627_v5 = vmul.f32 0.5, %v6797_v6 }
 0x9cf   :  { %5738 = vtanh.f32 %v1671_v60  ;;  %v1672_v1 = vmul.f32 0.7978846, %v1664_v63 }
 0x9d0   :  { %5740 = vtanh.f32 %v1670_v0 }
 0x9d1   :  { %5742 = vtanh.f32 %v1672_v1  ;;  %v5496_v1 = vld [vmem:[%s7254_s11 + $0x168] ss:$12 sps:$4 sm:$0xff]  }
 0x9d6   :  { %v5729_v2 = vpop.eup %5728 }
 0x9d7   :  { %v5731_v3 = vpop.eup %5730  ;;  %v1681_v23 = vadd.f32 1.0, %v5729_v2  ;;  %v5498_v2 = vld [vmem:[%s7254_s11 + $0x16c] ss:$12 sps:$4 sm:$0xff]  }
 0x9d8   :  { %v5733_v7 = vpop.eup %5732  ;;  %v1683_v30 = vadd.f32 1.0, %v5731_v3  ;;  %v5499_v3 = vld [vmem:[%s7254_s11 + $0x170] ss:$12 sps:$4 sm:$0xff]   ;;  %2268 = vmatprep.subr.bf16.mxu1 %v5498_v2 }
 0x9d9   :  { %v5735_v8 = vpop.eup %5734  ;;  %v1682_v14 = vadd.f32 1.0, %v5733_v7  ;;  %v1689_v38 = vmul.f32 %v1681_v23, %v1625_v15  ;;  %v5500_v15 = vld [vmem:[%s7254_s11 + $0x150] ss:$12 sps:$4 sm:$0xff]   ;;  %v5507_v23 = vld [vmem:[%s7254_s11 + $0x140] ss:$12 sps:$4 sm:$0xff]  }
 0x9da   :  { %v1684_v17 = vadd.f32 1.0, %v5735_v8  ;;  %v1691_v40 = vmul.f32 %v1683_v30, %v1627_v5  ;;  %v5512_v30 = vld [vmem:[%s7254_s11 + $0x108] ss:$12 sps:$4 sm:$0xff]   ;;  %v5526_v5 = vld [vmem:[%s7254_s11 + $0xc4] ss:$12 sps:$4 sm:$0xff]  }
 0x9db   :  { %v5737_v9 = vpop.eup %5736  ;;  %v1690_v51 = vmul.f32 %v1682_v14, %v1626_v12 }
 0x9dc   :  { %v5739_v54 = vpop.eup %5738  ;;  %v1685_v16 = vadd.f32 1.0, %v5737_v9  ;;  %v1692_v37 = vmul.f32 %v1684_v17, %v1628_v32  ;;  %v5504_v17 = vld [vmem:[%s7254_s11 + $0x138] ss:$12 sps:$4 sm:$0xff]   ;;  %v5518_v32 = vld [vmem:[%s7254_s11 + $0xf4] ss:$12 sps:$4 sm:$0xff]  }
 0x9dd   :  { %v5741_v13 = vpop.eup %5740  ;;  %v1687_v24 = vadd.f32 1.0, %v5739_v54 }
 0x9de   :  { %v5743_v25 = vpop.eup %5742  ;;  %v1686_v28 = vadd.f32 1.0, %v5741_v13  ;;  %v1693_v10 = vmul.f32 %v1685_v16, %v1629_v22  ;;  %v5502_v16 = vld [vmem:[%s7254_s11 + $0x154] ss:$12 sps:$4 sm:$0xff]   ;;  %v5503_v13 = vld [vmem:[%s7254_s11 + $0x158] ss:$12 sps:$4 sm:$0xff]  }
 0x9df   :  { %v1688_v34 = vadd.f32 1.0, %v5743_v25  ;;  %v1695_v36 = vmul.f32 %v1687_v24, %v1631_v29  ;;  %v5506_v22 = vld [vmem:[%s7254_s11 + $0x13c] ss:$12 sps:$4 sm:$0xff]   ;;  %v5510_v24 = vld [vmem:[%s7254_s11 + $0x124] ss:$12 sps:$4 sm:$0xff]  }
 0x9e0   :  { %v1694_v35 = vmul.f32 %v1686_v28, %v1630_v26  ;;  %v1761_v41 = vpack.c.bf16 %v1693_v10, %v1689_v38  ;;  %v5511_v25 = vld [vmem:[%s7254_s11 + $0x128] ss:$12 sps:$4 sm:$0xff]   ;;  %v5508_v26 = vld [vmem:[%s7254_s11 + $0x120] ss:$12 sps:$4 sm:$0xff]   ;;  %v5515_v29 = vld [vmem:[%s7254_s11 + $0x110] ss:$12 sps:$4 sm:$0xff]  }
 0x9e1   :  { %v1696_v18 = vmul.f32 %v1688_v34, %v1632_v33  ;;  %v1763_v19 = vpack.c.bf16 %v1695_v36, %v1691_v40  ;;  %v5514_v28 = vld [vmem:[%s7254_s11 + $0x10c] ss:$12 sps:$4 sm:$0xff]   ;;  %v5516_v34 = vld [vmem:[%s7254_s11 + $0xf0] ss:$12 sps:$4 sm:$0xff]   ;;  %v5527_v36 = vld [vmem:[%s7254_s11 + $0xc8] ss:$12 sps:$4 sm:$0xff]  }
 0x9e2   :  { %v1762_v39 = vpack.c.bf16 %v1694_v35, %v1690_v51  ;;  %v5519_v33 = vld [vmem:[%s7254_s11 + $0xf8] ss:$12 sps:$4 sm:$0xff]   ;;  %v5522_v10 = vld [vmem:[%s7254_s11 + $0xdc] ss:$12 sps:$4 sm:$0xff]   ;;  %v5523_v51 = vld [vmem:[%s7254_s11 + $0xe0] ss:$12 sps:$4 sm:$0xff]  }
 0x9e3   :  { %v1764_v31 = vpack.c.bf16 %v1696_v18, %v1692_v37  ;;  %v5520_v35 = vld [vmem:[%s7254_s11 + $0xd8] ss:$12 sps:$4 sm:$0xff]   ;;  %v5524_v37 = vld [vmem:[%s7254_s11 + $0xc0] ss:$12 sps:$4 sm:$0xff]  }
 0x9e4   :  { %1996 = vmatprep.mubr.bf16.mxu1 %v1762_v39 }
 0x9e5   :  { %2037 = vmatprep.mubr.bf16.mxu0 %v1764_v31  ;;  %1997 = vmatmul.mubr.bf16.vlgmr.msra.gmra.mxu1 %v1761_v41 }
 0x9e6   :  { %2038 = vmatmul.mubr.bf16.vlgmr.msra.gmra.mxu0 %v1763_v19  ;;  %2300 = vmatprep.mubr.bf16.mxu1 %v6285_v27 }
 0x9e7   :  { %5182 = vmatprep.mubr.msk.bf16.mxu0 %vm6286_vm0, %v6284_v4  ;;  %5167 = vmatpush3.bf16.msra.mxu0 %v5499_v3 }
 0x9e8   :  { %2269 = vmatpush1.bf16.msra.mxu1 %v5496_v1  ;;  %5168 = vmatprep.subr.bf16.mxu0 %v6284_v4 }
 0x9e9   :  { %2270 = vmatprep.subr.bf16.mxu1 %v5502_v16 }
 0x9eb   :  { %5169 = vmatpush3.bf16.msra.mxu0 %v5503_v13 }
 0x9ec   :  { %2271 = vmatpush1.bf16.msra.mxu1 %v5500_v15  ;;  %5170 = vmatprep.subr.bf16.mxu0 %v6284_v4 }
 0x9ed   :  { %2272 = vmatprep.subr.bf16.mxu1 %v5506_v22 }
 0x9ef   :  { %5171 = vmatpush3.bf16.msra.mxu0 %v5507_v23  ;;  %v6947_v23 = vld [vmem:[%s7256_s22] sm:$0xff] }
 0x9f0   :  { %2273 = vmatpush1.bf16.msra.mxu1 %v5504_v17  ;;  %5172 = vmatprep.subr.bf16.mxu0 %v6284_v4 }
 0x9f1   :  { %2274 = vmatprep.subr.bf16.mxu1 %v5510_v24 }
 0x9f3   :  { %5173 = vmatpush3.bf16.msra.mxu0 %v5511_v25 }
 0x9f4   :  { %2275 = vmatpush1.bf16.msra.mxu1 %v5508_v26  ;;  %5174 = vmatprep.subr.bf16.mxu0 %v6284_v4 }
 0x9f5   :  { %2276 = vmatprep.subr.bf16.mxu1 %v5514_v28 }
 0x9f7   :  { %5175 = vmatpush3.bf16.msra.mxu0 %v5515_v29 }
 0x9f8   :  { %2277 = vmatpush1.bf16.msra.mxu1 %v5512_v30  ;;  %5176 = vmatprep.subr.bf16.mxu0 %v6284_v4  ;;  %v6954_v30 = vld [vmem:[%s7256_s22 + $0x8] sm:$0xff] }
 0x9f9   :  { %2278 = vmatprep.subr.bf16.mxu1 %v5518_v32 }
 0x9fb   :  { %5177 = vmatpush3.bf16.msra.mxu0 %v5519_v33 }
 0x9fc   :  { %2279 = vmatpush1.bf16.msra.mxu1 %v5516_v34  ;;  %5178 = vmatprep.subr.bf16.mxu0 %v6284_v4 }
 0x9fd   :  { %2280 = vmatprep.subr.bf16.mxu1 %v5522_v10 }
 0x9ff   :  { %5179 = vmatpush3.bf16.msra.mxu0 %v5523_v51 }
 0xa00   :  { %2281 = vmatpush1.bf16.msra.mxu1 %v5520_v35  ;;  %5180 = vmatprep.subr.bf16.mxu0 %v6284_v4 }
 0xa01   :  { %2282 = vmatprep.subr.bf16.mxu1 %v5526_v5 }
 0xa03   :  { %5181 = vmatpush3.bf16.msra.mxu0 %v5527_v36 }
 0xa04   :  { %2283 = vmatpush1.bf16.msra.mxu1 %v5524_v37  ;;  %5210 = vmatprep.subr.bf16.mxu0 %v6284_v4 }
 0xa05   :  { %5186 = vmatprep.subr.bf16.mxu1 %v6284_v4 }
 0xaa5   :  { %v4945_v11 = vpop.f32.mrf.mxu1 }
 0xaa6   :  { %v4967_v6 = vpop.f32.mrf.mxu0 }
 0xaa7   :  { %v4946_v42 = vpop.f32.mrf.mxu1 }
 0xaa8   :  { %v4947_v43 = vadd.f32 %v4946_v42, %v4945_v11  ;;  %v4968_v44 = vpop.f32.mrf.mxu0 }
 0xaa9   :  { %v4948_v45 = vpop.f32.mrf.mxu1  ;;  %v4969_v47 = vadd.f32 %v4968_v44, %v4967_v6  ;;  %v4672_v6 = vld [vmem:[#allocation16] ss:$0 sm:$0xff]  ;;  %v4673_v44 = vld [vmem:[#allocation17] ss:$0 sm:$0xff] }
 0xaaa   :  { %v1999_v46 = vadd.f32 %v4947_v43, %v4639_v50  ;;  %v4970_v48 = vpop.f32.mrf.mxu0 }
 0xaab   :  { %v4949_v49 = vpop.f32.mrf.mxu1 }
 0xaac   :  { %v2040_v52 = vadd.f32 %v4969_v47, %v1999_v46  ;;  %v4950_v53 = vadd.f32 %v4949_v49, %v4948_v45  ;;  %v4971_v57 = vpop.f32.mrf.mxu0 }
 0xaad   :  { %v4972_v60 = vadd.f32 %v4971_v57, %v4970_v48 }
 0xaae   :  { %v2002_v59 = vadd.f32 %v4950_v53, %v4639_v50  ;;  %v2046_v62 = vadd.f32 %v2040_v52, %v6781_v20  ;;  %v4706_v53 = vld [vmem:[%s7255_s20 + $0x3] sm:$0x7] }
 0xab0   :  { %v2043_v63 = vadd.f32 %v4972_v60, %v2002_v59  ;;  %2050 = vadd.xlane.f32.xlu0 %v2046_v62  ;;  %v2132_v60 = vrot.slane %v4706_v53, %v6645_v58 }
 0xab2   :  { %v2047_v0 = vadd.f32 %v2043_v63, %v6783_v21 }
 0xab4   :  { %2052 = vadd.xlane.f32.xlu1 %v2047_v0 }
 0xb39   :  { %v2051_v20 = vpop.xlane.xlu0 %2050 }
 0xb3a   :  { %v2054_v21 = vmul.f32 0.0078125, %v2051_v20 }
 0xb3c   :  { %v6838_v7 = vsub.f32 %v2046_v62, %v2054_v21  ;;  %v2128_v21 = vrot.slane %v4706_v53, %v6636_v55 }
 0xb3d   :  { %v2053_v8 = vpop.xlane.xlu1 %2052 }
 0xb3e   :  { %v2055_v9 = vmul.f32 0.0078125, %v2053_v8  ;;  %v2058_v54 = vmul.f32 %v6838_v7, %v6838_v7  ;;  %v2136_v8 = vrot.slane %v4706_v53, %v6639_v56 }
 0xb40   :  { %v6842_v12 = vsub.f32 %v2047_v0, %v2055_v9  ;;  %2060 = vadd.xlane.f32.xlu0 %v2058_v54 }
 0xb42   :  { %v2059_v14 = vmul.f32 %v6842_v12, %v6842_v12 }
 0xb44   :  { %2062 = vadd.xlane.f32.xlu1 %v2059_v14 }
 0xbc9   :  { %v2061_v18 = vpop.xlane.xlu0 %2060 }
 0xbca   :  { %v2064_v38 = vmul.f32 0.0078125, %v2061_v18 }
 0xbcc   :  { %v2066_v39 = vadd.f32 1e-12, %v2064_v38 }
 0xbcd   :  { %v2063_v40 = vpop.xlane.xlu1 %2062 }
 0xbce   :  { %5744 = vrsqrt.f32 %v2066_v39  ;;  %v2065_v31 = vmul.f32 0.0078125, %v2063_v40 }
 0xbd0   :  { %v2067_v41 = vadd.f32 1e-12, %v2065_v31 }
 0xbd2   :  { %5746 = vrsqrt.f32 %v2067_v41 }
 0xbdb   :  { %v5745_v19 = vpop.eup %5744 }
 0xbdc   :  { %v2070_v11 = vmul.f32 %v5745_v19, %v6838_v7 }
 0xbde   :  { %v2078_v43 = vmul.f32 %v4672_v6, %v2070_v11 }
 0xbdf   :  { %v5747_v50 = vpop.eup %5746 }
 0xbe0   :  { %v2071_v42 = vmul.f32 %v5747_v50, %v6842_v12  ;;  %v6919_v46 = vadd.f32 %v4673_v44, %v2078_v43 }
 0xbe2   :  { %v2079_v45 = vmul.f32 %v4672_v6, %v2071_v42 }
 0xbe4   :  { %v6921_v47 = vadd.f32 %v4673_v44, %v2079_v45 }
 0xbe6   :  { %v2121_v48 = vpack.c.bf16 %v6921_v47, %v6919_v46 }
 0xbe8   :  { %2301 = vmatmul.mubr.bf16.vlgmr.msra.gmra.mxu1 %v2121_v48  ;;  %5183 = vmatmul.mubr.bf16.vlgmr.msra.gmra.mxu0 %v2121_v48 }
 0xbe9   :  { %5188 = vmatprep.mubr.msk.bf16.mxu1 %vm6286_vm0, %v6284_v4  ;;  %5212 = vmatprep.mubr.msk.bf16.mxu0 %vm6286_vm0, %v6284_v4 }
 0xca8   :  { %v2302_v49 = vpop.f32.mrf.mxu1  ;;  %v2345_v52 = vpop.f32.mrf.mxu0 }
 0xca9   :  { %v2303_v12 = vadd.f32 %v2302_v49, %v2128_v21  ;;  %v2346_v14 = vadd.f32 %v2345_v52, %v2136_v8 }
 0xcaa   :  { %v2304_v57 = vpop.f32.mrf.mxu1  ;;  %v5184_v59 = vpop.f32.mrf.mxu0 }
 0xcab   :  { %v2305_v2 = vadd.f32 %v2304_v57, %v2132_v60 }
 0xcac   :  { %v2306_v62 = vpop.f32.mrf.mxu1  ;;  %v2348_v63 = vpop.f32.mrf.mxu0 }
 0xcad   :  { %v2307_v9 = vadd.f32 %v2306_v62, %v2128_v21  ;;  %v2349_v54 = vadd.f32 %v2348_v63, %v2136_v8 }
 0xcae   :  { %v2308_v0 = vpop.f32.mrf.mxu1  ;;  %v5185_v1 = vpop.f32.mrf.mxu0 }
 0xcaf   :  { %v2309_v3 = vadd.f32 %v2308_v0, %v2132_v60  ;;  %v2352_v15 = vpack.c.bf16 %v2307_v9, %v2303_v12  ;;  %v6937_v16 = vpack.c.bf16 %v2349_v54, %v2346_v14 }
 0xcb1   :  { %v2353_v20 = vpack.c.bf16 %v2309_v3, %v2305_v2 }
 0xcb3   :  { %v2359_v7 = vsel %vm639_vm1, %v2353_v20, 0 }
 0xcb4   :  { %5187 = vmatpush3.bf16.xpose.msra.mxu1 %v2359_v7 }
 0xcb5   :  { %5192 = vmatprep.subr.bf16.mxu1 %v6284_v4 }
 0xcbb   :  { %5189 = vmatmul.mubr.msk.bf16.vlgmr.msra.gmra.mxu1 %vm639_vm1, %v2352_v15 }
 0xcbc   :  { %5193 = vmatpush3.bf16.msra.mxu1 %v6937_v16  ;;  %5194 = vmatprep.mubr.msk.bf16.mxu1 %vm6286_vm0, %v6284_v4 }
 0xcbd   :  { %5198 = vmatprep.subr.bf16.mxu1 %v6284_v4 }
 0xd7b   :  { %v2395_v13 = vpop.f32.mrf.mxu1 }
 0xd7c   :  { %v2402_v17 = vmul.f32 0.17677669, %v2395_v13 }
 0xd7d   :  { %v5190_v22 = vpop.f32.mrf.mxu1 }
 0xd7e   :  { %v2404_v24 = vadd.f32 %v6947_v23, %v2402_v17 }
 0xd7f   :  { %v2398_v25 = vpop.f32.mrf.mxu1 }
 0xd80   :  { %v2403_v26 = vmul.f32 0.17677669, %v2398_v25  ;;  %v2406_v28 = vsel %vm691_vm2, %v2404_v24, -inf }
 0xd81   :  { %2407 = vmax.xlane.f32.xlu0 %v2406_v28  ;;  %v5191_v29 = vpop.f32.mrf.mxu1 }
 0xd82   :  { %v2405_v32 = vadd.f32 %v6954_v30, %v2403_v26 }
 0xd84   :  { %v2409_v33 = vsel %vm691_vm2, %v2405_v32, -inf }
 0xd85   :  { %2410 = vmax.xlane.f32.xlu1 %v2409_v33 }
 0xe0a   :  { %v2408_v34 = vpop.xlane.xlu0 %2407 }
 0xe0b   :  { %v2412_v10 = vsub.f32 %v2404_v24, %v2408_v34 }
 0xe0d   :  { %v2414_v51 = vmul.f32 1.442695, %v2412_v10 }
 0xe0e   :  { %v2411_v35 = vpop.xlane.xlu1 %2410 }
 0xe0f   :  { %5748 = vpow2.f32 %v2414_v51  ;;  %v2413_v5 = vsub.f32 %v2405_v32, %v2411_v35 }
 0xe11   :  { %v2416_v36 = vmul.f32 1.442695, %v2413_v5 }
 0xe13   :  { %5750 = vpow2.f32 %v2416_v36 }
 0xe1c   :  { %v5749_v37 = vpop.eup %5748 }
 0xe1d   :  { %v2418_v18 = vsel %vm691_vm2, %v5749_v37, 0.0 }
 0xe1e   :  { %2419 = vadd.xlane.f32.xlu0 %v2418_v18 }
 0xe20   :  { %v5751_v38 = vpop.eup %5750 }
 0xe21   :  { %v2421_v39 = vsel %vm691_vm2, %v5751_v38, 0.0 }
 0xe22   :  { %2422 = vadd.xlane.f32.xlu1 %v2421_v39 }
 0xe33   :  { %2474 = vrot.lane.b32.xlu1 %v2352_v15, %s6287_s1 }
 0xe34   :  { %2477 = vrot.lane.b32.xlu0 %v2353_v20, %s6287_s1 }
 0xe37   :  { %2603 = vrot.lane.b32.xlu1 %v2353_v20, %s6265_s30 }
 0xe38   :  { %2728 = vrot.lane.b32.xlu0 %v2353_v20, %s6288_s15 }
 0xe3b   :  { %2601 = vrot.lane.b32.xlu1 %v2352_v15, %s6265_s30 }
 0xe3f   :  { %2726 = vrot.lane.b32.xlu1 %v2352_v15, %s6288_s15 }
 0xea7   :  { %v2420_v40 = vpop.xlane.xlu0 %2419 }
 0xea8   :  { %5752 = vrcp.f32 %v2420_v40 }
 0xeab   :  { %v2423_v31 = vpop.xlane.xlu1 %2422  ;;  %v2478_v19 = vpop.permute.xlu0 %2477 }
 0xeac   :  { %5754 = vrcp.f32 %v2423_v31  ;;  %v2483_v53 = vsel %vm639_vm1, %v2478_v19, 0 }
 0xeaf   :  { %v2475_v41 = vpop.permute.xlu1 %2474  ;;  %v2729_v43 = vpop.permute.xlu0 %2728 }
 0xeb0   :  { %v2734_v49 = vsel %vm639_vm1, %v2729_v43, 0 }
 0xeb3   :  { %v2604_v11 = vpop.permute.xlu1 %2603 }
 0xeb4   :  { %v2609_v6 = vsel %vm639_vm1, %v2604_v11, 0 }
 0xeb5   :  { %5211 = vmatpush3.bf16.xpose.msra.mxu0 %v2609_v6  ;;  %v5753_v50 = vpop.eup %5752 }
 0xeb6   :  { %5222 = vmatprep.subr.bf16.mxu0 %v6284_v4  ;;  %v2426_v44 = vmul.f32 %v5753_v50, %v5749_v37 }
 0xeb7   :  { %v2602_v48 = vpop.permute.xlu1 %2601 }
 0xeb9   :  { %v5755_v42 = vpop.eup %5754 }
 0xeba   :  { %v2427_v45 = vmul.f32 %v5755_v42, %v5751_v38 }
 0xebb   :  { %v2727_v57 = vpop.permute.xlu1 %2726 }
 0xebc   :  { %5213 = vmatmul.mubr.msk.bf16.vlgmr.msra.gmra.mxu0 %vm639_vm1, %v2602_v48  ;;  %v2428_v52 = vpack.c.bf16 %v2427_v45, %v2426_v44 }
 0xebd   :  { %5223 = vmatpush3.bf16.xpose.msra.mxu0 %v2734_v49  ;;  %5224 = vmatprep.mubr.msk.bf16.mxu0 %vm6286_vm0, %v6284_v4 }
 0xebe   :  { %5195 = vmatmul.mubr.msk.bf16.vlgmr.msra.gmra.mxu1 %vm691_vm2, %v2428_v52  ;;  %5234 = vmatprep.subr.bf16.mxu0 %v6284_v4 }
 0xebf   :  { %5199 = vmatpush3.bf16.xpose.msra.mxu1 %v2483_v53  ;;  %5200 = vmatprep.mubr.msk.bf16.mxu1 %vm6286_vm0, %v6284_v4 }
 0xec0   :  { %5204 = vmatprep.subr.bf16.mxu1 %v6284_v4 }
 0xec4   :  { %5225 = vmatmul.mubr.msk.bf16.vlgmr.msra.gmra.mxu0 %vm639_vm1, %v2727_v57 }
 0xec5   :  { %5250 = vmatprep.mubr.msk.bf16.mxu0 %vm6286_vm0, %v6284_v4 }
 0xec6   :  { %5201 = vmatmul.mubr.msk.bf16.vlgmr.msra.gmra.mxu1 %vm639_vm1, %v2475_v41 }
 0xec7   :  { %5206 = vmatprep.mubr.msk.bf16.mxu1 %vm6286_vm0, %v6284_v4 }
 0xf7c   :  { %v2645_v59 = vpop.f32.mrf.mxu0 }
 0xf7d   :  { %v2652_v21 = vmul.f32 0.17677669, %v2645_v59 }
 0xf7e   :  { %v6984_v60 = vpop.f32.mrf.mxu1  ;;  %v5214_v62 = vpop.f32.mrf.mxu0 }
 0xf7f   :  { %v2654_v22 = vadd.f32 %v6947_v23, %v2652_v21 }
 0xf80   :  { %v5196_v63 = vpop.f32.mrf.mxu1  ;;  %v2648_v0 = vpop.f32.mrf.mxu0 }
 0xf81   :  { %v2653_v15 = vmul.f32 0.17677669, %v2648_v0  ;;  %v2656_v32 = vsel %vm691_vm2, %v2654_v22, -inf }
 0xf82   :  { %v6986_v1 = vpop.f32.mrf.mxu1  ;;  %v5215_v2 = vpop.f32.mrf.mxu0 }
 0xf83   :  { %v2655_v10 = vadd.f32 %v6954_v30, %v2653_v15 }
 0xf84   :  { %v5197_v3 = vpop.f32.mrf.mxu1  ;;  %v2770_v20 = vpop.f32.mrf.mxu0 }
 0xf85   :  { %v2777_v33 = vmul.f32 0.17677669, %v2770_v20  ;;  %v2659_v35 = vsel %vm691_vm2, %v2655_v10, -inf }
 0xf86   :  { %v2519_v7 = vpop.f32.mrf.mxu1  ;;  %v5226_v8 = vpop.f32.mrf.mxu0 }
 0xf87   :  { %v2526_v9 = vmul.f32 0.17677669, %v2519_v7  ;;  %v2779_v36 = vadd.f32 %v6947_v23, %v2777_v33 }
 0xf88   :  { %v5202_v54 = vpop.f32.mrf.mxu1  ;;  %v2773_v12 = vpop.f32.mrf.mxu0 }
 0xf89   :  { %v2528_v14 = vadd.f32 %v6947_v23, %v2526_v9  ;;  %v2778_v24 = vmul.f32 0.17677669, %v2773_v12  ;;  %v2781_v37 = vsel %vm691_vm2, %v2779_v36, -inf }
 0xf8a   :  { %v2522_v13 = vpop.f32.mrf.mxu1  ;;  %v5227_v17 = vpop.f32.mrf.mxu0 }
 0xf8b   :  { %v2527_v25 = vmul.f32 0.17677669, %v2522_v13  ;;  %v2530_v26 = vsel %vm691_vm2, %v2528_v14, -inf  ;;  %v2780_v51 = vadd.f32 %v6954_v30, %v2778_v24 }
 0xf8c   :  { %2531 = vmax.xlane.f32.xlu0 %v2530_v26  ;;  %v5203_v28 = vpop.f32.mrf.mxu1 }
 0xf8d   :  { %v2529_v29 = vadd.f32 %v6954_v30, %v2527_v25  ;;  %v2784_v5 = vsel %vm691_vm2, %v2780_v51, -inf }
 0xf8f   :  { %v2533_v34 = vsel %vm691_vm2, %v2529_v29, -inf }
 0xf90   :  { %2657 = vmax.xlane.f32.xlu0 %v2656_v32  ;;  %2534 = vmax.xlane.f32.xlu1 %v2533_v34 }
 0xf94   :  { %2660 = vmax.xlane.f32.xlu0 %v2659_v35  ;;  %2785 = vmax.xlane.f32.xlu1 %v2784_v5 }
 0xf98   :  { %2782 = vmax.xlane.f32.xlu0 %v2781_v37 }
0x1015   :  { %v2532_v18 = vpop.xlane.xlu0 %2531 }
0x1016   :  { %v2536_v6 = vsub.f32 %v2528_v14, %v2532_v18  ;;  %v5528_v18 = vld [vmem:[%s7257_s17 + $0x78] sm:$0xff]  }
0x1017   :  { %5235 = vmatpush3.bf16.msra.mxu0 %v5528_v18 }
0x1018   :  { %v2538_v45 = vmul.f32 1.442695, %v2536_v6  ;;  %5236 = vmatprep.subr.bf16.mxu0 %v6284_v4 }
0x1019   :  { %v2658_v38 = vpop.xlane.xlu0 %2657  ;;  %v2535_v39 = vpop.xlane.xlu1 %2534 }
0x101a   :  { %v2662_v40 = vsub.f32 %v2654_v22, %v2658_v38  ;;  %v2537_v50 = vsub.f32 %v2529_v29, %v2535_v39  ;;  %v5529_v38 = vld [vmem:[%s7257_s17 + $0x70] sm:$0xff]   ;;  %v5530_v39 = vld [vmem:[%s7257_s17 + $0x68] sm:$0xff]  }
0x101b   :  { %5237 = vmatpush3.bf16.msra.mxu0 %v5529_v38 }
0x101c   :  { %v2664_v31 = vmul.f32 1.442695, %v2662_v40  ;;  %v2540_v48 = vmul.f32 1.442695, %v2537_v50  ;;  %5238 = vmatprep.subr.bf16.mxu0 %v6284_v4  ;;  %v5531_v40 = vld [vmem:[%s7257_s17 + $0x60] sm:$0xff]  }
0x101d   :  { %v2661_v41 = vpop.xlane.xlu0 %2660  ;;  %v2786_v30 = vpop.xlane.xlu1 %2785 }
0x101e   :  { %5756 = vpow2.f32 %v2664_v31  ;;  %v2663_v19 = vsub.f32 %v2655_v10, %v2661_v41  ;;  %v2788_v11 = vsub.f32 %v2780_v51, %v2786_v30  ;;  %v5532_v31 = vld [vmem:[%s7257_s17 + $0x58] sm:$0xff]  }
0x101f   :  { %5239 = vmatpush3.bf16.msra.mxu0 %v5530_v39  ;;  %v5542_v39 = vld [vmem:[#allocation10 + $0x1c0] ss:$16 sps:$4 sm:$0xff]  }
0x1020   :  { %v2666_v42 = vmul.f32 1.442695, %v2663_v19  ;;  %v2791_v43 = vmul.f32 1.442695, %v2788_v11  ;;  %5240 = vmatprep.subr.bf16.mxu0 %v6284_v4  ;;  %v5533_v11 = vld [vmem:[%s7257_s17 + $0x50] sm:$0xff]  }
0x1021   :  { %v2783_v23 = vpop.xlane.xlu0 %2782 }
0x1022   :  { %5758 = vpow2.f32 %v2666_v42  ;;  %v2787_v44 = vsub.f32 %v2779_v36, %v2783_v23  ;;  %v5534_v42 = vld [vmem:[%s7257_s17 + $0x48] sm:$0xff]  }
0x1023   :  { %5760 = vpow2.f32 %v2791_v43  ;;  %5241 = vmatpush3.bf16.msra.mxu0 %v5531_v40  ;;  %v5544_v40 = vld [vmem:[#allocation10 + $0x1c4] ss:$16 sps:$4 sm:$0xff]  }
0x1024   :  { %v2789_v49 = vmul.f32 1.442695, %v2787_v44  ;;  %5242 = vmatprep.subr.bf16.mxu0 %v6284_v4 }
0x1026   :  { %5762 = vpow2.f32 %v2789_v49 }
0x1027   :  { %5764 = vpow2.f32 %v2538_v45  ;;  %5243 = vmatpush3.bf16.msra.mxu0 %v5532_v31  ;;  %v5545_v31 = vld [vmem:[#allocation10 + $0x1c8] ss:$16 sps:$4 sm:$0xff]  }
0x1028   :  { %5766 = vpow2.f32 %v2540_v48  ;;  %5244 = vmatprep.subr.bf16.mxu0 %v6284_v4  ;;  %v5535_v48 = vld [vmem:[%s7257_s17 + $0x40] sm:$0xff]  }
0x102b   :  { %v5757_v52 = vpop.eup %5756  ;;  %5245 = vmatpush3.bf16.msra.mxu0 %v5533_v11  ;;  %v5551_v11 = vld [vmem:[#allocation10 + $0x1a8] ss:$16 sps:$4 sm:$0xff]  }
0x102c   :  { %v2668_v53 = vsel %vm691_vm2, %v5757_v52, 0.0  ;;  %5246 = vmatprep.subr.bf16.mxu0 %v6284_v4 }
0x102d   :  { %2669 = vadd.xlane.f32.xlu0 %v2668_v53 }
0x102f   :  { %v5759_v57 = vpop.eup %5758  ;;  %5247 = vmatpush3.bf16.msra.mxu0 %v5534_v42  ;;  %v5559_v42 = vld [vmem:[#allocation10 + $0x18c] ss:$16 sps:$4 sm:$0xff]  }
0x1030   :  { %v2671_v59 = vsel %vm691_vm2, %v5759_v57, 0.0  ;;  %v5761_v62 = vpop.eup %5760  ;;  %5248 = vmatprep.subr.bf16.mxu0 %v6284_v4 }
0x1031   :  { %2672 = vadd.xlane.f32.xlu1 %v2671_v59  ;;  %v2796_v3 = vsel %vm691_vm2, %v5761_v62, 0.0 }
0x1033   :  { %v5763_v63 = vpop.eup %5762  ;;  %5249 = vmatpush3.bf16.msra.mxu0 %v5535_v48  ;;  %v5560_v48 = vld [vmem:[#allocation10 + $0x160] ss:$16 sps:$4 sm:$0xff]  }
0x1034   :  { %v5765_v0 = vpop.eup %5764  ;;  %v2793_v2 = vsel %vm691_vm2, %v5763_v63, 0.0 }
0x1035   :  { %v5767_v20 = vpop.eup %5766  ;;  %2794 = vadd.xlane.f32.xlu0 %v2793_v2  ;;  %2797 = vadd.xlane.f32.xlu1 %v2796_v3  ;;  %v2542_v21 = vsel %vm691_vm2, %v5765_v0, 0.0 }
0x1036   :  { %v2545_v7 = vsel %vm691_vm2, %v5767_v20, 0.0 }
0x1039   :  { %2543 = vadd.xlane.f32.xlu0 %v2542_v21  ;;  %2546 = vadd.xlane.f32.xlu1 %v2545_v7 }
0x104a   :  { %2679 = vrot.lane.b32.xlu1 %v6937_v16, %s6265_s30 }
0x104e   :  { %2804 = vrot.lane.b32.xlu1 %v6937_v16, %s6288_s15 }
0x104f   :  { %2554 = vrot.lane.b32.xlu0 %v6937_v16, %s6287_s1 }
0x10b6   :  { %v2670_v8 = vpop.xlane.xlu0 %2669 }
0x10ba   :  { %v2673_v9 = vpop.xlane.xlu1 %2672 }
0x10be   :  { %v2795_v54 = vpop.xlane.xlu0 %2794  ;;  %v2798_v12 = vpop.xlane.xlu1 %2797 }
0x10c2   :  { %v2544_v14 = vpop.xlane.xlu0 %2543  ;;  %v2547_v15 = vpop.xlane.xlu1 %2546 }
0x10c3   :  { %5768 = vrcp.f32 %v2544_v14 }
0x10c4   :  { %5770 = vrcp.f32 %v2547_v15 }
0x10c5   :  { %5772 = vrcp.f32 %v2673_v9 }
0x10c6   :  { %v2555_v13 = vpop.permute.xlu0 %2554  ;;  %5774 = vrcp.f32 %v2670_v8  ;;  %v2680_v28 = vpop.permute.xlu1 %2679 }
0x10c7   :  { %5205 = vmatpush3.bf16.msra.mxu1 %v2555_v13  ;;  %5776 = vrcp.f32 %v2795_v54 }
0x10c8   :  { %5216 = vmatprep.subr.bf16.mxu1 %v6284_v4  ;;  %5778 = vrcp.f32 %v2798_v12 }
0x10ca   :  { %v2805_v35 = vpop.permute.xlu1 %2804 }
0x10d0   :  { %v5769_v17 = vpop.eup %5768 }
0x10d1   :  { %v5771_v22 = vpop.eup %5770  ;;  %v2550_v24 = vmul.f32 %v5769_v17, %v5765_v0 }
0x10d2   :  { %v2551_v16 = vmul.f32 %v5771_v22, %v5767_v20  ;;  %v5773_v26 = vpop.eup %5772 }
0x10d3   :  { %v5775_v29 = vpop.eup %5774  ;;  %v2677_v32 = vmul.f32 %v5773_v26, %v5759_v57 }
0x10d4   :  { %v2552_v25 = vpack.c.bf16 %v2551_v16, %v2550_v24  ;;  %v2676_v33 = vmul.f32 %v5775_v29, %v5757_v52  ;;  %v5777_v34 = vpop.eup %5776 }
0x10d5   :  { %v5779_v51 = vpop.eup %5778  ;;  %v2801_v5 = vmul.f32 %v5777_v34, %v5763_v63  ;;  %v5538_v34 = vld [vmem:[#allocation10 + $0x1e4] ss:$16 sps:$4 sm:$0xff]  }
0x10d6   :  { %5207 = vmatmul.mubr.msk.bf16.vlgmr.msra.gmra.mxu1 %vm691_vm2, %v2552_v25  ;;  %v2678_v10 = vpack.c.bf16 %v2677_v32, %v2676_v33  ;;  %v2802_v36 = vmul.f32 %v5779_v51, %v5761_v62  ;;  %v5536_v33 = vld [vmem:[#allocation10 + $0x1e0] ss:$16 sps:$4 sm:$0xff]   ;;  %v5541_v51 = vld [vmem:[#allocation10 + $0x1ec] ss:$16 sps:$4 sm:$0xff]  }
0x10d7   :  { %5217 = vmatpush3.bf16.msra.mxu1 %v2680_v28  ;;  %5218 = vmatprep.mubr.msk.bf16.mxu1 %vm6286_vm0, %v6284_v4 }
0x10d8   :  { %5228 = vmatprep.subr.bf16.mxu1 %v6284_v4  ;;  %v2803_v37 = vpack.c.bf16 %v2802_v36, %v2801_v5  ;;  %3300 = vmatprep.subr.bf16.mxu0 %v5541_v51  ;;  %v5588_v51 = vld [vmem:[#allocation13 + $0x170] sm:$0xff]  }
0x10de   :  { %5219 = vmatmul.mubr.msk.bf16.vlgmr.msra.gmra.mxu1 %vm691_vm2, %v2678_v10  ;;  %v5539_v10 = vld [vmem:[#allocation10 + $0x1e8] ss:$16 sps:$4 sm:$0xff]  }
0x10df   :  { %5229 = vmatpush3.bf16.msra.mxu1 %v2805_v35  ;;  %5230 = vmatprep.mubr.msk.bf16.mxu1 %vm6286_vm0, %v6284_v4 }
0x10e0   :  { %3257 = vmatprep.subr.bf16.mxu1 %v5538_v34  ;;  %v5586_v34 = vld [vmem:[#allocation13 + $0x138] sm:$0xff]  }
0x10e6   :  { %5231 = vmatmul.mubr.msk.bf16.vlgmr.msra.gmra.mxu1 %vm691_vm2, %v2803_v37 }
0x10e7   :  { %3289 = vmatprep.mubr.bf16.mxu1 %v6285_v27  ;;  %3258 = vmatpush1.bf16.msra.mxu1 %v5536_v33  ;;  %v5585_v33 = vld [vmem:[#allocation13 + $0x1f8] sm:$0xff]  }
0x10e8   :  { %3259 = vmatprep.subr.bf16.mxu1 %v5544_v40  ;;  %v5598_v40 = vld [vmem:[#allocation13 + $0x120] sm:$0xff]  }
0x10eb   :  { %3260 = vmatpush1.bf16.msra.mxu1 %v5542_v39  ;;  %v5597_v39 = vld [vmem:[#allocation13 + $0x1e0] sm:$0xff]  }
0x1196   :  { %v2594_v41 = vpop.f32.mrf.mxu1 }
0x1198   :  { %v5208_v30 = vpop.f32.mrf.mxu1 }
0x1199   :  { %v5548_v30 = vld [vmem:[#allocation10 + $0x1a0] ss:$16 sps:$4 sm:$0xff]  }
0x119a   :  { %v2597_v19 = vpop.f32.mrf.mxu1 }
0x119b   :  { %v5361_v6 = vpack.i.bf16 %v2597_v19, %v2594_v41  ;;  %v5547_v41 = vld [vmem:[#allocation10 + $0x1cc] ss:$16 sps:$4 sm:$0xff]   ;;  %v5550_v19 = vld [vmem:[#allocation10 + $0x1a4] ss:$16 sps:$4 sm:$0xff]  }
0x119c   :  { %v5209_v50 = vpop.f32.mrf.mxu1  ;;  %3261 = vmatprep.subr.bf16.mxu1 %v5550_v19  ;;  %v5602_v19 = vld [vmem:[#allocation13 + $0x118] sm:$0xff]  }
0x119d   :  { %5362 = vrot.lane.b32.xlu1 %v5361_v6, %s6288_s15  ;;  %v5553_v6 = vld [vmem:[#allocation10 + $0x1ac] ss:$16 sps:$4 sm:$0xff]   ;;  %v5556_v50 = vld [vmem:[#allocation10 + $0x184] ss:$16 sps:$4 sm:$0xff]   ;;  %3262 = vmatpush1.bf16.msra.mxu1 %v5548_v30 }
0x119e   :  { %v2719_v43 = vpop.f32.mrf.mxu1  ;;  %3263 = vmatprep.subr.bf16.mxu1 %v5556_v50  ;;  %v5601_v30 = vld [vmem:[#allocation13 + $0x1d8] sm:$0xff]   ;;  %v5605_v50 = vld [vmem:[#allocation13 + $0x1d0] sm:$0xff]  }
0x11a0   :  { %v5220_v23 = vpop.f32.mrf.mxu1 }
0x11a1   :  { %v5557_v23 = vld [vmem:[#allocation10 + $0x188] ss:$16 sps:$4 sm:$0xff]  }
0x11a2   :  { %v2722_v44 = vpop.f32.mrf.mxu1 }
0x11a3   :  { %v5366_v45 = vpack.i.bf16 %v2722_v44, %v2719_v43  ;;  %v5554_v43 = vld [vmem:[#allocation10 + $0x180] ss:$16 sps:$4 sm:$0xff]   ;;  %v5562_v44 = vld [vmem:[#allocation10 + $0x164] ss:$16 sps:$4 sm:$0xff]  }
0x11a4   :  { %v5221_v49 = vpop.f32.mrf.mxu1  ;;  %3264 = vmatpush1.bf16.msra.mxu1 %v5554_v43  ;;  %v5607_v43 = vld [vmem:[#allocation13 + $0x190] sm:$0xff]  }
0x11a5   :  { %5367 = vrot.lane.b32.xlu0 %v5366_v45, %s6265_s30  ;;  %v5565_v45 = vld [vmem:[#allocation10 + $0x16c] ss:$16 sps:$4 sm:$0xff]   ;;  %3265 = vmatprep.subr.bf16.mxu1 %v5562_v44  ;;  %v5563_v49 = vld [vmem:[#allocation10 + $0x168] ss:$16 sps:$4 sm:$0xff]   ;;  %v5609_v44 = vld [vmem:[#allocation13 + $0x1c8] sm:$0xff]  }
0x11a6   :  { %v2844_v52 = vpop.f32.mrf.mxu1 }
0x11a8   :  { %v5232_v53 = vpop.f32.mrf.mxu1  ;;  %3266 = vmatpush1.bf16.msra.mxu1 %v5560_v48  ;;  %v5611_v48 = vld [vmem:[#allocation13 + $0x188] sm:$0xff]  }
0x11a9   :  { %v5571_v53 = vld [vmem:[#allocation10 + $0x14c] ss:$16 sps:$4 sm:$0xff]  }
0x11aa   :  { %v2847_v57 = vpop.f32.mrf.mxu1 }
0x11ab   :  { %v5371_v59 = vpack.i.bf16 %v2847_v57, %v2844_v52  ;;  %v5568_v52 = vld [vmem:[#allocation10 + $0x144] ss:$16 sps:$4 sm:$0xff]   ;;  %v5566_v57 = vld [vmem:[#allocation10 + $0x140] ss:$16 sps:$4 sm:$0xff]  }
0x11ac   :  { %v5233_v62 = vpop.f32.mrf.mxu1  ;;  %3267 = vmatprep.subr.bf16.mxu1 %v5568_v52  ;;  %v5613_v52 = vld [vmem:[#allocation13 + $0x1c0] sm:$0xff]  }
0x11ad   :  { %5372 = vrot.lane.b32.xlu1 %v5371_v59, %s6287_s1  ;;  %v5569_v59 = vld [vmem:[#allocation10 + $0x148] ss:$16 sps:$4 sm:$0xff]   ;;  %v5574_v62 = vld [vmem:[#allocation10 + $0x124] ss:$16 sps:$4 sm:$0xff]   ;;  %3268 = vmatpush1.bf16.msra.mxu1 %v5566_v57 }
0x11ae   :  { %3269 = vmatprep.subr.bf16.mxu1 %v5574_v62  ;;  %v5615_v57 = vld [vmem:[#allocation13 + $0x180] sm:$0xff]  }
0x120f   :  { %v5363_v63 = vpop.permute.xlu1 %5362 }
0x1210   :  { %v5365_v2 = vunpack.i.h.bf16 %v5363_v63  ;;  %v5364_v3 = vunpack.i.l.bf16 %v5363_v63  ;;  %v5577_v63 = vld [vmem:[#allocation10 + $0x12c] ss:$16 sps:$4 sm:$0xff]  }
0x1212   :  { %v2876_v8 = vsel %vm639_vm1, %v6986_v1, %v5365_v2  ;;  %v2875_v9 = vsel %vm639_vm1, %v6984_v60, %v5364_v3  ;;  %v4756_v1 = vld [vmem:[%s7258_s2 + $0x1] ss:$0 sm:$0xff]  ;;  %v5580_v3 = vld [vmem:[#allocation10 + $0x104] ss:$16 sps:$4 sm:$0xff]  }
0x1213   :  { %v5575_v2 = vld [vmem:[#allocation10 + $0x128] ss:$16 sps:$4 sm:$0xff]  }
0x1217   :  { %v5368_v0 = vpop.permute.xlu0 %5367 }
0x1218   :  { %v5370_v20 = vunpack.i.h.bf16 %v5368_v0  ;;  %v5369_v21 = vunpack.i.l.bf16 %v5368_v0  ;;  %v5572_v0 = vld [vmem:[#allocation10 + $0x120] ss:$16 sps:$4 sm:$0xff]  }
0x1219   :  { %3270 = vmatpush1.bf16.msra.mxu1 %v5572_v0 }
0x121a   :  { %v2878_v14 = vsel %vm1163_vm3, %v2876_v8, %v5370_v20  ;;  %v2877_v15 = vsel %vm1163_vm3, %v2875_v9, %v5369_v21  ;;  %v5583_v20 = vld [vmem:[#allocation10 + $0x10c] ss:$16 sps:$4 sm:$0xff]   ;;  %v5578_v21 = vld [vmem:[#allocation10 + $0x100] ss:$16 sps:$4 sm:$0xff]   ;;  %3271 = vmatprep.subr.bf16.mxu1 %v5580_v3 }
0x121d   :  { %3272 = vmatpush1.bf16.msra.mxu1 %v5578_v21 }
0x121f   :  { %v5373_v7 = vpop.permute.xlu1 %5372 }
0x1220   :  { %v5375_v54 = vunpack.i.h.bf16 %v5373_v7  ;;  %v5374_v12 = vunpack.i.l.bf16 %v5373_v7  ;;  %v5581_v7 = vld [vmem:[#allocation10 + $0x108] ss:$16 sps:$4 sm:$0xff]  }
0x1222   :  { %v2880_v13 = vsel %vm1166_vm4, %v2878_v14, %v5375_v54  ;;  %v2879_v17 = vsel %vm1166_vm4, %v2877_v15, %v5374_v12 }
0x1223   :  { %v2898_v22 = vpack.c.bf16 %v2880_v13, %v2879_v17 }
0x1225   :  { %5251 = vmatmul.mubr.bf16.vlgmr.msra.gmra.mxu0 %v2898_v22  ;;  %v4765_v22 = vld [vmem:[#allocation7 + $0x1] ss:$0 sm:$0xff] }
0x1226   :  { %3332 = vmatprep.mubr.bf16.mxu0 %v6285_v27  ;;  %3301 = vmatpush1.bf16.msra.mxu0 %v5539_v10  ;;  %v5587_v10 = vld [vmem:[#allocation13 + $0x1b8] sm:$0xff]  }
0x1227   :  { %3302 = vmatprep.subr.bf16.mxu0 %v5547_v41  ;;  %v5600_v41 = vld [vmem:[#allocation13 + $0x158] sm:$0xff]  }
0x122a   :  { %3303 = vmatpush1.bf16.msra.mxu0 %v5545_v31  ;;  %v5599_v31 = vld [vmem:[#allocation13 + $0x1a0] sm:$0xff]  }
0x122b   :  { %3304 = vmatprep.subr.bf16.mxu0 %v5553_v6  ;;  %v5604_v6 = vld [vmem:[#allocation13 + $0x150] sm:$0xff]  }
0x122e   :  { %3305 = vmatpush1.bf16.msra.mxu0 %v5551_v11  ;;  %v5603_v11 = vld [vmem:[#allocation13 + $0x198] sm:$0xff]  }
0x122f   :  { %3306 = vmatprep.subr.bf16.mxu0 %v5559_v42  ;;  %v5606_v42 = vld [vmem:[#allocation13 + $0x110] sm:$0xff]  }
0x1232   :  { %3307 = vmatpush1.bf16.msra.mxu0 %v5557_v23  ;;  %v5608_v23 = vld [vmem:[#allocation13 + $0x148] sm:$0xff]  }
0x1233   :  { %3308 = vmatprep.subr.bf16.mxu0 %v5565_v45  ;;  %v5610_v45 = vld [vmem:[#allocation13 + $0x108] sm:$0xff]  }
0x1236   :  { %3309 = vmatpush1.bf16.msra.mxu0 %v5563_v49  ;;  %v5612_v49 = vld [vmem:[#allocation13 + $0x140] sm:$0xff]  }
0x1237   :  { %3310 = vmatprep.subr.bf16.mxu0 %v5571_v53  ;;  %v5614_v53 = vld [vmem:[#allocation13 + $0x100] sm:$0xff]  }
0x123a   :  { %3311 = vmatpush1.bf16.msra.mxu0 %v5569_v59  ;;  %v3075_v59 = vld [vmem:[#allocation11 + $0x4] sm:$0xf] }
0x123b   :  { %3312 = vmatprep.subr.bf16.mxu0 %v5577_v63  ;;  %v3080_v62 = vrot.slane %v3075_v59, %v6636_v55  ;;  %v3088_v63 = vrot.slane %v3075_v59, %v6639_v56  ;;  %v3084_v0 = vrot.slane %v3075_v59, %v6645_v58 }
0x123e   :  { %3313 = vmatpush1.bf16.msra.mxu0 %v5575_v2  ;;  %v3092_v2 = vrot.slane %v3075_v59, %v6789_v61 }
0x123f   :  { %3314 = vmatprep.subr.bf16.mxu0 %v5583_v20 }
0x1242   :  { %3315 = vmatpush1.bf16.msra.mxu0 %v5581_v7 }
0x1243   :  { %5029 = vmatprep.subr.bf16.mxu0 %v5585_v33 }
0x12e5   :  { %v2989_v24 = vpop.f32.mrf.mxu0 }
0x12e6   :  { %v2990_v60 = vadd.f32 %v4756_v1, %v2989_v24 }
0x12e7   :  { %v5252_v16 = vpop.f32.mrf.mxu0 }
0x12e8   :  { %v2996_v25 = vadd.f32 %v2990_v60, %v6919_v46  ;;  %v4766_v16 = vld [vmem:[#allocation8 + $0x1] ss:$0 sm:$0xff] }
0x12e9   :  { %v2992_v26 = vpop.f32.mrf.mxu0 }
0x12ea   :  { %v2993_v28 = vadd.f32 %v4756_v1, %v2992_v26  ;;  %3002 = vadd.xlane.f32.xlu0 %v2996_v25 }
0x12eb   :  { %v5253_v29 = vpop.f32.mrf.mxu0 }
0x12ec   :  { %v2997_v32 = vadd.f32 %v2993_v28, %v6921_v47 }
0x12ee   :  { %3004 = vadd.xlane.f32.xlu1 %v2997_v32 }
0x1373   :  { %v3003_v35 = vpop.xlane.xlu0 %3002 }
0x1374   :  { %v3006_v5 = vmul.f32 0.0078125, %v3003_v35  ;;  %v5589_v35 = vld [vmem:[#allocation13 + $0x1f0] sm:$0xff]  }
0x1376   :  { %v7070_v36 = vsub.f32 %v2996_v25, %v3006_v5  ;;  %v5590_v5 = vld [vmem:[#allocation13 + $0x130] sm:$0xff]  }
0x1377   :  { %v3005_v46 = vpop.xlane.xlu1 %3004 }
0x1378   :  { %v3007_v37 = vmul.f32 0.0078125, %v3005_v46  ;;  %v3010_v18 = vmul.f32 %v7070_v36, %v7070_v36  ;;  %v5592_v46 = vld [vmem:[#allocation13 + $0x168] sm:$0xff]  }
0x137a   :  { %v7074_v38 = vsub.f32 %v2997_v32, %v3007_v37  ;;  %3012 = vadd.xlane.f32.xlu0 %v3010_v18  ;;  %v5584_v32 = vld [vmem:[#allocation13 + $0x178] sm:$0xff]   ;;  %v5593_v37 = vld [vmem:[#allocation13 + $0x1e8] sm:$0xff]  }
0x137b   :  { %5007 = vmatprep.subr.bf16.mxu1 %v5584_v32  ;;  %v5594_v18 = vld [vmem:[#allocation13 + $0x128] sm:$0xff]  }
0x137c   :  { %v3011_v47 = vmul.f32 %v7074_v38, %v7074_v38 }
0x137e   :  { %3014 = vadd.xlane.f32.xlu0 %v3011_v47  ;;  %v5596_v47 = vld [vmem:[#allocation13 + $0x160] sm:$0xff]  }
0x1403   :  { %v3013_v8 = vpop.xlane.xlu0 %3012 }
0x1404   :  { %v3016_v9 = vmul.f32 0.0078125, %v3013_v8 }
0x1406   :  { %v3018_v54 = vadd.f32 1e-12, %v3016_v9 }
0x1407   :  { %v3015_v12 = vpop.xlane.xlu0 %3014 }
0x1408   :  { %5780 = vrsqrt.f32 %v3018_v54  ;;  %v3017_v14 = vmul.f32 0.0078125, %v3015_v12 }
0x140a   :  { %v3019_v15 = vadd.f32 1e-12, %v3017_v14 }
0x140c   :  { %5782 = vrsqrt.f32 %v3019_v15 }
0x1415   :  { %v5781_v13 = vpop.eup %5780 }
0x1416   :  { %v3022_v17 = vmul.f32 %v5781_v13, %v7070_v36  ;;  %v5591_v36 = vld [vmem:[#allocation13 + $0x1b0] sm:$0xff]  }
0x1418   :  { %v3030_v60 = vmul.f32 %v4765_v22, %v3022_v17 }
0x1419   :  { %v5783_v1 = vpop.eup %5782 }
0x141a   :  { %v3023_v24 = vmul.f32 %v5783_v1, %v7074_v38  ;;  %v7080_v26 = vadd.f32 %v4766_v16, %v3030_v60  ;;  %v5595_v38 = vld [vmem:[#allocation13 + $0x1a8] sm:$0xff]  }
0x141c   :  { %v3031_v25 = vmul.f32 %v4765_v22, %v3023_v24 }
0x141e   :  { %v7082_v28 = vadd.f32 %v4766_v16, %v3031_v25 }
0x1420   :  { %v3073_v29 = vpack.c.bf16 %v7082_v28, %v7080_v26 }
0x1422   :  { %3290 = vmatmul.mubr.bf16.vlgmr.msra.gmra.mxu1 %v3073_v29  ;;  %3333 = vmatmul.mubr.bf16.vlgmr.msra.gmra.mxu0 %v3073_v29 }
0x1423   :  { %5008 = vmatpush3.bf16.msra.mxu1 %v5586_v34  ;;  %5030 = vmatpush3.bf16.msra.mxu0 %v5587_v10 }
0x1424   :  { %5009 = vmatprep.subr.bf16.mxu1 %v5588_v51  ;;  %5031 = vmatprep.subr.bf16.mxu0 %v5589_v35 }
0x1427   :  { %5010 = vmatpush3.bf16.msra.mxu1 %v5590_v5  ;;  %5032 = vmatpush3.bf16.msra.mxu0 %v5591_v36 }
0x1428   :  { %5011 = vmatprep.subr.bf16.mxu1 %v5592_v46  ;;  %5033 = vmatprep.subr.bf16.mxu0 %v5593_v37 }
0x142b   :  { %5012 = vmatpush3.bf16.msra.mxu1 %v5594_v18  ;;  %5034 = vmatpush3.bf16.msra.mxu0 %v5595_v38 }
0x142c   :  { %5013 = vmatprep.subr.bf16.mxu1 %v5596_v47  ;;  %5035 = vmatprep.subr.bf16.mxu0 %v5597_v39 }
0x142f   :  { %5014 = vmatpush3.bf16.msra.mxu1 %v5598_v40  ;;  %5036 = vmatpush3.bf16.msra.mxu0 %v5599_v31 }
0x1430   :  { %5015 = vmatprep.subr.bf16.mxu1 %v5600_v41  ;;  %5037 = vmatprep.subr.bf16.mxu0 %v5601_v30 }
0x1433   :  { %5016 = vmatpush3.bf16.msra.mxu1 %v5602_v19  ;;  %5038 = vmatpush3.bf16.msra.mxu0 %v5603_v11 }
0x1434   :  { %5017 = vmatprep.subr.bf16.mxu1 %v5604_v6  ;;  %5039 = vmatprep.subr.bf16.mxu0 %v5605_v50 }
0x1437   :  { %5018 = vmatpush3.bf16.msra.mxu1 %v5606_v42  ;;  %5040 = vmatpush3.bf16.msra.mxu0 %v5607_v43 }
0x1438   :  { %5019 = vmatprep.subr.bf16.mxu1 %v5608_v23  ;;  %5041 = vmatprep.subr.bf16.mxu0 %v5609_v44 }
0x143b   :  { %5020 = vmatpush3.bf16.msra.mxu1 %v5610_v45  ;;  %5042 = vmatpush3.bf16.msra.mxu0 %v5611_v48 }
0x143c   :  { %5021 = vmatprep.subr.bf16.mxu1 %v5612_v49  ;;  %5043 = vmatprep.subr.bf16.mxu0 %v5613_v52 }
0x143f   :  { %5022 = vmatpush3.bf16.msra.mxu1 %v5614_v53  ;;  %5044 = vmatpush3.bf16.msra.mxu0 %v5615_v57 }
0x1440   :  { %5254 = vmatprep.subr.bf16.mxu1 %v6284_v4 }
0x14e2   :  { %v3291_v3 = vpop.f32.mrf.mxu1  ;;  %v3334_v20 = vpop.f32.mrf.mxu0 }
0x14e3   :  { %v7091_v21 = vadd.f32 %v3291_v3, %v3080_v62  ;;  %v7093_v7 = vadd.f32 %v3334_v20, %v3088_v63 }
0x14e4   :  { %v3293_v8 = vpop.f32.mrf.mxu1  ;;  %v3336_v9 = vpop.f32.mrf.mxu0 }
0x14e5   :  { %v3351_v54 = vmul.f32 0.044715, %v7091_v21  ;;  %v3353_v12 = vmul.f32 0.044715, %v7093_v7  ;;  %v3294_v14 = vadd.f32 %v3293_v8, %v3084_v0  ;;  %v7097_v15 = vadd.f32 %v3336_v9, %v3092_v2 }
0x14e6   :  { %v3295_v13 = vpop.f32.mrf.mxu1  ;;  %v3338_v17 = vpop.f32.mrf.mxu0 }
0x14e7   :  { %v3359_v22 = vmul.f32 %v3351_v54, %v7091_v21  ;;  %v3361_v1 = vmul.f32 %v3353_v12, %v7093_v7  ;;  %v3352_v24 = vmul.f32 0.044715, %v3294_v14  ;;  %v3354_v60 = vmul.f32 0.044715, %v7097_v15 }
0x14e8   :  { %v3296_v16 = vadd.f32 %v3295_v13, %v3080_v62  ;;  %v7102_v25 = vadd.f32 %v3338_v17, %v3088_v63  ;;  %v3297_v29 = vpop.f32.mrf.mxu1  ;;  %v3340_v32 = vpop.f32.mrf.mxu0  ;;  %v3344_v13 = vmul.f32 0.5, %v3294_v14 }
0x14e9   :  { %v3367_v33 = vmul.f32 %v3359_v22, %v7091_v21  ;;  %v3369_v34 = vmul.f32 %v3361_v1, %v7093_v7  ;;  %v3360_v10 = vmul.f32 %v3352_v24, %v3294_v14  ;;  %v3362_v51 = vmul.f32 %v3354_v60, %v7097_v15 }
0x14ea   :  { %v3355_v35 = vmul.f32 0.044715, %v3296_v16  ;;  %v3357_v5 = vmul.f32 0.044715, %v7102_v25  ;;  %v3298_v36 = vadd.f32 %v3297_v29, %v3084_v0  ;;  %v3341_v46 = vadd.f32 %v3340_v32, %v3092_v2 }
0x14eb   :  { %v3375_v37 = vadd.f32 %v3367_v33, %v7091_v21  ;;  %v3377_v18 = vadd.f32 %v3369_v34, %v7093_v7  ;;  %v3368_v38 = vmul.f32 %v3360_v10, %v3294_v14  ;;  %v3370_v47 = vmul.f32 %v3362_v51, %v7097_v15 }
0x14ec   :  { %v3363_v39 = vmul.f32 %v3355_v35, %v3296_v16  ;;  %v3365_v40 = vmul.f32 %v3357_v5, %v7102_v25  ;;  %v3356_v31 = vmul.f32 0.044715, %v3298_v36  ;;  %v3358_v41 = vmul.f32 0.044715, %v3341_v46 }
0x14ed   :  { %v3383_v30 = vmul.f32 0.7978846, %v3375_v37  ;;  %v3385_v19 = vmul.f32 0.7978846, %v3377_v18  ;;  %v3376_v11 = vadd.f32 %v3368_v38, %v3294_v14  ;;  %v3378_v44 = vadd.f32 %v3370_v47, %v7097_v15 }
0x14ee   :  { %v3371_v6 = vmul.f32 %v3363_v39, %v3296_v16  ;;  %v3373_v50 = vmul.f32 %v3365_v40, %v7102_v25  ;;  %v3364_v42 = vmul.f32 %v3356_v31, %v3298_v36  ;;  %v3366_v43 = vmul.f32 %v3358_v41, %v3341_v46 }
0x14ef   :  { %v3384_v23 = vmul.f32 0.7978846, %v3376_v11  ;;  %5784 = vtanh.f32 %v3383_v30  ;;  %v3386_v53 = vmul.f32 0.7978846, %v3378_v44  ;;  %v3343_v22 = vmul.f32 0.5, %v7091_v21 }
0x14f0   :  { %v3379_v45 = vadd.f32 %v3371_v6, %v3296_v16  ;;  %v3381_v48 = vadd.f32 %v3373_v50, %v7102_v25  ;;  %v3372_v49 = vmul.f32 %v3364_v42, %v3298_v36  ;;  %5786 = vtanh.f32 %v3385_v19 }
0x14f1   :  { %v3374_v52 = vmul.f32 %v3366_v43, %v3341_v46  ;;  %5788 = vtanh.f32 %v3384_v23  ;;  %v3347_v29 = vmul.f32 0.5, %v3296_v16  ;;  %v3348_v10 = vmul.f32 0.5, %v3298_v36 }
0x14f2   :  { %v3387_v57 = vmul.f32 0.7978846, %v3379_v45  ;;  %v3389_v59 = vmul.f32 0.7978846, %v3381_v48  ;;  %v3380_v62 = vadd.f32 %v3372_v49, %v3298_v36  ;;  %5790 = vtanh.f32 %v3386_v53 }
0x14f3   :  { %v3382_v63 = vadd.f32 %v3374_v52, %v3341_v46  ;;  %v3349_v35 = vmul.f32 0.5, %v7102_v25  ;;  %v3346_v37 = vmul.f32 0.5, %v7097_v15  ;;  %v3350_v18 = vmul.f32 0.5, %v3341_v46  ;;  %v4799_v46 = vld [vmem:[#allocation14 + $0x1] ss:$0 sm:$0xff] }
0x14f4   :  { %5792 = vtanh.f32 %v3387_v57  ;;  %v3388_v0 = vmul.f32 0.7978846, %v3380_v62  ;;  %v3345_v21 = vmul.f32 0.5, %v7093_v7 }
0x14f5   :  { %5794 = vtanh.f32 %v3389_v59  ;;  %v3390_v2 = vmul.f32 0.7978846, %v3382_v63 }
0x14f6   :  { %5796 = vtanh.f32 %v3388_v0 }
0x14f7   :  { %5798 = vtanh.f32 %v3390_v2  ;;  %v5616_v2 = vld [vmem:[#allocation23 + $0x38] sm:$0xff]  }
0x14fc   :  { %v5785_v3 = vpop.eup %5784 }
0x14fd   :  { %v5787_v20 = vpop.eup %5786  ;;  %v3399_v32 = vadd.f32 1.0, %v5785_v3 }
0x14fe   :  { %v5789_v8 = vpop.eup %5788  ;;  %v3401_v5 = vadd.f32 1.0, %v5787_v20 }
0x14ff   :  { %v5791_v9 = vpop.eup %5790  ;;  %v3400_v17 = vadd.f32 1.0, %v5789_v8  ;;  %v3407_v41 = vmul.f32 %v3399_v32, %v3343_v22  ;;  %v5619_v22 = vld [vmem:[#allocation23 + $0x20] sm:$0xff]  }
0x1500   :  { %v3402_v60 = vadd.f32 1.0, %v5791_v9  ;;  %v3409_v19 = vmul.f32 %v3401_v5, %v3345_v21 }
0x1501   :  { %v5793_v54 = vpop.eup %5792  ;;  %v3408_v47 = vmul.f32 %v3400_v17, %v3344_v13 }
0x1502   :  { %v5795_v12 = vpop.eup %5794  ;;  %v3403_v1 = vadd.f32 1.0, %v5793_v54  ;;  %v3410_v31 = vmul.f32 %v3402_v60, %v3346_v37  ;;  %v5622_v60 = vld [vmem:[#allocation23 + $0x8] sm:$0xff]  }
0x1503   :  { %v5797_v24 = vpop.eup %5796  ;;  %v3405_v33 = vadd.f32 1.0, %v5795_v12 }
0x1504   :  { %v5799_v34 = vpop.eup %5798  ;;  %v3404_v51 = vadd.f32 1.0, %v5797_v24  ;;  %v3411_v14 = vmul.f32 %v3403_v1, %v3347_v29  ;;  %v5620_v1 = vld [vmem:[#allocation23 + $0x18] sm:$0xff]   ;;  %v5621_v24 = vld [vmem:[#allocation23 + $0x10] sm:$0xff]   ;;  %v5623_v29 = vld [vmem:[#allocation23] sm:$0xff]  }
0x1505   :  { %v3406_v38 = vadd.f32 1.0, %v5799_v34  ;;  %v3413_v40 = vmul.f32 %v3405_v33, %v3349_v35 }
0x1506   :  { %v3412_v39 = vmul.f32 %v3404_v51, %v3348_v10  ;;  %v3480_v11 = vpack.c.bf16 %v3411_v14, %v3407_v41 }
0x1507   :  { %v3414_v16 = vmul.f32 %v3406_v38, %v3350_v18  ;;  %v3482_v25 = vpack.c.bf16 %v3413_v40, %v3409_v19  ;;  %v4832_v18 = vld [vmem:[#allocation16 + $0x1] ss:$0 sm:$0xff]  ;;  %v4834_v19 = vld [vmem:[#allocation25] ss:$0 sm:$0xff] }
0x1508   :  { %v3481_v30 = vpack.c.bf16 %v3412_v39, %v3408_v47  ;;  %v4833_v39 = vld [vmem:[#allocation17 + $0x1] ss:$0 sm:$0xff] }
0x1509   :  { %v3483_v36 = vpack.c.bf16 %v3414_v16, %v3410_v31 }
0x150a   :  { %3716 = vmatprep.mubr.bf16.mxu1 %v3481_v30 }
0x150b   :  { %3757 = vmatprep.mubr.bf16.mxu0 %v3483_v36  ;;  %3717 = vmatmul.mubr.bf16.vlgmr.msra.gmra.mxu1 %v3480_v11 }
0x150c   :  { %3758 = vmatmul.mubr.bf16.vlgmr.msra.gmra.mxu0 %v3482_v25  ;;  %5270 = vmatprep.mubr.msk.bf16.mxu1 %vm6286_vm0, %v6284_v4 }
0x150d   :  { %4228 = vmatprep.mubr.bf16.mxu0 %v6285_v27  ;;  %5255 = vmatpush3.bf16.msra.mxu1 %v5616_v2 }
0x150e   :  { %5256 = vmatprep.subr.bf16.mxu1 %v6284_v4 }
0x15cb   :  { %v5023_v15 = vpop.f32.mrf.mxu1 }
0x15cc   :  { %v5045_v7 = vpop.f32.mrf.mxu0 }
0x15cd   :  { %v5024_v6 = vpop.f32.mrf.mxu1 }
0x15ce   :  { %v5025_v50 = vadd.f32 %v5024_v6, %v5023_v15  ;;  %v5046_v42 = vpop.f32.mrf.mxu0 }
0x15cf   :  { %v5026_v43 = vpop.f32.mrf.mxu1  ;;  %v5047_v44 = vadd.f32 %v5046_v42, %v5045_v7 }
0x15d0   :  { %v3719_v23 = vadd.f32 %v5025_v50, %v4799_v46  ;;  %v5048_v45 = vpop.f32.mrf.mxu0 }
0x15d1   :  { %v5027_v48 = vpop.f32.mrf.mxu1 }
0x15d2   :  { %v3760_v49 = vadd.f32 %v5047_v44, %v3719_v23  ;;  %v5028_v52 = vadd.f32 %v5027_v48, %v5026_v43  ;;  %v5049_v53 = vpop.f32.mrf.mxu0 }
0x15d3   :  { %v5050_v59 = vadd.f32 %v5049_v53, %v5048_v45 }
0x15d4   :  { %v3722_v57 = vadd.f32 %v5028_v52, %v4799_v46  ;;  %v3766_v62 = vadd.f32 %v3760_v49, %v7080_v26  ;;  %v5617_v26 = vld [vmem:[#allocation23 + $0x30] sm:$0xff]  }
0x15d5   :  { %5257 = vmatpush3.bf16.msra.mxu1 %v5617_v26 }
0x15d6   :  { %v3763_v63 = vadd.f32 %v5050_v59, %v3722_v57  ;;  %3772 = vadd.xlane.f32.xlu0 %v3766_v62  ;;  %5258 = vmatprep.subr.bf16.mxu1 %v6284_v4 }
0x15d8   :  { %v3767_v0 = vadd.f32 %v3763_v63, %v7082_v28  ;;  %v5618_v28 = vld [vmem:[#allocation23 + $0x28] sm:$0xff]  }
0x15d9   :  { %5259 = vmatpush3.bf16.msra.mxu1 %v5618_v28 }
0x15da   :  { %3774 = vadd.xlane.f32.xlu1 %v3767_v0  ;;  %5260 = vmatprep.subr.bf16.mxu1 %v6284_v4 }
0x15dd   :  { %5261 = vmatpush3.bf16.msra.mxu1 %v5619_v22 }
0x15de   :  { %5262 = vmatprep.subr.bf16.mxu1 %v6284_v4 }
0x15e1   :  { %5263 = vmatpush3.bf16.msra.mxu1 %v5620_v1 }
0x15e2   :  { %5264 = vmatprep.subr.bf16.mxu1 %v6284_v4 }
0x15e5   :  { %5265 = vmatpush3.bf16.msra.mxu1 %v5621_v24  ;;  %v5630_v24 = vld [vmem:[#allocation29 + $0xc0] ss:$16 sps:$4 sm:$0xff]  }
0x15e6   :  { %5266 = vmatprep.subr.bf16.mxu1 %v6284_v4 }
0x15e9   :  { %5267 = vmatpush3.bf16.msra.mxu1 %v5622_v60  ;;  %v5632_v60 = vld [vmem:[#allocation29 + $0xc4] ss:$16 sps:$4 sm:$0xff]  }
0x15ea   :  { %5268 = vmatprep.subr.bf16.mxu1 %v6284_v4 }
0x15ed   :  { %5269 = vmatpush3.bf16.msra.mxu1 %v5623_v29  ;;  %v5633_v29 = vld [vmem:[#allocation29 + $0xc8] ss:$16 sps:$4 sm:$0xff]  }
0x165f   :  { %v3773_v3 = vpop.xlane.xlu0 %3772 }
0x1660   :  { %v3776_v20 = vmul.f32 0.0078125, %v3773_v3  ;;  %v5624_v3 = vld [vmem:[#allocation29 + $0xe0] ss:$16 sps:$4 sm:$0xff]  }
0x1662   :  { %v3778_v8 = vsub.f32 %v3766_v62, %v3776_v20  ;;  %v5626_v20 = vld [vmem:[#allocation29 + $0xe4] ss:$16 sps:$4 sm:$0xff]  }
0x1663   :  { %v3775_v9 = vpop.xlane.xlu1 %3774  ;;  %4196 = vmatprep.subr.bf16.mxu0 %v5626_v20  ;;  %v5674_v20 = vld [vmem:[#allocation19 + $0x28] sm:$0xff]  }
0x1664   :  { %v3777_v54 = vmul.f32 0.0078125, %v3775_v9  ;;  %v3780_v12 = vmul.f32 %v3778_v8, %v3778_v8  ;;  %v5629_v9 = vld [vmem:[#allocation29 + $0xec] ss:$16 sps:$4 sm:$0xff]   ;;  %4197 = vmatpush1.bf16.msra.mxu0 %v5624_v3 }
0x1665   :  { %4239 = vmatprep.subr.bf16.mxu1 %v5629_v9  ;;  %4198 = vmatprep.subr.bf16.mxu0 %v5632_v60  ;;  %v5673_v3 = vld [vmem:[#allocation19 + $0x30] sm:$0xff]   ;;  %v5676_v9 = vld [vmem:[#allocation19 + $0x18] sm:$0xff]  }
0x1666   :  { %v3779_v13 = vsub.f32 %v3767_v0, %v3777_v54  ;;  %3782 = vadd.xlane.f32.xlu0 %v3780_v12  ;;  %v5686_v60 = vld [vmem:[%s7219_s18 + $0x8] sm:$0xff]  }
0x1668   :  { %v3781_v17 = vmul.f32 %v3779_v13, %v3779_v13  ;;  %4199 = vmatpush1.bf16.msra.mxu0 %v5630_v24  ;;  %v5685_v24 = vld [vmem:[%s7219_s18 + $0x10] sm:$0xff]  }
0x166a   :  { %3784 = vadd.xlane.f32.xlu1 %v3781_v17 }
0x16ef   :  { %v3783_v32 = vpop.xlane.xlu0 %3782 }
0x16f0   :  { %v3786_v33 = vmul.f32 0.0078125, %v3783_v32  ;;  %v5635_v32 = vld [vmem:[#allocation29 + $0xcc] ss:$16 sps:$4 sm:$0xff]  }
0x16f2   :  { %v3788_v34 = vadd.f32 1e-12, %v3786_v33  ;;  %v5636_v33 = vld [vmem:[#allocation29 + $0xa0] ss:$16 sps:$4 sm:$0xff]  }
0x16f3   :  { %v3785_v10 = vpop.xlane.xlu1 %3784 }
0x16f4   :  { %5800 = vrsqrt.f32 %v3788_v34  ;;  %v3787_v51 = vmul.f32 0.0078125, %v3785_v10  ;;  %v5638_v34 = vld [vmem:[#allocation29 + $0xa4] ss:$16 sps:$4 sm:$0xff]   ;;  %v5639_v10 = vld [vmem:[#allocation29 + $0xa8] ss:$16 sps:$4 sm:$0xff]  }
0x16f5   :  { %4200 = vmatprep.subr.bf16.mxu0 %v5638_v34 }
0x16f6   :  { %v3789_v35 = vadd.f32 1e-12, %v3787_v51  ;;  %v5641_v51 = vld [vmem:[#allocation29 + $0xac] ss:$16 sps:$4 sm:$0xff]   ;;  %4201 = vmatpush1.bf16.msra.mxu0 %v5636_v33 }
0x16f8   :  { %5802 = vrsqrt.f32 %v3789_v35  ;;  %v5644_v35 = vld [vmem:[#allocation29 + $0x84] ss:$16 sps:$4 sm:$0xff]  }
0x16f9   :  { %4202 = vmatprep.subr.bf16.mxu0 %v5644_v35 }
0x1701   :  { %v5801_v5 = vpop.eup %5800 }
0x1702   :  { %v3792_v37 = vmul.f32 %v5801_v5, %v3778_v8  ;;  %v5627_v8 = vld [vmem:[#allocation29 + $0xe8] ss:$16 sps:$4 sm:$0xff]   ;;  %v5647_v5 = vld [vmem:[#allocation29 + $0x8c] ss:$16 sps:$4 sm:$0xff]  }
0x1704   :  { %v3800_v47 = vmul.f32 %v4832_v18, %v3792_v37  ;;  %v5642_v37 = vld [vmem:[#allocation29 + $0x80] ss:$16 sps:$4 sm:$0xff]  }
0x1705   :  { %v5803_v38 = vpop.eup %5802  ;;  %4203 = vmatpush1.bf16.msra.mxu0 %v5642_v37 }
0x1706   :  { %v3793_v14 = vmul.f32 %v5803_v38, %v3779_v13  ;;  %v3808_v40 = vadd.f32 %v4833_v39, %v3800_v47  ;;  %v5650_v38 = vld [vmem:[#allocation29 + $0x64] ss:$16 sps:$4 sm:$0xff]   ;;  %v5648_v47 = vld [vmem:[#allocation29 + $0x60] ss:$16 sps:$4 sm:$0xff]  }
0x1707   :  { %4204 = vmatprep.subr.bf16.mxu0 %v5650_v38 }
0x1708   :  { %v3801_v21 = vmul.f32 %v4832_v18, %v3793_v14  ;;  %v5645_v18 = vld [vmem:[#allocation29 + $0x88] ss:$16 sps:$4 sm:$0xff]   ;;  %v5653_v14 = vld [vmem:[#allocation29 + $0x6c] ss:$16 sps:$4 sm:$0xff]  }
0x1709   :  { %4205 = vmatpush1.bf16.msra.mxu0 %v5648_v47 }
0x170a   :  { %v3809_v31 = vadd.f32 %v4833_v39, %v3801_v21  ;;  %v5651_v39 = vld [vmem:[#allocation29 + $0x68] ss:$16 sps:$4 sm:$0xff]   ;;  %v5656_v21 = vld [vmem:[#allocation29 + $0x44] ss:$16 sps:$4 sm:$0xff]  }
0x170b   :  { %4206 = vmatprep.subr.bf16.mxu0 %v5656_v21 }
0x170c   :  { %v3826_v16 = vpack.c.bf16 %v3809_v31, %v3808_v40  ;;  %v4291_v41 = vrot.slane %v3809_v31, 7  ;;  %v5654_v31 = vld [vmem:[#allocation29 + $0x40] ss:$16 sps:$4 sm:$0xff]  }
0x170d   :  { %4207 = vmatpush1.bf16.msra.mxu0 %v5654_v31 }
0x170e   :  { %5271 = vmatmul.mubr.bf16.vlgmr.msra.gmra.mxu1 %v3826_v16  ;;  %v7131_v30 = vsel %vm4293_vm5, %v3808_v40, %v4291_v41  ;;  %v5659_v40 = vld [vmem:[#allocation29 + $0x4c] ss:$16 sps:$4 sm:$0xff]   ;;  %v5657_v16 = vld [vmem:[#allocation29 + $0x48] ss:$16 sps:$4 sm:$0xff]   ;;  %v5662_v41 = vld [vmem:[#allocation29 + $0x24] ss:$16 sps:$4 sm:$0xff]  }
0x170f   :  { %4271 = vmatprep.mubr.bf16.mxu1 %v6285_v27  ;;  %4240 = vmatpush1.bf16.msra.mxu1 %v5627_v8  ;;  %v5675_v8 = vld [vmem:[#allocation19 + $0x20] sm:$0xff]  }
0x1710   :  { %4241 = vmatprep.subr.bf16.mxu1 %v5635_v32  ;;  %4208 = vmatprep.subr.bf16.mxu0 %v5662_v41  ;;  %v4014_v32 = vld [vmem:[#allocation31] sm:$0xf] }
0x1711   :  { %v4019_v33 = vrot.slane %v4014_v32, %v6636_v55  ;;  %v4027_v34 = vrot.slane %v4014_v32, %v6639_v56 }
0x1713   :  { %4242 = vmatpush1.bf16.msra.mxu1 %v5633_v29  ;;  %v5687_v29 = vld [vmem:[%s7219_s18] sm:$0xff]  }
0x1714   :  { %4243 = vmatprep.subr.bf16.mxu1 %v5641_v51  ;;  %v4031_v51 = vrot.slane %v4014_v32, %v6789_v61 }
0x1717   :  { %4244 = vmatpush1.bf16.msra.mxu1 %v5639_v10  ;;  %v4023_v10 = vrot.slane %v4014_v32, %v6645_v58 }
0x1718   :  { %4245 = vmatprep.subr.bf16.mxu1 %v5647_v5 }
0x171b   :  { %4246 = vmatpush1.bf16.msra.mxu1 %v5645_v18 }
0x171c   :  { %4247 = vmatprep.subr.bf16.mxu1 %v5653_v14 }
0x171f   :  { %4248 = vmatpush1.bf16.msra.mxu1 %v5651_v39 }
0x1720   :  { %4249 = vmatprep.subr.bf16.mxu1 %v5659_v40 }
0x1723   :  { %4250 = vmatpush1.bf16.msra.mxu1 %v5657_v16  ;;  %v4877_v16 = vld [vmem:[#allocation20] ss:$0 sm:$0xff] }
0x17ce   :  { %v3916_v36 = vpop.f32.mrf.mxu1 }
0x17cf   :  { %v3917_v11 = vadd.f32 %v4834_v19, %v3916_v36  ;;  %v5660_v36 = vld [vmem:[#allocation29 + $0x20] ss:$16 sps:$4 sm:$0xff]  }
0x17d0   :  { %v5272_v25 = vpop.f32.mrf.mxu1  ;;  %4209 = vmatpush1.bf16.msra.mxu0 %v5660_v36 }
0x17d1   :  { %v3925_v15 = vmul.f32 0.044715, %v3917_v11  ;;  %v3923_v53 = vmul.f32 0.5, %v3917_v11  ;;  %v5668_v25 = vld [vmem:[#allocation29 + $0x4] ss:$16 sps:$4 sm:$0xff]  }
0x17d2   :  { %v3919_v7 = vpop.f32.mrf.mxu1  ;;  %4210 = vmatprep.subr.bf16.mxu0 %v5668_v25 }
0x17d3   :  { %v3920_v46 = vadd.f32 %v4834_v19, %v3919_v7  ;;  %v3927_v6 = vmul.f32 %v3925_v15, %v3917_v11  ;;  %v5665_v19 = vld [vmem:[#allocation29 + $0x2c] ss:$16 sps:$4 sm:$0xff]   ;;  %v5666_v7 = vld [vmem:[#allocation29] ss:$16 sps:$4 sm:$0xff]  }
0x17d4   :  { %v5273_v50 = vpop.f32.mrf.mxu1  ;;  %4251 = vmatprep.subr.bf16.mxu1 %v5665_v19  ;;  %v5671_v15 = vld [vmem:[#allocation29 + $0xc] ss:$16 sps:$4 sm:$0xff]   ;;  %4211 = vmatpush1.bf16.msra.mxu0 %v5666_v7 }
0x17d5   :  { %v3926_v42 = vmul.f32 0.044715, %v3920_v46  ;;  %v3929_v43 = vmul.f32 %v3927_v6, %v3917_v11  ;;  %v3924_v63 = vmul.f32 0.5, %v3920_v46  ;;  %5274 = vmatprep.subr.bf16.mxu0 %v6284_v4 }
0x17d7   :  { %v3931_v23 = vadd.f32 %v3929_v43, %v3917_v11  ;;  %v3928_v44 = vmul.f32 %v3926_v42, %v3920_v46  ;;  %v5663_v11 = vld [vmem:[#allocation29 + $0x28] ss:$16 sps:$4 sm:$0xff]  }
0x17d8   :  { %4252 = vmatpush1.bf16.msra.mxu1 %v5663_v11 }
0x17d9   :  { %v3933_v45 = vmul.f32 0.7978846, %v3931_v23  ;;  %v3930_v48 = vmul.f32 %v3928_v44, %v3920_v46  ;;  %4253 = vmatprep.subr.bf16.mxu1 %v5671_v15 }
0x17db   :  { %5804 = vtanh.f32 %v3933_v45  ;;  %v3932_v49 = vadd.f32 %v3930_v48, %v3920_v46  ;;  %v5669_v46 = vld [vmem:[#allocation29 + $0x8] ss:$16 sps:$4 sm:$0xff]  }
0x17dc   :  { %4254 = vmatpush1.bf16.msra.mxu1 %v5669_v46 }
0x17dd   :  { %v3934_v52 = vmul.f32 0.7978846, %v3932_v49  ;;  %5294 = vmatprep.subr.bf16.mxu1 %v6284_v4  ;;  %v4843_v49 = vld [vmem:[#allocation26] ss:$0 sm:$0xff] }
0x17df   :  { %5806 = vtanh.f32 %v3934_v52 }
0x17e8   :  { %v5805_v27 = vpop.eup %5804 }
0x17e9   :  { %v3937_v57 = vadd.f32 1.0, %v5805_v27 }
0x17eb   :  { %v3939_v59 = vmul.f32 %v3937_v57, %v3923_v53  ;;  %v4844_v57 = vld [vmem:[#allocation28] ss:$0 sm:$0xff] }
0x17ec   :  { %v5807_v62 = vpop.eup %5806 }
0x17ed   :  { %3943 = vadd.xlane.f32.xlu0 %v3939_v59  ;;  %v3938_v0 = vadd.f32 1.0, %v5807_v62 }
0x17ef   :  { %v3940_v2 = vmul.f32 %v3938_v0, %v3924_v63  ;;  %v5672_v0 = vld [vmem:[#allocation19 + $0x38] sm:$0xff]  }
0x17f1   :  { %3945 = vadd.xlane.f32.xlu1 %v3940_v2 }
0x1876   :  { %v3944_v54 = vpop.xlane.xlu0 %3943 }
0x1877   :  { %v3947_v12 = vmul.f32 0.0078125, %v3944_v54  ;;  %v5677_v54 = vld [vmem:[#allocation19 + $0x10] sm:$0xff]  }
0x1879   :  { %v7134_v13 = vsub.f32 %v3939_v59, %v3947_v12  ;;  %v5678_v12 = vld [vmem:[#allocation19 + $0x8] sm:$0xff]  }
0x187a   :  { %v3946_v17 = vpop.xlane.xlu1 %3945 }
0x187b   :  { %v3948_v26 = vmul.f32 0.0078125, %v3946_v17  ;;  %v3951_v28 = vmul.f32 %v7134_v13, %v7134_v13  ;;  %v4311_v17 = vpack.c.bf16 %v7131_v30, %v7131_v30  ;;  %v5683_v30 = vld [vmem:[%s7219_s18 + $0x20] sm:$0xff]  }
0x187d   :  { %v7138_v22 = vsub.f32 %v3940_v2, %v3948_v26  ;;  %3953 = vadd.xlane.f32.xlu0 %v3951_v28  ;;  %v5680_v26 = vld [vmem:[%s7219_s18 + $0x38] sm:$0xff]   ;;  %v5681_v28 = vld [vmem:[%s7219_s18 + $0x30] sm:$0xff]  }
0x187f   :  { %v3952_v1 = vmul.f32 %v7138_v22, %v7138_v22 }
0x1881   :  { %3955 = vadd.xlane.f32.xlu1 %v3952_v1  ;;  %v5684_v1 = vld [vmem:[%s7219_s18 + $0x18] sm:$0xff]  }
0x1906   :  { %v3954_v6 = vpop.xlane.xlu0 %3953 }
0x1907   :  { %v3957_v50 = vmul.f32 0.0078125, %v3954_v6 }
0x1909   :  { %v3959_v42 = vadd.f32 1e-12, %v3957_v50 }
0x190a   :  { %v3956_v43 = vpop.xlane.xlu1 %3955 }
0x190b   :  { %5808 = vrsqrt.f32 %v3959_v42  ;;  %v3958_v23 = vmul.f32 0.0078125, %v3956_v43 }
0x190d   :  { %v3960_v44 = vadd.f32 1e-12, %v3958_v23 }
0x190f   :  { %5810 = vrsqrt.f32 %v3960_v44 }
0x1918   :  { %v5809_v45 = vpop.eup %5808 }
0x1919   :  { %v3963_v48 = vmul.f32 %v5809_v45, %v7134_v13  ;;  %v5679_v13 = vld [vmem:[#allocation19] sm:$0xff]  }
0x191b   :  { %v3971_v53 = vmul.f32 %v4843_v49, %v3963_v48 }
0x191c   :  { %v5811_v52 = vpop.eup %5810 }
0x191d   :  { %v3964_v27 = vmul.f32 %v5811_v52, %v7138_v22  ;;  %v3979_v62 = vadd.f32 %v4844_v57, %v3971_v53  ;;  %v5682_v22 = vld [vmem:[%s7219_s18 + $0x28] sm:$0xff]   ;;  %s6289_s18 = smov [#allocation32]  }
0x191e   :  { %s4527_s12 = sshll.u32 %s6289_s18, 4  ;;  %s4528_s12 = int_to_ptr.vmem [resolvable:$true] %s4527_s12 }
0x191f   :  { %v3972_v59 = vmul.f32 %v4843_v49, %v3964_v27  ;;  %s6196_s14 = scalar_lea.vmem %s4528_s12, 1024  ;;  %p6201_p12 = scmp.lt.s32.totalorder %s4528_s12, %s4528_s12 }
0x1920   :  { %p6197_p11 = scmp.ne.s32.totalorder %s4528_s12, %s6196_s14  ;;  %p6202_p13 = scmp.lt.s32.totalorder %s6196_s14, %s6196_s14 }
0x1921   :  { %v3980_v63 = vadd.f32 %v4844_v57, %v3972_v59 }
0x1922   :  { %p6203_p0 = por %p6202_p13, %p6201_p12 }
0x1923   :  { %v4013_v2 = vpack.c.bf16 %v3980_v63, %v3979_v62 }
0x1924   :  { %p6204_p1 = pnand %p6203_p0, %p6197_p11 }
0x1925   :  { %4229 = vmatmul.mubr.bf16.vlgmr.msra.gmra.mxu0 %v4013_v2  ;;  %4272 = vmatmul.mubr.bf16.vlgmr.msra.gmra.mxu1 %v4013_v2 }
0x1926   :  { %5275 = vmatpush3.bf16.msra.mxu0 %v5672_v0  ;;  %5290 = vmatprep.mubr.msk.bf16.mxu0 %vm6286_vm0, %v6284_v4 }
0x1927   :  { %5276 = vmatprep.subr.bf16.mxu0 %v6284_v4  ;;  %5310 = vmatprep.mubr.msk.bf16.mxu1 %vm6286_vm0, %v6284_v4 }
0x1928   :  { %5295 = vmatpush3.bf16.msra.mxu1 %v5680_v26 }
0x1929   :  { %5296 = vmatprep.subr.bf16.mxu1 %v6284_v4 }
0x192a   :  { %5277 = vmatpush3.bf16.msra.mxu0 %v5673_v3 }
0x192b   :  { %5278 = vmatprep.subr.bf16.mxu0 %v6284_v4 }
0x192c   :  { %5297 = vmatpush3.bf16.msra.mxu1 %v5681_v28 }
0x192d   :  { %5298 = vmatprep.subr.bf16.mxu1 %v6284_v4 }
0x192e   :  { %5279 = vmatpush3.bf16.msra.mxu0 %v5674_v20 }
0x192f   :  { %5280 = vmatprep.subr.bf16.mxu0 %v6284_v4 }
0x1930   :  { %5299 = vmatpush3.bf16.msra.mxu1 %v5682_v22 }
0x1931   :  { %5300 = vmatprep.subr.bf16.mxu1 %v6284_v4 }
0x1932   :  { %5281 = vmatpush3.bf16.msra.mxu0 %v5675_v8 }
0x1933   :  { %5282 = vmatprep.subr.bf16.mxu0 %v6284_v4 }
0x1934   :  { %5301 = vmatpush3.bf16.msra.mxu1 %v5683_v30 }
0x1935   :  { %5302 = vmatprep.subr.bf16.mxu1 %v6284_v4 }
0x1936   :  { %5283 = vmatpush3.bf16.msra.mxu0 %v5676_v9 }
0x1937   :  { %5284 = vmatprep.subr.bf16.mxu0 %v6284_v4 }
0x1938   :  { %5303 = vmatpush3.bf16.msra.mxu1 %v5684_v1 }
0x1939   :  { %5304 = vmatprep.subr.bf16.mxu1 %v6284_v4 }
0x193a   :  { %5285 = vmatpush3.bf16.msra.mxu0 %v5677_v54 }
0x193b   :  { %5286 = vmatprep.subr.bf16.mxu0 %v6284_v4 }
0x193c   :  { %5305 = vmatpush3.bf16.msra.mxu1 %v5685_v24 }
0x193d   :  { %5306 = vmatprep.subr.bf16.mxu1 %v6284_v4 }
0x193e   :  { %5287 = vmatpush3.bf16.msra.mxu0 %v5678_v12 }
0x193f   :  { %5288 = vmatprep.subr.bf16.mxu0 %v6284_v4 }
0x1940   :  { %5307 = vmatpush3.bf16.msra.mxu1 %v5686_v60 }
0x1941   :  { %5308 = vmatprep.subr.bf16.mxu1 %v6284_v4 }
0x1942   :  { %5289 = vmatpush3.bf16.msra.mxu0 %v5679_v13 }
0x1944   :  { %5309 = vmatpush3.bf16.msra.mxu1 %v5687_v29 }
0x1945   :  { %5291 = vmatmul.mubr.bf16.vlgmr.msra.gmra.mxu0 %v4311_v17 }
0x19e5   :  { %v4230_v35 = vpop.f32.mrf.mxu0  ;;  %v4273_v5 = vpop.f32.mrf.mxu1 }
0x19e6   :  { %v4231_v37 = vadd.f32 %v4230_v35, %v4019_v33  ;;  %v4274_v18 = vadd.f32 %v4273_v5, %v4027_v34 }
0x19e7   :  { %v4232_v38 = vpop.f32.mrf.mxu0  ;;  %v4275_v14 = vpop.f32.mrf.mxu1 }
0x19e8   :  { %4282 = vst [vmem:[#allocation32] sm:$0xff] %v4231_v37  ;;  %4284 = vst [vmem:[#allocation32 + $0x10] sm:$0xff] %v4274_v18  ;;  %v4233_v47 = vadd.f32 %v4232_v38, %v4023_v10  ;;  %v4276_v4 = vadd.f32 %v4275_v14, %v4031_v51 }
0x19e9   :  { %v4234_v39 = vpop.f32.mrf.mxu0  ;;  %v4277_v21 = vpop.f32.mrf.mxu1 }
0x19ea   :  { %4283 = vst [vmem:[#allocation32 + $0x8] sm:$0xff] %v4233_v47  ;;  %4285 = vst [vmem:[#allocation32 + $0x18] sm:$0xff] %v4276_v4  ;;  %v4235_v55 = vadd.f32 %v4234_v39, %v4019_v33  ;;  %v4278_v56 = vadd.f32 %v4277_v21, %v4027_v34 }
0x19eb   :  { %v4236_v40 = vpop.f32.mrf.mxu0  ;;  %v4279_v58 = vpop.f32.mrf.mxu1 }
0x19ec   :  { %4286 = vst [vmem:[#allocation32 + $0x20] sm:$0xff] %v4235_v55  ;;  %4288 = vst [vmem:[#allocation32 + $0x30] sm:$0xff] %v4278_v56  ;;  %v4237_v61 = vadd.f32 %v4236_v40, %v4023_v10  ;;  %v4280_v31 = vadd.f32 %v4279_v58, %v4031_v51 }
0x19ee   :  { %4287 = vst [vmem:[#allocation32 + $0x28] sm:$0xff] %v4237_v61  ;;  %4289 = vst [vmem:[#allocation32 + $0x38] sm:$0xff] %v4280_v31 }
0x1a05   :  { %v4401_v41 = vpop.f32.mrf.mxu0 }
0x1a06   :  { %v4402_v19 = vadd.f32 %v4877_v16, %v4401_v41 }
0x1a07   :  { %v5292_v36 = vpop.f32.mrf.mxu0 }
0x1a08   :  { %5812 = vtanh.f32 %v4402_v19 }
0x1a09   :  { %v4404_v11 = vpop.f32.mrf.mxu0 }
0x1a0b   :  { %v5293_v25 = vpop.f32.mrf.mxu0 }
0x1a15   :  { %v5813_v15 = vpop.eup %5812 }
0x1a16   :  { %v4424_v7 = vpack.c.bf16 %v5813_v15, %v5813_v15 }
0x1a18   :  { %5311 = vmatmul.mubr.bf16.vlgmr.msra.gmra.mxu1 %v4424_v7 }
0x1a19   :  { %6207 = shalt.err (!%p6204_p1)
}
0x1a1a   :  { %s6290_s3 = smov 512   ;;  %v4886_v46 = vld [vmem:[#allocation22] ss:$0 sm:$0xff]  ;;  %s6291_s0 = smov [#allocation33]   ;;  %vm4520_vm6 = vcmask 9216  }
0x1a1b   :  { %4533 = dma.vmem_to_hbm [thread:$0]  %s4528_s12, 1024, %s7227_s26, [#allocation4], %s6290_s3, %s6290_s3, %s6288_s15  }
0x1a1c   :  { %s4540_s16 = sshll.u32 %s6291_s0, 4  ;;  %s4541_s16 = int_to_ptr.vmem [resolvable:$true] %s4540_s16 }
0x1a1d   :  { %s6216_s9 = scalar_lea.vmem %s4541_s16, 32  ;;  %p6221_p3 = scmp.lt.s32.totalorder %s4541_s16, %s4541_s16 }
0x1a1e   :  { %p6217_p2 = scmp.ne.s32.totalorder %s4541_s16, %s6216_s9  ;;  %p6222_p4 = scmp.lt.s32.totalorder %s6216_s9, %s6216_s9 }
0x1a20   :  { %p6223_p5 = por %p6222_p4, %p6221_p3 }
0x1a22   :  { %p6224_p6 = pnand %p6223_p5, %p6217_p2 }
0x1ad8   :  { %v4514_v6 = vpop.f32.mrf.mxu1 }
0x1ad9   :  { %v4515_v50 = vadd.f32 %v4886_v46, %v4514_v6 }
0x1ada   :  { %v5312_v42 = vpop.f32.mrf.mxu1 }
0x1adb   :  { %4521 = vst.msk [vmem:[#allocation33] sm:$0x3] %vm4520_vm6, %v4515_v50 }
0x1adc   :  { %v4517_v43 = vpop.f32.mrf.mxu1 }
0x1add   :  { %6227 = shalt.err (!%p6224_p6)
}
0x1ade   :  { %4543 = dma.vmem_to_hbm [thread:$0]  %s4541_s16, 32, %s7228_s27, [#allocation34]   ;;  %v5313_v23 = vpop.f32.mrf.mxu1 }
0x1adf   :  { %6256 = dma.done.wait [#allocation4], 1024  }
0x1ae0   :  { %6257 = vsyncadd [#allocation4], 4294966272 }
0x1ae1   :  { %6258 = dma.done.wait [#allocation34], 32  }
0x1ae2   :  { %6259 = vsyncadd [#allocation34], 4294967264 }
0x1ae3   :  { %4550 = vsyncpa [#allocation3], 1 }
0x1ae4   :  { %4551 = vsyncpa [#allocation6], 1 }
0x1ae5   :  { %4552 = vsyncpa [#allocation9], 1 }
0x1ae6   :  { %4553 = vsyncpa [#allocation12], 1 }
0x1ae7   :  { %4554 = vsyncpa [#allocation15], 1 }
0x1ae8   :  { %4555 = vsyncpa [#allocation18], 1 }
0x1ae9   :  { %4556 = vsyncpa [#allocation21], 1 }
0x1aea   :  { %4557 = vsyncpa [#allocation24], 1 }
0x1aeb   :  { %4558 = vsyncpa [#allocation27], 1 }
0x1aec   :  { %4559 = vsyncpa [#allocation30], 1 }
0x1aed   :  { %4560 = vsyncpa [#allocation4], 1 }
0x1aee   :  { %4561 = vsyncpa [#allocation34], 1 }

</bundles_post_ra>
